<compile_context>
chip_gen: v7x
topology: tpu7x:2x2x1
jax: 0.10.0
libtpu: 0.0.40
codegen_flags: <defaults>
</compile_context>

<pallas_src>
import math

import jax
import jax.numpy as jnp
from jax import lax
from jax.experimental import pallas as pl
from jax.experimental.pallas import tpu as pltpu

B = 2                 # batch
N = 16                # tokens / patches
C = 32                # channel_num[4]
KV = C                # config.KV_sizec (must equal channel_num[4] since emb_all = emb1)
NUM_HEADS = 4
DH = C // NUM_HEADS
LN_EPS = 1e-6         # nn.LayerNorm eps
IN_EPS = 1e-5         # nn.InstanceNorm2d default eps (affine=False, per-sample stats)
NEG_INF = -1e30


def block_kernel(x_ref, y_ref, mask_ref, ln_w_ref, ln_b_ref, wq_ref, wkv_ref,
                 outw_ref, mlp_w_ref, mlp_b_ref, out_ref):
    f32 = jnp.float32
    x = x_ref[...].reshape(B * N, C)          # (B*N, C)
    y = y_ref[...].reshape(B * N, C)
    maskf = mask_ref[...]                     # (C, C) block-diagonal head mask (float)
    neg_off = (1.0 - maskf) * NEG_INF         # "-inf" off the head-diagonal blocks
    inv_blk = 1.0 / float(DH * DH)

    # ---- the four pre-attention LayerNorms: one normalization pass, four affines ----
    xy = jnp.concatenate([x, y], axis=0)                       # (2*B*N, C)
    mu = jnp.mean(xy, axis=-1, keepdims=True)
    var = jnp.mean(jnp.square(xy - mu), axis=-1, keepdims=True)
    hat = (xy - mu) * lax.rsqrt(var + LN_EPS)
    x_hat, y_hat = hat[:B * N], hat[B * N:]

    cx = x_hat * ln_w_ref[0] + ln_b_ref[0]    # attn_norm   -> Q source
    cy = y_hat * ln_w_ref[1] + ln_b_ref[1]    # attn_normd  -> Qd source
    ax = x_hat * ln_w_ref[2] + ln_b_ref[2]    # attn_normx  -> K, V source
    ay = y_hat * ln_w_ref[3] + ln_b_ref[3]    # attn_normy  -> Kd, Vd source

    # ---- head-batched projections (block-diagonal weights, 1/sqrt(KV) folded into Q) ----
    q = jnp.dot(cx, wq_ref[0], preferred_element_type=f32)
    qd = jnp.dot(cy, wq_ref[1], preferred_element_type=f32)
    k = jnp.dot(ax, wkv_ref[0], preferred_element_type=f32)
    v = jnp.dot(ax, wkv_ref[1], preferred_element_type=f32)
    kd = jnp.dot(ay, wkv_ref[2], preferred_element_type=f32)
    vd = jnp.dot(ay, wkv_ref[3], preferred_element_type=f32)

    def channel_attn(qb, kb, vb, ow):
        # S = Q^T K (contract tokens); only the head-diagonal (DH,DH) blocks are used.
        s = lax.dot_general(qb, kb, (((0,), (0,)), ((), ())),
                            preferred_element_type=f32)                       # (C, C)
        # InstanceNorm2d per head block: block sums via mask @ (.) @ mask
        bsum = jnp.dot(maskf, jnp.dot(s, maskf, preferred_element_type=f32),
                       preferred_element_type=f32)
        centered = (s - bsum * inv_blk) * maskf
        bvar = jnp.dot(maskf, jnp.dot(centered * centered, maskf,
                                      preferred_element_type=f32),
                       preferred_element_type=f32) * inv_blk
        normed = centered * lax.rsqrt(bvar + IN_EPS)
        # softmax over the last dim, restricted to the head block
        logits = normed + neg_off
        e = jnp.exp(logits - jnp.max(logits, axis=-1, keepdims=True))
        p = e / jnp.sum(e, axis=-1, keepdims=True)                            # (C, C)
        # context = P @ V^T (contract channels) -> (C, N)
        ctx = lax.dot_general(p, vb, (((1,), (1,)), ((), ())),
                              preferred_element_type=f32)
        # out projection with the torch permute(0,3,2,1)+view interleave folded into
        # the (row-permuted) weight: contract the channel rows -> (N, C)
        return lax.dot_general(ctx, ow, (((0,), (0,)), ((), ())),
                               preferred_element_type=f32)

    ow1 = outw_ref[0]
    owd = outw_ref[1]
    o1_parts, od1_parts = [], []
    for b in range(B):                                  # B=2, unrolled
        rows = slice(b * N, (b + 1) * N)
        o1_parts.append(channel_attn(q[rows], kd[rows], vd[rows], ow1))   # stream 1 x stream d
        od1_parts.append(channel_attn(qd[rows], k[rows], v[rows], owd))   # stream d x stream 1
    o1 = jnp.concatenate(o1_parts, axis=0)              # (B*N, C)
    od1 = jnp.concatenate(od1_parts, axis=0)

    cx1 = x + o1                                        # residual 1
    cy1 = y + od1

    # ---- FFN LayerNorms (stacked) + per-stream MLP + residual 2 ----
    zz = jnp.concatenate([cx1, cy1], axis=0)
    mu2 = jnp.mean(zz, axis=-1, keepdims=True)
    var2 = jnp.mean(jnp.square(zz - mu2), axis=-1, keepdims=True)
    hat2 = (zz - mu2) * lax.rsqrt(var2 + LN_EPS)
    xh = hat2[:B * N] * ln_w_ref[4] + ln_b_ref[4]       # ffn_norm
    yh = hat2[B * N:] * ln_w_ref[5] + ln_b_ref[5]       # ffn_normd

    def mlp(z, s):
        h = jnp.dot(z, mlp_w_ref[s, 0], preferred_element_type=f32) + mlp_b_ref[s, 0]
        h = 0.5 * h * (1.0 + lax.erf(h * (1.0 / math.sqrt(2.0))))   # exact GELU
        return jnp.dot(h, mlp_w_ref[s, 1], preferred_element_type=f32) + mlp_b_ref[s, 1]

    x1 = mlp(xh, 0) + cx1
    y1 = mlp(yh, 1) + cy1

    out_ref[0] = x1.reshape(B, N, C).astype(out_ref.dtype)
    out_ref[1] = y1.reshape(B, N, C).astype(out_ref.dtype)


def _full_spec(shape):
    nd = len(shape)
    return pl.BlockSpec(shape, lambda i, nd=nd: (0,) * nd)


def block_vit_cross(emb1, embd1, packed_params, vis=False):
    """Block_ViT_cross.forward(emb1, embd1) -> (x1, y1, weights)."""
    inputs = (emb1, embd1) + tuple(packed_params)
    out = pl.pallas_call(
        block_kernel,
        grid=(1,),
        in_specs=[_full_spec(a.shape) for a in inputs],
        out_specs=_full_spec((2, B, N, C)),
        out_shape=jax.ShapeDtypeStruct((2, B, N, C), jnp.float32),
        compiler_params=pltpu.CompilerParams(dimension_semantics=("arbitrary",)),
    )(*inputs)
    # TODO(synk): vis=True attention-probability output (mean over heads) is not wired out
    # of the kernel; the module's vis=False path returns None, which is what we return.
    return out[0], out[1], None


def make_torch_params(key):
    """Random weights in the PyTorch module's native layout (nn.Linear weight = (out, in))."""
    ks = jax.random.split(key, 8)

    def w(k, shape, scale):
        return jax.random.normal(k, shape, jnp.float32) * scale

    return {
        # attn_norm, attn_normd, attn_normx, attn_normy, ffn_norm, ffn_normd
        "ln_w": 1.0 + w(ks[0], (6, C), 0.5),
        "ln_b": w(ks[1], (6, C), 0.3),
        "q_heads": w(ks[2], (NUM_HEADS, DH, DH), 0.15),   # query[h].weight
        "qd_heads": w(ks[3], (NUM_HEADS, DH, DH), 0.15),  # queryd[h].weight
        "kv0": w(ks[4], (4, DH, DH), 0.15),               # key[0], value[0], keyd[0], valued[0]
        "out_w": w(ks[5], (2, C, C), 0.15),               # out.weight, outd.weight
        "fc_w": w(ks[6], (2, 2, C, C), 0.1),              # [stream][fc1, fc2].weight
        "fc_b": w(ks[7], (2, 2, C), 0.02),                # [stream][fc1, fc2].bias
    }


def pack_params(p):
    """Fold torch-layout weights into the kernel's head-batched / interleave-folded layout."""
    scale_q = 1.0 / math.sqrt(KV)

    def head_blockdiag(heads, scale):
        m = jnp.zeros((C, C), jnp.float32)
        for h in range(NUM_HEADS):
            m = m.at[h * DH:(h + 1) * DH, h * DH:(h + 1) * DH].set(heads[h].T * scale)
        return m

    eye_h = jnp.eye(NUM_HEADS, dtype=jnp.float32)
    wq = jnp.stack([head_blockdiag(p["q_heads"], scale_q),
                    head_blockdiag(p["qd_heads"], scale_q)], axis=0)           # (2, C, C)
    wkv = jnp.stack([jnp.kron(eye_h, p["kv0"][i].T) for i in range(4)], axis=0)  # (4, C, C)

    # kernel context rows are r = h*DH + d; torch's permute(0,3,2,1)+view feeds input
    # channel d*NUM_HEADS + h to out/outd -> permute the W^T rows accordingly.
    out_t = jnp.transpose(p["out_w"], (0, 2, 1))                               # W^T: (in, out)
    perm = jnp.array([(r % DH) * NUM_HEADS + r // DH for r in range(C)], jnp.int32)
    outw = out_t[:, perm, :]                                                   # (2, C, C)

    mlp_w = jnp.transpose(p["fc_w"], (0, 1, 3, 2))                             # W^T
    rr = jnp.arange(C, dtype=jnp.int32) // DH
    maskf = (rr[:, None] == rr[None, :]).astype(jnp.float32)                   # head-block mask
    return (maskf, p["ln_w"], p["ln_b"], wq, wkv, outw, mlp_w, p["fc_b"])


def reference_forward(emb1, embd1, p):
    """Plain-JAX transcription of Block_ViT_cross.forward (eval mode) for validation."""
    hp = "highest"

    def ln(z, w, b):
        m = jnp.mean(z, axis=-1, keepdims=True)
        v = jnp.mean((z - m) ** 2, axis=-1, keepdims=True)
        return (z - m) / jnp.sqrt(v + LN_EPS) * w + b

    cx = ln(emb1, p["ln_w"][0], p["ln_b"][0])
    cy = ln(embd1, p["ln_w"][1], p["ln_b"][1])
    ex = ln(emb1, p["ln_w"][2], p["ln_b"][2])
    ey = ln(embd1, p["ln_w"][3], p["ln_b"][3])

    def split_heads(z, weights, shared):
        outs = []
        for h in range(NUM_HEADS):
            chunk = z[..., h * DH:(h + 1) * DH]
            wgt = weights if shared else weights[h]
            outs.append(jnp.matmul(chunk, wgt.T, precision=hp))
        return jnp.stack(outs, axis=1)                        # (B, H, N, DH)

    Q = split_heads(cx, p["q_heads"], False)
    Qd = split_heads(cy, p["qd_heads"], False)
    K = split_heads(ex, p["kv0"][0], True)
    V = split_heads(ex, p["kv0"][1], True)
    Kd = split_heads(ey, p["kv0"][2], True)
    Vd = split_heads(ey, p["kv0"][3], True)

    def attn(Qh, Kh, Vh, out_w):
        s = jnp.einsum("bhnd,bhne->bhde", Qh, Kh, precision=hp) / math.sqrt(KV)
        m = jnp.mean(s, axis=(-1, -2), keepdims=True)
        v = jnp.mean((s - m) ** 2, axis=(-1, -2), keepdims=True)
        s = (s - m) / jnp.sqrt(v + IN_EPS)                    # InstanceNorm2d (affine=False)
        pr = jax.nn.softmax(s, axis=-1)
        ctx = jnp.einsum("bhde,bhne->bhdn", pr, Vh, precision=hp)        # (B, H, DH, N)
        ctx = jnp.transpose(ctx, (0, 3, 2, 1)).reshape(Qh.shape[0], N, C)  # c = d*H + h
        return jnp.matmul(ctx, out_w.T, precision=hp)

    O1 = attn(Q, Kd, Vd, p["out_w"][0])
    Od1 = attn(Qd, K, V, p["out_w"][1])

    cx1 = emb1 + O1
    cy1 = embd1 + Od1

    def mlp(z, s):
        h = jnp.matmul(z, p["fc_w"][s, 0].T, precision=hp) + p["fc_b"][s, 0]
        h = 0.5 * h * (1.0 + lax.erf(h / math.sqrt(2.0)))
        return jnp.matmul(h, p["fc_w"][s, 1].T, precision=hp) + p["fc_b"][s, 1]

    x1 = mlp(ln(cx1, p["ln_w"][4], p["ln_b"][4]), 0) + cx1
    y1 = mlp(ln(cy1, p["ln_w"][5], p["ln_b"][5]), 1) + cy1
    return x1, y1


if __name__ == "__main__":
    key = jax.random.PRNGKey(0)
    k_emb, k_embd, k_par = jax.random.split(key, 3)
    emb1 = jax.random.normal(k_emb, (B, N, C), jnp.float32)
    embd1 = jax.random.normal(k_embd, (B, N, C), jnp.float32)

    torch_params = make_torch_params(k_par)
    packed = pack_params(torch_params)

    x1, y1, weights = block_vit_cross(emb1, embd1, packed, vis=False)
    jax.block_until_ready((x1, y1))
    assert x1.shape == (B, N, C) and y1.shape == (B, N, C) and weights is None

    # validate against a plain-JAX transcription of the PyTorch forward
    x_ref, y_ref = reference_forward(emb1, embd1, torch_params)
    err = max(float(jnp.max(jnp.abs(x1 - x_ref))), float(jnp.max(jnp.abs(y1 - y_ref))))
    assert err < 5e-3, f"kernel mismatch vs reference: max abs err = {err}"
    print("KERNEL_OK")
</pallas_src>

<mosaic_0001>
module attributes {stable_mosaic.version = 11 : i64} {
  func.func @block_kernel(%arg0: i32, %arg1: memref<2x16x32xf32, #tpu.memory_space<vmem>>, %arg2: memref<2x16x32xf32, #tpu.memory_space<vmem>>, %arg3: memref<32x32xf32, #tpu.memory_space<vmem>>, %arg4: memref<6x32xf32, #tpu.memory_space<vmem>>, %arg5: memref<6x32xf32, #tpu.memory_space<vmem>>, %arg6: memref<2x32x32xf32, #tpu.memory_space<vmem>>, %arg7: memref<4x32x32xf32, #tpu.memory_space<vmem>>, %arg8: memref<2x32x32xf32, #tpu.memory_space<vmem>>, %arg9: memref<2x2x32x32xf32, #tpu.memory_space<vmem>>, %arg10: memref<2x2x32xf32, #tpu.memory_space<vmem>>, %arg11: memref<2x2x16x32xf32, #tpu.memory_space<vmem>>) attributes {dimension_semantics = [#tpu.dimension_semantics<arbitrary>], iteration_bounds = array<i64: 1>, scalar_prefetch = 0 : i64, scratch_operands = 0 : i64, tpu.core_type = #tpu.core_type<tc>, window_params = [{pipeline_mode = #tpu.pipeline_mode<synchronous>, transform_indices = @transform_0, window_bounds = array<i64: 2, 16, 32>}, {pipeline_mode = #tpu.pipeline_mode<synchronous>, transform_indices = @transform_1, window_bounds = array<i64: 2, 16, 32>}, {pipeline_mode = #tpu.pipeline_mode<synchronous>, transform_indices = @transform_2, window_bounds = array<i64: 32, 32>}, {pipeline_mode = #tpu.pipeline_mode<synchronous>, transform_indices = @transform_3, window_bounds = array<i64: 6, 32>}, {pipeline_mode = #tpu.pipeline_mode<synchronous>, transform_indices = @transform_4, window_bounds = array<i64: 6, 32>}, {pipeline_mode = #tpu.pipeline_mode<synchronous>, transform_indices = @transform_5, window_bounds = array<i64: 2, 32, 32>}, {pipeline_mode = #tpu.pipeline_mode<synchronous>, transform_indices = @transform_6, window_bounds = array<i64: 4, 32, 32>}, {pipeline_mode = #tpu.pipeline_mode<synchronous>, transform_indices = @transform_7, window_bounds = array<i64: 2, 32, 32>}, {pipeline_mode = #tpu.pipeline_mode<synchronous>, transform_indices = @transform_8, window_bounds = array<i64: 2, 2, 32, 32>}, {pipeline_mode = #tpu.pipeline_mode<synchronous>, transform_indices = @transform_9, window_bounds = array<i64: 2, 2, 32>}, {pipeline_mode = #tpu.pipeline_mode<synchronous>, transform_indices = @transform_10, window_bounds = array<i64: 2, 2, 16, 32>}]} {
    %c0 = arith.constant 0 : index
    %c0_0 = arith.constant 0 : index
    %c0_1 = arith.constant 0 : index
    %0 = vector.load %arg1[%c0, %c0_0, %c0_1] : memref<2x16x32xf32, #tpu.memory_space<vmem>>, vector<2x16x32xf32>
    %1 = vector.shape_cast %0 : vector<2x16x32xf32> to vector<32x32xf32>
    %c0_2 = arith.constant 0 : index
    %c0_3 = arith.constant 0 : index
    %c0_4 = arith.constant 0 : index
    %2 = vector.load %arg2[%c0_2, %c0_3, %c0_4] : memref<2x16x32xf32, #tpu.memory_space<vmem>>, vector<2x16x32xf32>
    %3 = vector.shape_cast %2 : vector<2x16x32xf32> to vector<32x32xf32>
    %c0_5 = arith.constant 0 : index
    %c0_6 = arith.constant 0 : index
    %4 = vector.load %arg3[%c0_5, %c0_6] : memref<32x32xf32, #tpu.memory_space<vmem>>, vector<32x32xf32>
    %cst = arith.constant 1.000000e+00 : f32
    %5 = vector.broadcast %cst : f32 to vector<32x32xf32>
    %6 = arith.subf %5, %4 : vector<32x32xf32>
    %cst_7 = arith.constant -1.000000e+30 : f32
    %7 = vector.broadcast %cst_7 : f32 to vector<32x32xf32>
    %8 = arith.mulf %6, %7 : vector<32x32xf32>
    %9 = tpu.concatenate %1, %3 in 0 : vector<32x32xf32>, vector<32x32xf32> -> vector<64x32xf32>
    %cst_8 = arith.constant dense<0.000000e+00> : vector<64xf32>
    %10 = vector.multi_reduction <add>, %9, %cst_8 [1] : vector<64x32xf32> to vector<64xf32>
    %11 = vector.shape_cast %10 : vector<64xf32> to vector<64x1xf32>
    %cst_9 = arith.constant 3.200000e+01 : f32
    %12 = vector.broadcast %cst_9 : f32 to vector<64x1xf32>
    %13 = arith.divf %11, %12 : vector<64x1xf32>
    %14 = vector.broadcast %13 : vector<64x1xf32> to vector<64x32xf32>
    %15 = arith.subf %9, %14 : vector<64x32xf32>
    %16 = arith.mulf %15, %15 : vector<64x32xf32>
    %cst_10 = arith.constant dense<0.000000e+00> : vector<64xf32>
    %17 = vector.multi_reduction <add>, %16, %cst_10 [1] : vector<64x32xf32> to vector<64xf32>
    %18 = vector.shape_cast %17 : vector<64xf32> to vector<64x1xf32>
    %cst_11 = arith.constant 3.200000e+01 : f32
    %19 = vector.broadcast %cst_11 : f32 to vector<64x1xf32>
    %20 = arith.divf %18, %19 : vector<64x1xf32>
    %21 = vector.broadcast %13 : vector<64x1xf32> to vector<64x32xf32>
    %22 = arith.subf %9, %21 : vector<64x32xf32>
    %cst_12 = arith.constant 9.99999997E-7 : f32
    %23 = vector.broadcast %cst_12 : f32 to vector<64x1xf32>
    %24 = arith.addf %20, %23 : vector<64x1xf32>
    %25 = math.rsqrt %24 : vector<64x1xf32>
    %26 = vector.broadcast %25 : vector<64x1xf32> to vector<64x32xf32>
    %27 = arith.mulf %22, %26 : vector<64x32xf32>
    %28 = vector.extract_strided_slice %27 {offsets = [0, 0], sizes = [32, 32], strides = [1, 1]} : vector<64x32xf32> to vector<32x32xf32>
    %29 = vector.extract_strided_slice %27 {offsets = [32, 0], sizes = [32, 32], strides = [1, 1]} : vector<64x32xf32> to vector<32x32xf32>
    %c0_13 = arith.constant 0 : index
    %c0_14 = arith.constant 0 : index
    %30 = vector.load %arg4[%c0_13, %c0_14] : memref<6x32xf32, #tpu.memory_space<vmem>>, vector<1x32xf32>
    %31 = vector.shape_cast %30 : vector<1x32xf32> to vector<32xf32>
    %32 = vector.shape_cast %31 : vector<32xf32> to vector<1x32xf32>
    %33 = vector.broadcast %32 : vector<1x32xf32> to vector<32x32xf32>
    %34 = arith.mulf %28, %33 : vector<32x32xf32>
    %c0_15 = arith.constant 0 : index
    %c0_16 = arith.constant 0 : index
    %35 = vector.load %arg5[%c0_15, %c0_16] : memref<6x32xf32, #tpu.memory_space<vmem>>, vector<1x32xf32>
    %36 = vector.shape_cast %35 : vector<1x32xf32> to vector<32xf32>
    %37 = vector.shape_cast %36 : vector<32xf32> to vector<1x32xf32>
    %38 = vector.broadcast %37 : vector<1x32xf32> to vector<32x32xf32>
    %39 = arith.addf %34, %38 : vector<32x32xf32>
    %c1 = arith.constant 1 : index
    %c0_17 = arith.constant 0 : index
    %40 = vector.load %arg4[%c1, %c0_17] : memref<6x32xf32, #tpu.memory_space<vmem>>, vector<1x32xf32>
    %41 = vector.shape_cast %40 : vector<1x32xf32> to vector<32xf32>
    %42 = vector.shape_cast %41 : vector<32xf32> to vector<1x32xf32>
    %43 = vector.broadcast %42 : vector<1x32xf32> to vector<32x32xf32>
    %44 = arith.mulf %29, %43 : vector<32x32xf32>
    %c1_18 = arith.constant 1 : index
    %c0_19 = arith.constant 0 : index
    %45 = vector.load %arg5[%c1_18, %c0_19] : memref<6x32xf32, #tpu.memory_space<vmem>>, vector<1x32xf32>
    %46 = vector.shape_cast %45 : vector<1x32xf32> to vector<32xf32>
    %47 = vector.shape_cast %46 : vector<32xf32> to vector<1x32xf32>
    %48 = vector.broadcast %47 : vector<1x32xf32> to vector<32x32xf32>
    %49 = arith.addf %44, %48 : vector<32x32xf32>
    %c2 = arith.constant 2 : index
    %c0_20 = arith.constant 0 : index
    %50 = vector.load %arg4[%c2, %c0_20] : memref<6x32xf32, #tpu.memory_space<vmem>>, vector<1x32xf32>
    %51 = vector.shape_cast %50 : vector<1x32xf32> to vector<32xf32>
    %52 = vector.shape_cast %51 : vector<32xf32> to vector<1x32xf32>
    %53 = vector.broadcast %52 : vector<1x32xf32> to vector<32x32xf32>
    %54 = arith.mulf %28, %53 : vector<32x32xf32>
    %c2_21 = arith.constant 2 : index
    %c0_22 = arith.constant 0 : index
    %55 = vector.load %arg5[%c2_21, %c0_22] : memref<6x32xf32, #tpu.memory_space<vmem>>, vector<1x32xf32>
    %56 = vector.shape_cast %55 : vector<1x32xf32> to vector<32xf32>
    %57 = vector.shape_cast %56 : vector<32xf32> to vector<1x32xf32>
    %58 = vector.broadcast %57 : vector<1x32xf32> to vector<32x32xf32>
    %59 = arith.addf %54, %58 : vector<32x32xf32>
    %c3 = arith.constant 3 : index
    %c0_23 = arith.constant 0 : index
    %60 = vector.load %arg4[%c3, %c0_23] : memref<6x32xf32, #tpu.memory_space<vmem>>, vector<1x32xf32>
    %61 = vector.shape_cast %60 : vector<1x32xf32> to vector<32xf32>
    %62 = vector.shape_cast %61 : vector<32xf32> to vector<1x32xf32>
    %63 = vector.broadcast %62 : vector<1x32xf32> to vector<32x32xf32>
    %64 = arith.mulf %29, %63 : vector<32x32xf32>
    %c3_24 = arith.constant 3 : index
    %c0_25 = arith.constant 0 : index
    %65 = vector.load %arg5[%c3_24, %c0_25] : memref<6x32xf32, #tpu.memory_space<vmem>>, vector<1x32xf32>
    %66 = vector.shape_cast %65 : vector<1x32xf32> to vector<32xf32>
    %67 = vector.shape_cast %66 : vector<32xf32> to vector<1x32xf32>
    %68 = vector.broadcast %67 : vector<1x32xf32> to vector<32x32xf32>
    %69 = arith.addf %64, %68 : vector<32x32xf32>
    %c0_26 = arith.constant 0 : index
    %c0_27 = arith.constant 0 : index
    %c0_28 = arith.constant 0 : index
    %70 = vector.load %arg6[%c0_26, %c0_27, %c0_28] : memref<2x32x32xf32, #tpu.memory_space<vmem>>, vector<1x32x32xf32>
    %71 = vector.shape_cast %70 : vector<1x32x32xf32> to vector<32x32xf32>
    %cst_29 = arith.constant dense<0.000000e+00> : vector<32x32xf32>
    %72 = tpu.matmul %39, %71, %cst_29 {dimension_numbers = #tpu.dot_dimension_numbers<[1], [0], [0], [1], [0, 0, 1, 1], [], []>} : vector<32x32xf32>, vector<32x32xf32>, vector<32x32xf32> -> vector<32x32xf32>
    %c1_30 = arith.constant 1 : index
    %c0_31 = arith.constant 0 : index
    %c0_32 = arith.constant 0 : index
    %73 = vector.load %arg6[%c1_30, %c0_31, %c0_32] : memref<2x32x32xf32, #tpu.memory_space<vmem>>, vector<1x32x32xf32>
    %74 = vector.shape_cast %73 : vector<1x32x32xf32> to vector<32x32xf32>
    %cst_33 = arith.constant dense<0.000000e+00> : vector<32x32xf32>
    %75 = tpu.matmul %49, %74, %cst_33 {dimension_numbers = #tpu.dot_dimension_numbers<[1], [0], [0], [1], [0, 0, 1, 1], [], []>} : vector<32x32xf32>, vector<32x32xf32>, vector<32x32xf32> -> vector<32x32xf32>
    %c0_34 = arith.constant 0 : index
    %c0_35 = arith.constant 0 : index
    %c0_36 = arith.constant 0 : index
    %76 = vector.load %arg7[%c0_34, %c0_35, %c0_36] : memref<4x32x32xf32, #tpu.memory_space<vmem>>, vector<1x32x32xf32>
    %77 = vector.shape_cast %76 : vector<1x32x32xf32> to vector<32x32xf32>
    %cst_37 = arith.constant dense<0.000000e+00> : vector<32x32xf32>
    %78 = tpu.matmul %59, %77, %cst_37 {dimension_numbers = #tpu.dot_dimension_numbers<[1], [0], [0], [1], [0, 0, 1, 1], [], []>} : vector<32x32xf32>, vector<32x32xf32>, vector<32x32xf32> -> vector<32x32xf32>
    %c1_38 = arith.constant 1 : index
    %c0_39 = arith.constant 0 : index
    %c0_40 = arith.constant 0 : index
    %79 = vector.load %arg7[%c1_38, %c0_39, %c0_40] : memref<4x32x32xf32, #tpu.memory_space<vmem>>, vector<1x32x32xf32>
    %80 = vector.shape_cast %79 : vector<1x32x32xf32> to vector<32x32xf32>
    %cst_41 = arith.constant dense<0.000000e+00> : vector<32x32xf32>
    %81 = tpu.matmul %59, %80, %cst_41 {dimension_numbers = #tpu.dot_dimension_numbers<[1], [0], [0], [1], [0, 0, 1, 1], [], []>} : vector<32x32xf32>, vector<32x32xf32>, vector<32x32xf32> -> vector<32x32xf32>
    %c2_42 = arith.constant 2 : index
    %c0_43 = arith.constant 0 : index
    %c0_44 = arith.constant 0 : index
    %82 = vector.load %arg7[%c2_42, %c0_43, %c0_44] : memref<4x32x32xf32, #tpu.memory_space<vmem>>, vector<1x32x32xf32>
    %83 = vector.shape_cast %82 : vector<1x32x32xf32> to vector<32x32xf32>
    %cst_45 = arith.constant dense<0.000000e+00> : vector<32x32xf32>
    %84 = tpu.matmul %69, %83, %cst_45 {dimension_numbers = #tpu.dot_dimension_numbers<[1], [0], [0], [1], [0, 0, 1, 1], [], []>} : vector<32x32xf32>, vector<32x32xf32>, vector<32x32xf32> -> vector<32x32xf32>
    %c3_46 = arith.constant 3 : index
    %c0_47 = arith.constant 0 : index
    %c0_48 = arith.constant 0 : index
    %85 = vector.load %arg7[%c3_46, %c0_47, %c0_48] : memref<4x32x32xf32, #tpu.memory_space<vmem>>, vector<1x32x32xf32>
    %86 = vector.shape_cast %85 : vector<1x32x32xf32> to vector<32x32xf32>
    %cst_49 = arith.constant dense<0.000000e+00> : vector<32x32xf32>
    %87 = tpu.matmul %69, %86, %cst_49 {dimension_numbers = #tpu.dot_dimension_numbers<[1], [0], [0], [1], [0, 0, 1, 1], [], []>} : vector<32x32xf32>, vector<32x32xf32>, vector<32x32xf32> -> vector<32x32xf32>
    %c0_50 = arith.constant 0 : index
    %c0_51 = arith.constant 0 : index
    %c0_52 = arith.constant 0 : index
    %88 = vector.load %arg8[%c0_50, %c0_51, %c0_52] : memref<2x32x32xf32, #tpu.memory_space<vmem>>, vector<1x32x32xf32>
    %89 = vector.shape_cast %88 : vector<1x32x32xf32> to vector<32x32xf32>
    %c1_53 = arith.constant 1 : index
    %c0_54 = arith.constant 0 : index
    %c0_55 = arith.constant 0 : index
    %90 = vector.load %arg8[%c1_53, %c0_54, %c0_55] : memref<2x32x32xf32, #tpu.memory_space<vmem>>, vector<1x32x32xf32>
    %91 = vector.shape_cast %90 : vector<1x32x32xf32> to vector<32x32xf32>
    %92 = vector.extract_strided_slice %72 {offsets = [0, 0], sizes = [16, 32], strides = [1, 1]} : vector<32x32xf32> to vector<16x32xf32>
    %93 = vector.extract_strided_slice %84 {offsets = [0, 0], sizes = [16, 32], strides = [1, 1]} : vector<32x32xf32> to vector<16x32xf32>
    %94 = vector.extract_strided_slice %87 {offsets = [0, 0], sizes = [16, 32], strides = [1, 1]} : vector<32x32xf32> to vector<16x32xf32>
    %cst_56 = arith.constant dense<0.000000e+00> : vector<32x32xf32>
    %95 = tpu.matmul %92, %93, %cst_56 {dimension_numbers = #tpu.dot_dimension_numbers<[0], [0], [1], [1], [0, 1, 1, 1], [], []>} : vector<16x32xf32>, vector<16x32xf32>, vector<32x32xf32> -> vector<32x32xf32>
    %cst_57 = arith.constant dense<0.000000e+00> : vector<32x32xf32>
    %96 = tpu.matmul %95, %4, %cst_57 {dimension_numbers = #tpu.dot_dimension_numbers<[1], [0], [0], [1], [0, 0, 1, 1], [], []>} : vector<32x32xf32>, vector<32x32xf32>, vector<32x32xf32> -> vector<32x32xf32>
    %cst_58 = arith.constant dense<0.000000e+00> : vector<32x32xf32>
    %97 = tpu.matmul %4, %96, %cst_58 {dimension_numbers = #tpu.dot_dimension_numbers<[1], [0], [0], [1], [0, 0, 1, 1], [], []>} : vector<32x32xf32>, vector<32x32xf32>, vector<32x32xf32> -> vector<32x32xf32>
    %cst_59 = arith.constant 1.562500e-02 : f32
    %98 = vector.broadcast %cst_59 : f32 to vector<32x32xf32>
    %99 = arith.mulf %97, %98 : vector<32x32xf32>
    %100 = arith.subf %95, %99 : vector<32x32xf32>
    %101 = arith.mulf %100, %4 : vector<32x32xf32>
    %102 = arith.mulf %101, %101 : vector<32x32xf32>
    %cst_60 = arith.constant dense<0.000000e+00> : vector<32x32xf32>
    %103 = tpu.matmul %102, %4, %cst_60 {dimension_numbers = #tpu.dot_dimension_numbers<[1], [0], [0], [1], [0, 0, 1, 1], [], []>} : vector<32x32xf32>, vector<32x32xf32>, vector<32x32xf32> -> vector<32x32xf32>
    %cst_61 = arith.constant dense<0.000000e+00> : vector<32x32xf32>
    %104 = tpu.matmul %4, %103, %cst_61 {dimension_numbers = #tpu.dot_dimension_numbers<[1], [0], [0], [1], [0, 0, 1, 1], [], []>} : vector<32x32xf32>, vector<32x32xf32>, vector<32x32xf32> -> vector<32x32xf32>
    %cst_62 = arith.constant 1.562500e-02 : f32
    %105 = vector.broadcast %cst_62 : f32 to vector<32x32xf32>
    %106 = arith.mulf %104, %105 : vector<32x32xf32>
    %cst_63 = arith.constant 9.99999974E-6 : f32
    %107 = vector.broadcast %cst_63 : f32 to vector<32x32xf32>
    %108 = arith.addf %106, %107 : vector<32x32xf32>
    %109 = math.rsqrt %108 : vector<32x32xf32>
    %110 = arith.mulf %101, %109 : vector<32x32xf32>
    %111 = arith.addf %110, %8 : vector<32x32xf32>
    %cst_64 = arith.constant dense<0xFF800000> : vector<32xf32>
    %112 = vector.multi_reduction <maximumf>, %111, %cst_64 [1] : vector<32x32xf32> to vector<32xf32>
    %113 = vector.shape_cast %112 : vector<32xf32> to vector<32x1xf32>
    %114 = vector.broadcast %113 : vector<32x1xf32> to vector<32x32xf32>
    %115 = arith.subf %111, %114 : vector<32x32xf32>
    %116 = math.exp %115 : vector<32x32xf32>
    %cst_65 = arith.constant dense<0.000000e+00> : vector<32xf32>
    %117 = vector.multi_reduction <add>, %116, %cst_65 [1] : vector<32x32xf32> to vector<32xf32>
    %118 = vector.shape_cast %117 : vector<32xf32> to vector<32x1xf32>
    %119 = vector.broadcast %118 : vector<32x1xf32> to vector<32x32xf32>
    %120 = arith.divf %116, %119 : vector<32x32xf32>
    %cst_66 = arith.constant dense<0.000000e+00> : vector<32x16xf32>
    %121 = tpu.matmul %120, %94, %cst_66 {dimension_numbers = #tpu.dot_dimension_numbers<[1], [1], [0], [0], [0, 0, 1, 0], [], []>} : vector<32x32xf32>, vector<16x32xf32>, vector<32x16xf32> -> vector<32x16xf32>
    %cst_67 = arith.constant dense<0.000000e+00> : vector<16x32xf32>
    %122 = tpu.matmul %121, %89, %cst_67 {dimension_numbers = #tpu.dot_dimension_numbers<[0], [0], [1], [1], [0, 1, 1, 1], [], []>} : vector<32x16xf32>, vector<32x32xf32>, vector<16x32xf32> -> vector<16x32xf32>
    %123 = vector.extract_strided_slice %75 {offsets = [0, 0], sizes = [16, 32], strides = [1, 1]} : vector<32x32xf32> to vector<16x32xf32>
    %124 = vector.extract_strided_slice %78 {offsets = [0, 0], sizes = [16, 32], strides = [1, 1]} : vector<32x32xf32> to vector<16x32xf32>
    %125 = vector.extract_strided_slice %81 {offsets = [0, 0], sizes = [16, 32], strides = [1, 1]} : vector<32x32xf32> to vector<16x32xf32>
    %cst_68 = arith.constant dense<0.000000e+00> : vector<32x32xf32>
    %126 = tpu.matmul %123, %124, %cst_68 {dimension_numbers = #tpu.dot_dimension_numbers<[0], [0], [1], [1], [0, 1, 1, 1], [], []>} : vector<16x32xf32>, vector<16x32xf32>, vector<32x32xf32> -> vector<32x32xf32>
    %cst_69 = arith.constant dense<0.000000e+00> : vector<32x32xf32>
    %127 = tpu.matmul %126, %4, %cst_69 {dimension_numbers = #tpu.dot_dimension_numbers<[1], [0], [0], [1], [0, 0, 1, 1], [], []>} : vector<32x32xf32>, vector<32x32xf32>, vector<32x32xf32> -> vector<32x32xf32>
    %cst_70 = arith.constant dense<0.000000e+00> : vector<32x32xf32>
    %128 = tpu.matmul %4, %127, %cst_70 {dimension_numbers = #tpu.dot_dimension_numbers<[1], [0], [0], [1], [0, 0, 1, 1], [], []>} : vector<32x32xf32>, vector<32x32xf32>, vector<32x32xf32> -> vector<32x32xf32>
    %cst_71 = arith.constant 1.562500e-02 : f32
    %129 = vector.broadcast %cst_71 : f32 to vector<32x32xf32>
    %130 = arith.mulf %128, %129 : vector<32x32xf32>
    %131 = arith.subf %126, %130 : vector<32x32xf32>
    %132 = arith.mulf %131, %4 : vector<32x32xf32>
    %133 = arith.mulf %132, %132 : vector<32x32xf32>
    %cst_72 = arith.constant dense<0.000000e+00> : vector<32x32xf32>
    %134 = tpu.matmul %133, %4, %cst_72 {dimension_numbers = #tpu.dot_dimension_numbers<[1], [0], [0], [1], [0, 0, 1, 1], [], []>} : vector<32x32xf32>, vector<32x32xf32>, vector<32x32xf32> -> vector<32x32xf32>
    %cst_73 = arith.constant dense<0.000000e+00> : vector<32x32xf32>
    %135 = tpu.matmul %4, %134, %cst_73 {dimension_numbers = #tpu.dot_dimension_numbers<[1], [0], [0], [1], [0, 0, 1, 1], [], []>} : vector<32x32xf32>, vector<32x32xf32>, vector<32x32xf32> -> vector<32x32xf32>
    %cst_74 = arith.constant 1.562500e-02 : f32
    %136 = vector.broadcast %cst_74 : f32 to vector<32x32xf32>
    %137 = arith.mulf %135, %136 : vector<32x32xf32>
    %cst_75 = arith.constant 9.99999974E-6 : f32
    %138 = vector.broadcast %cst_75 : f32 to vector<32x32xf32>
    %139 = arith.addf %137, %138 : vector<32x32xf32>
    %140 = math.rsqrt %139 : vector<32x32xf32>
    %141 = arith.mulf %132, %140 : vector<32x32xf32>
    %142 = arith.addf %141, %8 : vector<32x32xf32>
    %cst_76 = arith.constant dense<0xFF800000> : vector<32xf32>
    %143 = vector.multi_reduction <maximumf>, %142, %cst_76 [1] : vector<32x32xf32> to vector<32xf32>
    %144 = vector.shape_cast %143 : vector<32xf32> to vector<32x1xf32>
    %145 = vector.broadcast %144 : vector<32x1xf32> to vector<32x32xf32>
    %146 = arith.subf %142, %145 : vector<32x32xf32>
    %147 = math.exp %146 : vector<32x32xf32>
    %cst_77 = arith.constant dense<0.000000e+00> : vector<32xf32>
    %148 = vector.multi_reduction <add>, %147, %cst_77 [1] : vector<32x32xf32> to vector<32xf32>
    %149 = vector.shape_cast %148 : vector<32xf32> to vector<32x1xf32>
    %150 = vector.broadcast %149 : vector<32x1xf32> to vector<32x32xf32>
    %151 = arith.divf %147, %150 : vector<32x32xf32>
    %cst_78 = arith.constant dense<0.000000e+00> : vector<32x16xf32>
    %152 = tpu.matmul %151, %125, %cst_78 {dimension_numbers = #tpu.dot_dimension_numbers<[1], [1], [0], [0], [0, 0, 1, 0], [], []>} : vector<32x32xf32>, vector<16x32xf32>, vector<32x16xf32> -> vector<32x16xf32>
    %cst_79 = arith.constant dense<0.000000e+00> : vector<16x32xf32>
    %153 = tpu.matmul %152, %91, %cst_79 {dimension_numbers = #tpu.dot_dimension_numbers<[0], [0], [1], [1], [0, 1, 1, 1], [], []>} : vector<32x16xf32>, vector<32x32xf32>, vector<16x32xf32> -> vector<16x32xf32>
    %154 = vector.extract_strided_slice %72 {offsets = [16, 0], sizes = [16, 32], strides = [1, 1]} : vector<32x32xf32> to vector<16x32xf32>
    %155 = vector.extract_strided_slice %84 {offsets = [16, 0], sizes = [16, 32], strides = [1, 1]} : vector<32x32xf32> to vector<16x32xf32>
    %156 = vector.extract_strided_slice %87 {offsets = [16, 0], sizes = [16, 32], strides = [1, 1]} : vector<32x32xf32> to vector<16x32xf32>
    %cst_80 = arith.constant dense<0.000000e+00> : vector<32x32xf32>
    %157 = tpu.matmul %154, %155, %cst_80 {dimension_numbers = #tpu.dot_dimension_numbers<[0], [0], [1], [1], [0, 1, 1, 1], [], []>} : vector<16x32xf32>, vector<16x32xf32>, vector<32x32xf32> -> vector<32x32xf32>
    %cst_81 = arith.constant dense<0.000000e+00> : vector<32x32xf32>
    %158 = tpu.matmul %157, %4, %cst_81 {dimension_numbers = #tpu.dot_dimension_numbers<[1], [0], [0], [1], [0, 0, 1, 1], [], []>} : vector<32x32xf32>, vector<32x32xf32>, vector<32x32xf32> -> vector<32x32xf32>
    %cst_82 = arith.constant dense<0.000000e+00> : vector<32x32xf32>
    %159 = tpu.matmul %4, %158, %cst_82 {dimension_numbers = #tpu.dot_dimension_numbers<[1], [0], [0], [1], [0, 0, 1, 1], [], []>} : vector<32x32xf32>, vector<32x32xf32>, vector<32x32xf32> -> vector<32x32xf32>
    %cst_83 = arith.constant 1.562500e-02 : f32
    %160 = vector.broadcast %cst_83 : f32 to vector<32x32xf32>
    %161 = arith.mulf %159, %160 : vector<32x32xf32>
    %162 = arith.subf %157, %161 : vector<32x32xf32>
    %163 = arith.mulf %162, %4 : vector<32x32xf32>
    %164 = arith.mulf %163, %163 : vector<32x32xf32>
    %cst_84 = arith.constant dense<0.000000e+00> : vector<32x32xf32>
    %165 = tpu.matmul %164, %4, %cst_84 {dimension_numbers = #tpu.dot_dimension_numbers<[1], [0], [0], [1], [0, 0, 1, 1], [], []>} : vector<32x32xf32>, vector<32x32xf32>, vector<32x32xf32> -> vector<32x32xf32>
    %cst_85 = arith.constant dense<0.000000e+00> : vector<32x32xf32>
    %166 = tpu.matmul %4, %165, %cst_85 {dimension_numbers = #tpu.dot_dimension_numbers<[1], [0], [0], [1], [0, 0, 1, 1], [], []>} : vector<32x32xf32>, vector<32x32xf32>, vector<32x32xf32> -> vector<32x32xf32>
    %cst_86 = arith.constant 1.562500e-02 : f32
    %167 = vector.broadcast %cst_86 : f32 to vector<32x32xf32>
    %168 = arith.mulf %166, %167 : vector<32x32xf32>
    %cst_87 = arith.constant 9.99999974E-6 : f32
    %169 = vector.broadcast %cst_87 : f32 to vector<32x32xf32>
    %170 = arith.addf %168, %169 : vector<32x32xf32>
    %171 = math.rsqrt %170 : vector<32x32xf32>
    %172 = arith.mulf %163, %171 : vector<32x32xf32>
    %173 = arith.addf %172, %8 : vector<32x32xf32>
    %cst_88 = arith.constant dense<0xFF800000> : vector<32xf32>
    %174 = vector.multi_reduction <maximumf>, %173, %cst_88 [1] : vector<32x32xf32> to vector<32xf32>
    %175 = vector.shape_cast %174 : vector<32xf32> to vector<32x1xf32>
    %176 = vector.broadcast %175 : vector<32x1xf32> to vector<32x32xf32>
    %177 = arith.subf %173, %176 : vector<32x32xf32>
    %178 = math.exp %177 : vector<32x32xf32>
    %cst_89 = arith.constant dense<0.000000e+00> : vector<32xf32>
    %179 = vector.multi_reduction <add>, %178, %cst_89 [1] : vector<32x32xf32> to vector<32xf32>
    %180 = vector.shape_cast %179 : vector<32xf32> to vector<32x1xf32>
    %181 = vector.broadcast %180 : vector<32x1xf32> to vector<32x32xf32>
    %182 = arith.divf %178, %181 : vector<32x32xf32>
    %cst_90 = arith.constant dense<0.000000e+00> : vector<32x16xf32>
    %183 = tpu.matmul %182, %156, %cst_90 {dimension_numbers = #tpu.dot_dimension_numbers<[1], [1], [0], [0], [0, 0, 1, 0], [], []>} : vector<32x32xf32>, vector<16x32xf32>, vector<32x16xf32> -> vector<32x16xf32>
    %cst_91 = arith.constant dense<0.000000e+00> : vector<16x32xf32>
    %184 = tpu.matmul %183, %89, %cst_91 {dimension_numbers = #tpu.dot_dimension_numbers<[0], [0], [1], [1], [0, 1, 1, 1], [], []>} : vector<32x16xf32>, vector<32x32xf32>, vector<16x32xf32> -> vector<16x32xf32>
    %185 = vector.extract_strided_slice %75 {offsets = [16, 0], sizes = [16, 32], strides = [1, 1]} : vector<32x32xf32> to vector<16x32xf32>
    %186 = vector.extract_strided_slice %78 {offsets = [16, 0], sizes = [16, 32], strides = [1, 1]} : vector<32x32xf32> to vector<16x32xf32>
    %187 = vector.extract_strided_slice %81 {offsets = [16, 0], sizes = [16, 32], strides = [1, 1]} : vector<32x32xf32> to vector<16x32xf32>
    %cst_92 = arith.constant dense<0.000000e+00> : vector<32x32xf32>
    %188 = tpu.matmul %185, %186, %cst_92 {dimension_numbers = #tpu.dot_dimension_numbers<[0], [0], [1], [1], [0, 1, 1, 1], [], []>} : vector<16x32xf32>, vector<16x32xf32>, vector<32x32xf32> -> vector<32x32xf32>
    %cst_93 = arith.constant dense<0.000000e+00> : vector<32x32xf32>
    %189 = tpu.matmul %188, %4, %cst_93 {dimension_numbers = #tpu.dot_dimension_numbers<[1], [0], [0], [1], [0, 0, 1, 1], [], []>} : vector<32x32xf32>, vector<32x32xf32>, vector<32x32xf32> -> vector<32x32xf32>
    %cst_94 = arith.constant dense<0.000000e+00> : vector<32x32xf32>
    %190 = tpu.matmul %4, %189, %cst_94 {dimension_numbers = #tpu.dot_dimension_numbers<[1], [0], [0], [1], [0, 0, 1, 1], [], []>} : vector<32x32xf32>, vector<32x32xf32>, vector<32x32xf32> -> vector<32x32xf32>
    %cst_95 = arith.constant 1.562500e-02 : f32
    %191 = vector.broadcast %cst_95 : f32 to vector<32x32xf32>
    %192 = arith.mulf %190, %191 : vector<32x32xf32>
    %193 = arith.subf %188, %192 : vector<32x32xf32>
    %194 = arith.mulf %193, %4 : vector<32x32xf32>
    %195 = arith.mulf %194, %194 : vector<32x32xf32>
    %cst_96 = arith.constant dense<0.000000e+00> : vector<32x32xf32>
    %196 = tpu.matmul %195, %4, %cst_96 {dimension_numbers = #tpu.dot_dimension_numbers<[1], [0], [0], [1], [0, 0, 1, 1], [], []>} : vector<32x32xf32>, vector<32x32xf32>, vector<32x32xf32> -> vector<32x32xf32>
    %cst_97 = arith.constant dense<0.000000e+00> : vector<32x32xf32>
    %197 = tpu.matmul %4, %196, %cst_97 {dimension_numbers = #tpu.dot_dimension_numbers<[1], [0], [0], [1], [0, 0, 1, 1], [], []>} : vector<32x32xf32>, vector<32x32xf32>, vector<32x32xf32> -> vector<32x32xf32>
    %cst_98 = arith.constant 1.562500e-02 : f32
    %198 = vector.broadcast %cst_98 : f32 to vector<32x32xf32>
    %199 = arith.mulf %197, %198 : vector<32x32xf32>
    %cst_99 = arith.constant 9.99999974E-6 : f32
    %200 = vector.broadcast %cst_99 : f32 to vector<32x32xf32>
    %201 = arith.addf %199, %200 : vector<32x32xf32>
    %202 = math.rsqrt %201 : vector<32x32xf32>
    %203 = arith.mulf %194, %202 : vector<32x32xf32>
    %204 = arith.addf %203, %8 : vector<32x32xf32>
    %cst_100 = arith.constant dense<0xFF800000> : vector<32xf32>
    %205 = vector.multi_reduction <maximumf>, %204, %cst_100 [1] : vector<32x32xf32> to vector<32xf32>
    %206 = vector.shape_cast %205 : vector<32xf32> to vector<32x1xf32>
    %207 = vector.broadcast %206 : vector<32x1xf32> to vector<32x32xf32>
    %208 = arith.subf %204, %207 : vector<32x32xf32>
    %209 = math.exp %208 : vector<32x32xf32>
    %cst_101 = arith.constant dense<0.000000e+00> : vector<32xf32>
    %210 = vector.multi_reduction <add>, %209, %cst_101 [1] : vector<32x32xf32> to vector<32xf32>
    %211 = vector.shape_cast %210 : vector<32xf32> to vector<32x1xf32>
    %212 = vector.broadcast %211 : vector<32x1xf32> to vector<32x32xf32>
    %213 = arith.divf %209, %212 : vector<32x32xf32>
    %cst_102 = arith.constant dense<0.000000e+00> : vector<32x16xf32>
    %214 = tpu.matmul %213, %187, %cst_102 {dimension_numbers = #tpu.dot_dimension_numbers<[1], [1], [0], [0], [0, 0, 1, 0], [], []>} : vector<32x32xf32>, vector<16x32xf32>, vector<32x16xf32> -> vector<32x16xf32>
    %cst_103 = arith.constant dense<0.000000e+00> : vector<16x32xf32>
    %215 = tpu.matmul %214, %91, %cst_103 {dimension_numbers = #tpu.dot_dimension_numbers<[0], [0], [1], [1], [0, 1, 1, 1], [], []>} : vector<32x16xf32>, vector<32x32xf32>, vector<16x32xf32> -> vector<16x32xf32>
    %216 = tpu.concatenate %122, %184 in 0 : vector<16x32xf32>, vector<16x32xf32> -> vector<32x32xf32>
    %217 = tpu.concatenate %153, %215 in 0 : vector<16x32xf32>, vector<16x32xf32> -> vector<32x32xf32>
    %218 = arith.addf %1, %216 : vector<32x32xf32>
    %219 = arith.addf %3, %217 : vector<32x32xf32>
    %220 = tpu.concatenate %218, %219 in 0 : vector<32x32xf32>, vector<32x32xf32> -> vector<64x32xf32>
    %cst_104 = arith.constant dense<0.000000e+00> : vector<64xf32>
    %221 = vector.multi_reduction <add>, %220, %cst_104 [1] : vector<64x32xf32> to vector<64xf32>
    %222 = vector.shape_cast %221 : vector<64xf32> to vector<64x1xf32>
    %cst_105 = arith.constant 3.200000e+01 : f32
    %223 = vector.broadcast %cst_105 : f32 to vector<64x1xf32>
    %224 = arith.divf %222, %223 : vector<64x1xf32>
    %225 = vector.broadcast %224 : vector<64x1xf32> to vector<64x32xf32>
    %226 = arith.subf %220, %225 : vector<64x32xf32>
    %227 = arith.mulf %226, %226 : vector<64x32xf32>
    %cst_106 = arith.constant dense<0.000000e+00> : vector<64xf32>
    %228 = vector.multi_reduction <add>, %227, %cst_106 [1] : vector<64x32xf32> to vector<64xf32>
    %229 = vector.shape_cast %228 : vector<64xf32> to vector<64x1xf32>
    %cst_107 = arith.constant 3.200000e+01 : f32
    %230 = vector.broadcast %cst_107 : f32 to vector<64x1xf32>
    %231 = arith.divf %229, %230 : vector<64x1xf32>
    %232 = vector.broadcast %224 : vector<64x1xf32> to vector<64x32xf32>
    %233 = arith.subf %220, %232 : vector<64x32xf32>
    %cst_108 = arith.constant 9.99999997E-7 : f32
    %234 = vector.broadcast %cst_108 : f32 to vector<64x1xf32>
    %235 = arith.addf %231, %234 : vector<64x1xf32>
    %236 = math.rsqrt %235 : vector<64x1xf32>
    %237 = vector.broadcast %236 : vector<64x1xf32> to vector<64x32xf32>
    %238 = arith.mulf %233, %237 : vector<64x32xf32>
    %239 = vector.extract_strided_slice %238 {offsets = [0, 0], sizes = [32, 32], strides = [1, 1]} : vector<64x32xf32> to vector<32x32xf32>
    %c4 = arith.constant 4 : index
    %c0_109 = arith.constant 0 : index
    %240 = vector.load %arg4[%c4, %c0_109] : memref<6x32xf32, #tpu.memory_space<vmem>>, vector<1x32xf32>
    %241 = vector.shape_cast %240 : vector<1x32xf32> to vector<32xf32>
    %242 = vector.shape_cast %241 : vector<32xf32> to vector<1x32xf32>
    %243 = vector.broadcast %242 : vector<1x32xf32> to vector<32x32xf32>
    %244 = arith.mulf %239, %243 : vector<32x32xf32>
    %c4_110 = arith.constant 4 : index
    %c0_111 = arith.constant 0 : index
    %245 = vector.load %arg5[%c4_110, %c0_111] : memref<6x32xf32, #tpu.memory_space<vmem>>, vector<1x32xf32>
    %246 = vector.shape_cast %245 : vector<1x32xf32> to vector<32xf32>
    %247 = vector.shape_cast %246 : vector<32xf32> to vector<1x32xf32>
    %248 = vector.broadcast %247 : vector<1x32xf32> to vector<32x32xf32>
    %249 = arith.addf %244, %248 : vector<32x32xf32>
    %250 = vector.extract_strided_slice %238 {offsets = [32, 0], sizes = [32, 32], strides = [1, 1]} : vector<64x32xf32> to vector<32x32xf32>
    %c5 = arith.constant 5 : index
    %c0_112 = arith.constant 0 : index
    %251 = vector.load %arg4[%c5, %c0_112] : memref<6x32xf32, #tpu.memory_space<vmem>>, vector<1x32xf32>
    %252 = vector.shape_cast %251 : vector<1x32xf32> to vector<32xf32>
    %253 = vector.shape_cast %252 : vector<32xf32> to vector<1x32xf32>
    %254 = vector.broadcast %253 : vector<1x32xf32> to vector<32x32xf32>
    %255 = arith.mulf %250, %254 : vector<32x32xf32>
    %c5_113 = arith.constant 5 : index
    %c0_114 = arith.constant 0 : index
    %256 = vector.load %arg5[%c5_113, %c0_114] : memref<6x32xf32, #tpu.memory_space<vmem>>, vector<1x32xf32>
    %257 = vector.shape_cast %256 : vector<1x32xf32> to vector<32xf32>
    %258 = vector.shape_cast %257 : vector<32xf32> to vector<1x32xf32>
    %259 = vector.broadcast %258 : vector<1x32xf32> to vector<32x32xf32>
    %260 = arith.addf %255, %259 : vector<32x32xf32>
    %c0_115 = arith.constant 0 : index
    %c0_116 = arith.constant 0 : index
    %c0_117 = arith.constant 0 : index
    %c0_118 = arith.constant 0 : index
    %261 = vector.load %arg9[%c0_115, %c0_116, %c0_117, %c0_118] : memref<2x2x32x32xf32, #tpu.memory_space<vmem>>, vector<1x1x32x32xf32>
    %262 = vector.shape_cast %261 : vector<1x1x32x32xf32> to vector<32x32xf32>
    %cst_119 = arith.constant dense<0.000000e+00> : vector<32x32xf32>
    %263 = tpu.matmul %249, %262, %cst_119 {dimension_numbers = #tpu.dot_dimension_numbers<[1], [0], [0], [1], [0, 0, 1, 1], [], []>} : vector<32x32xf32>, vector<32x32xf32>, vector<32x32xf32> -> vector<32x32xf32>
    %c0_120 = arith.constant 0 : index
    %c0_121 = arith.constant 0 : index
    %c0_122 = arith.constant 0 : index
    %264 = vector.load %arg10[%c0_120, %c0_121, %c0_122] : memref<2x2x32xf32, #tpu.memory_space<vmem>>, vector<1x1x32xf32>
    %265 = vector.shape_cast %264 : vector<1x1x32xf32> to vector<32xf32>
    %266 = vector.shape_cast %265 : vector<32xf32> to vector<1x32xf32>
    %267 = vector.broadcast %266 : vector<1x32xf32> to vector<32x32xf32>
    %268 = arith.addf %263, %267 : vector<32x32xf32>
    %cst_123 = arith.constant 5.000000e-01 : f32
    %269 = vector.broadcast %cst_123 : f32 to vector<32x32xf32>
    %270 = arith.mulf %269, %268 : vector<32x32xf32>
    %cst_124 = arith.constant 0.707106769 : f32
    %271 = vector.broadcast %cst_124 : f32 to vector<32x32xf32>
    %272 = arith.mulf %268, %271 : vector<32x32xf32>
    %273 = math.erf %272 : vector<32x32xf32>
    %cst_125 = arith.constant 1.000000e+00 : f32
    %274 = vector.broadcast %cst_125 : f32 to vector<32x32xf32>
    %275 = arith.addf %274, %273 : vector<32x32xf32>
    %276 = arith.mulf %270, %275 : vector<32x32xf32>
    %c0_126 = arith.constant 0 : index
    %c1_127 = arith.constant 1 : index
    %c0_128 = arith.constant 0 : index
    %c0_129 = arith.constant 0 : index
    %277 = vector.load %arg9[%c0_126, %c1_127, %c0_128, %c0_129] : memref<2x2x32x32xf32, #tpu.memory_space<vmem>>, vector<1x1x32x32xf32>
    %278 = vector.shape_cast %277 : vector<1x1x32x32xf32> to vector<32x32xf32>
    %cst_130 = arith.constant dense<0.000000e+00> : vector<32x32xf32>
    %279 = tpu.matmul %276, %278, %cst_130 {dimension_numbers = #tpu.dot_dimension_numbers<[1], [0], [0], [1], [0, 0, 1, 1], [], []>} : vector<32x32xf32>, vector<32x32xf32>, vector<32x32xf32> -> vector<32x32xf32>
    %c0_131 = arith.constant 0 : index
    %c1_132 = arith.constant 1 : index
    %c0_133 = arith.constant 0 : index
    %280 = vector.load %arg10[%c0_131, %c1_132, %c0_133] : memref<2x2x32xf32, #tpu.memory_space<vmem>>, vector<1x1x32xf32>
    %281 = vector.shape_cast %280 : vector<1x1x32xf32> to vector<32xf32>
    %282 = vector.shape_cast %281 : vector<32xf32> to vector<1x32xf32>
    %283 = vector.broadcast %282 : vector<1x32xf32> to vector<32x32xf32>
    %284 = arith.addf %279, %283 : vector<32x32xf32>
    %285 = arith.addf %284, %218 : vector<32x32xf32>
    %c1_134 = arith.constant 1 : index
    %c0_135 = arith.constant 0 : index
    %c0_136 = arith.constant 0 : index
    %c0_137 = arith.constant 0 : index
    %286 = vector.load %arg9[%c1_134, %c0_135, %c0_136, %c0_137] : memref<2x2x32x32xf32, #tpu.memory_space<vmem>>, vector<1x1x32x32xf32>
    %287 = vector.shape_cast %286 : vector<1x1x32x32xf32> to vector<32x32xf32>
    %cst_138 = arith.constant dense<0.000000e+00> : vector<32x32xf32>
    %288 = tpu.matmul %260, %287, %cst_138 {dimension_numbers = #tpu.dot_dimension_numbers<[1], [0], [0], [1], [0, 0, 1, 1], [], []>} : vector<32x32xf32>, vector<32x32xf32>, vector<32x32xf32> -> vector<32x32xf32>
    %c1_139 = arith.constant 1 : index
    %c0_140 = arith.constant 0 : index
    %c0_141 = arith.constant 0 : index
    %289 = vector.load %arg10[%c1_139, %c0_140, %c0_141] : memref<2x2x32xf32, #tpu.memory_space<vmem>>, vector<1x1x32xf32>
    %290 = vector.shape_cast %289 : vector<1x1x32xf32> to vector<32xf32>
    %291 = vector.shape_cast %290 : vector<32xf32> to vector<1x32xf32>
    %292 = vector.broadcast %291 : vector<1x32xf32> to vector<32x32xf32>
    %293 = arith.addf %288, %292 : vector<32x32xf32>
    %cst_142 = arith.constant 5.000000e-01 : f32
    %294 = vector.broadcast %cst_142 : f32 to vector<32x32xf32>
    %295 = arith.mulf %294, %293 : vector<32x32xf32>
    %cst_143 = arith.constant 0.707106769 : f32
    %296 = vector.broadcast %cst_143 : f32 to vector<32x32xf32>
    %297 = arith.mulf %293, %296 : vector<32x32xf32>
    %298 = math.erf %297 : vector<32x32xf32>
    %cst_144 = arith.constant 1.000000e+00 : f32
    %299 = vector.broadcast %cst_144 : f32 to vector<32x32xf32>
    %300 = arith.addf %299, %298 : vector<32x32xf32>
    %301 = arith.mulf %295, %300 : vector<32x32xf32>
    %c1_145 = arith.constant 1 : index
    %c1_146 = arith.constant 1 : index
    %c0_147 = arith.constant 0 : index
    %c0_148 = arith.constant 0 : index
    %302 = vector.load %arg9[%c1_145, %c1_146, %c0_147, %c0_148] : memref<2x2x32x32xf32, #tpu.memory_space<vmem>>, vector<1x1x32x32xf32>
    %303 = vector.shape_cast %302 : vector<1x1x32x32xf32> to vector<32x32xf32>
    %cst_149 = arith.constant dense<0.000000e+00> : vector<32x32xf32>
    %304 = tpu.matmul %301, %303, %cst_149 {dimension_numbers = #tpu.dot_dimension_numbers<[1], [0], [0], [1], [0, 0, 1, 1], [], []>} : vector<32x32xf32>, vector<32x32xf32>, vector<32x32xf32> -> vector<32x32xf32>
    %c1_150 = arith.constant 1 : index
    %c1_151 = arith.constant 1 : index
    %c0_152 = arith.constant 0 : index
    %305 = vector.load %arg10[%c1_150, %c1_151, %c0_152] : memref<2x2x32xf32, #tpu.memory_space<vmem>>, vector<1x1x32xf32>
    %306 = vector.shape_cast %305 : vector<1x1x32xf32> to vector<32xf32>
    %307 = vector.shape_cast %306 : vector<32xf32> to vector<1x32xf32>
    %308 = vector.broadcast %307 : vector<1x32xf32> to vector<32x32xf32>
    %309 = arith.addf %304, %308 : vector<32x32xf32>
    %310 = arith.addf %309, %219 : vector<32x32xf32>
    %311 = vector.shape_cast %285 : vector<32x32xf32> to vector<2x16x32xf32>
    %c0_153 = arith.constant 0 : index
    %c0_154 = arith.constant 0 : index
    %c0_155 = arith.constant 0 : index
    %c0_156 = arith.constant 0 : index
    %312 = vector.load %arg11[%c0_153, %c0_154, %c0_155, %c0_156] : memref<2x2x16x32xf32, #tpu.memory_space<vmem>>, vector<1x2x16x32xf32>
    %313 = vector.shape_cast %312 : vector<1x2x16x32xf32> to vector<2x16x32xf32>
    %314 = vector.shape_cast %311 : vector<2x16x32xf32> to vector<1x2x16x32xf32>
    tpu.vector_store %arg11[%c0_153, %c0_154, %c0_155, %c0_156], %314 {strides = array<i32>} : memref<2x2x16x32xf32, #tpu.memory_space<vmem>>, vector<1x2x16x32xf32>,
    %315 = vector.shape_cast %310 : vector<32x32xf32> to vector<2x16x32xf32>
    %c1_157 = arith.constant 1 : index
    %c0_158 = arith.constant 0 : index
    %c0_159 = arith.constant 0 : index
    %c0_160 = arith.constant 0 : index
    %316 = vector.load %arg11[%c1_157, %c0_158, %c0_159, %c0_160] : memref<2x2x16x32xf32, #tpu.memory_space<vmem>>, vector<1x2x16x32xf32>
    %317 = vector.shape_cast %316 : vector<1x2x16x32xf32> to vector<2x16x32xf32>
    %318 = vector.shape_cast %315 : vector<2x16x32xf32> to vector<1x2x16x32xf32>
    tpu.vector_store %arg11[%c1_157, %c0_158, %c0_159, %c0_160], %318 {strides = array<i32>} : memref<2x2x16x32xf32, #tpu.memory_space<vmem>>, vector<1x2x16x32xf32>,
    return
  }
  func.func @transform_0(%arg0: i32) -> (i32, i32, i32) {
    %c0_i32 = arith.constant 0 : i32
    %c0_i32_0 = arith.constant 0 : i32
    %c0_i32_1 = arith.constant 0 : i32
    %c0_i32_2 = arith.constant 0 : i32
    return %c0_i32, %c0_i32_0, %c0_i32_1 : i32, i32, i32
  }
  func.func @transform_1(%arg0: i32) -> (i32, i32, i32) {
    %c0_i32 = arith.constant 0 : i32
    %c0_i32_0 = arith.constant 0 : i32
    %c0_i32_1 = arith.constant 0 : i32
    %c0_i32_2 = arith.constant 0 : i32
    return %c0_i32, %c0_i32_0, %c0_i32_1 : i32, i32, i32
  }
  func.func @transform_2(%arg0: i32) -> (i32, i32) {
    %c0_i32 = arith.constant 0 : i32
    %c0_i32_0 = arith.constant 0 : i32
    %c0_i32_1 = arith.constant 0 : i32
    return %c0_i32, %c0_i32_0 : i32, i32
  }
  func.func @transform_3(%arg0: i32) -> (i32, i32) {
    %c0_i32 = arith.constant 0 : i32
    %c0_i32_0 = arith.constant 0 : i32
    %c0_i32_1 = arith.constant 0 : i32
    return %c0_i32, %c0_i32_0 : i32, i32
  }
  func.func @transform_4(%arg0: i32) -> (i32, i32) {
    %c0_i32 = arith.constant 0 : i32
    %c0_i32_0 = arith.constant 0 : i32
    %c0_i32_1 = arith.constant 0 : i32
    return %c0_i32, %c0_i32_0 : i32, i32
  }
  func.func @transform_5(%arg0: i32) -> (i32, i32, i32) {
    %c0_i32 = arith.constant 0 : i32
    %c0_i32_0 = arith.constant 0 : i32
    %c0_i32_1 = arith.constant 0 : i32
    %c0_i32_2 = arith.constant 0 : i32
    return %c0_i32, %c0_i32_0, %c0_i32_1 : i32, i32, i32
  }
  func.func @transform_6(%arg0: i32) -> (i32, i32, i32) {
    %c0_i32 = arith.constant 0 : i32
    %c0_i32_0 = arith.constant 0 : i32
    %c0_i32_1 = arith.constant 0 : i32
    %c0_i32_2 = arith.constant 0 : i32
    return %c0_i32, %c0_i32_0, %c0_i32_1 : i32, i32, i32
  }
  func.func @transform_7(%arg0: i32) -> (i32, i32, i32) {
    %c0_i32 = arith.constant 0 : i32
    %c0_i32_0 = arith.constant 0 : i32
    %c0_i32_1 = arith.constant 0 : i32
    %c0_i32_2 = arith.constant 0 : i32
    return %c0_i32, %c0_i32_0, %c0_i32_1 : i32, i32, i32
  }
  func.func @transform_8(%arg0: i32) -> (i32, i32, i32, i32) {
    %c0_i32 = arith.constant 0 : i32
    %c0_i32_0 = arith.constant 0 : i32
    %c0_i32_1 = arith.constant 0 : i32
    %c0_i32_2 = arith.constant 0 : i32
    %c0_i32_3 = arith.constant 0 : i32
    return %c0_i32, %c0_i32_0, %c0_i32_1, %c0_i32_2 : i32, i32, i32, i32
  }
  func.func @transform_9(%arg0: i32) -> (i32, i32, i32) {
    %c0_i32 = arith.constant 0 : i32
    %c0_i32_0 = arith.constant 0 : i32
    %c0_i32_1 = arith.constant 0 : i32
    %c0_i32_2 = arith.constant 0 : i32
    return %c0_i32, %c0_i32_0, %c0_i32_1 : i32, i32, i32
  }
  func.func @transform_10(%arg0: i32) -> (i32, i32, i32, i32) {
    %c0_i32 = arith.constant 0 : i32
    %c0_i32_0 = arith.constant 0 : i32
    %c0_i32_1 = arith.constant 0 : i32
    %c0_i32_2 = arith.constant 0 : i32
    %c0_i32_3 = arith.constant 0 : i32
    return %c0_i32, %c0_i32_0, %c0_i32_1, %c0_i32_2 : i32, i32, i32, i32
  }
}

</mosaic_0001>

<bundles_post_ra>
// kernel: tpu_custom_call.1
= control target key start
LH: loop header
LB: loop body
LE: loop exit
PB: predicated region body
PF: predicated region fallthrough
CT: control target
= control target key end

     0   :  { %15 = vsyncpa [#allocation3], 0  ;;  %s7186_s0 = inlined_call_operand.hbm [shape: f32[2,16,32], index: 0, kind: input, shape index: {}]   ;;  %s7187_s1 = inlined_call_operand.hbm [shape: f32[2,16,32], index: 1, kind: input, shape index: {}]   ;;  %s7188_s2 = inlined_call_operand.hbm [shape: f32[32,32], index: 2, kind: input, shape index: {}]   ;;  %s7189_s3 = inlined_call_operand.vmem [shape: f32[6,32], index: 3, kind: input, shape index: {}]   ;;  %s7190_s4 = inlined_call_operand.hbm [shape: f32[6,32], index: 4, kind: input, shape index: {}]   ;;  %s7191_s5 = inlined_call_operand.hbm [shape: f32[2,32,32], index: 5, kind: input, shape index: {}]   ;;  %s7192_s6 = inlined_call_operand.hbm [shape: f32[4,32,32], index: 6, kind: input, shape index: {}]   ;;  %s7193_s7 = inlined_call_operand.hbm [shape: f32[2,32,32], index: 7, kind: input, shape index: {}]   ;;  %s7194_s8 = inlined_call_operand.hbm [shape: f32[2,2,32,32], index: 8, kind: input, shape index: {}]   ;;  %s7195_s9 = inlined_call_operand.vmem [shape: f32[2,2,32], index: 9, kind: input, shape index: {}]   ;;  %s7196_s10 = inlined_call_operand.hbm [shape: f32[2,2,16,32], index: 10, kind: output, shape index: {}]  }
   0x1   :  { %16 = vsyncpa [#allocation6], 0 }
   0x2   :  { %17 = vsyncpa [#allocation9], 0 }
   0x3   :  { %18 = vsyncpa [#allocation12], 0 }
   0x4   :  { %19 = vsyncpa [#allocation15], 0 }
   0x5   :  { %20 = vsyncpa [#allocation4], 0  ;;  %s6355_s13 = smov [#allocation5]   ;;  %s6356_s15 = smov [#allocation8]  }
   0x6   :  { %s38_s14 = sshll.u32 %s6355_s13, 4  ;;  %s65_s16 = sshll.u32 %s6356_s15, 4  ;;  %s39_s14 = int_to_ptr.vmem [resolvable:$true] %s38_s14  ;;  %s66_s16 = int_to_ptr.vmem [resolvable:$true] %s65_s16 }
   0x7   :  { %s6145_s19 = scalar_lea.hbm %s7187_s1, 512 }
   0x8   :  { %p6146_p0 = scmp.ne.s32.totalorder %s7187_s1, %s6145_s19  ;;  %p6149_p1 = scmp.lt.u32.totalorder %s6145_s19, %s7187_s1 }
   0xa   :  { %p6151_p2 = pnand %p6149_p1, %p6146_p0 }
   0xc   :  { %6154 = shalt.err (!%p6151_p2)
}
   0xd   :  { %s6155_s24 = scalar_lea.vmem %s39_s14, 512  ;;  %p6160_p4 = scmp.lt.s32.totalorder %s39_s14, %s39_s14 }
   0xe   :  { %p6156_p3 = scmp.ne.s32.totalorder %s39_s14, %s6155_s24  ;;  %p6161_p5 = scmp.lt.s32.totalorder %s6155_s24, %s6155_s24 }
  0x10   :  { %p6162_p6 = por %p6161_p5, %p6160_p4 }
  0x12   :  { %p6163_p7 = pnand %p6162_p6, %p6156_p3 }
  0x14   :  { %6166 = shalt.err (!%p6163_p7)
}
  0x15   :  { %s6357_s25 = smov 128   ;;  %s6358_s26 = smov 8  }
  0x16   :  { %44 = dma.hbm_to_vmem [thread:$0]  %s7187_s1, 512, %s39_s14, [#allocation6], %s6357_s25, %s6357_s25, %s6358_s26  }
  0x17   :  { %s6167_s11 = scalar_lea.hbm %s7190_s4, 128 }
  0x18   :  { %p6168_p8 = scmp.ne.s32.totalorder %s7190_s4, %s6167_s11  ;;  %p6171_p9 = scmp.lt.u32.totalorder %s6167_s11, %s7190_s4 }
  0x1a   :  { %p6173_p10 = pnand %p6171_p9, %p6168_p8 }
  0x1c   :  { %6176 = shalt.err (!%p6173_p10)
}
  0x1d   :  { %s6177_s18 = scalar_lea.vmem %s66_s16, 128  ;;  %p6182_p12 = scmp.lt.s32.totalorder %s66_s16, %s66_s16 }
  0x1e   :  { %p6178_p11 = scmp.ne.s32.totalorder %s66_s16, %s6177_s18  ;;  %p6183_p13 = scmp.lt.s32.totalorder %s6177_s18, %s6177_s18 }
  0x20   :  { %p6184_p0 = por %p6183_p13, %p6182_p12 }
  0x22   :  { %p6185_p1 = pnand %p6184_p0, %p6178_p11 }
  0x24   :  { %6188 = shalt.err (!%p6185_p1)
}
  0x25   :  { %68 = dma.hbm_to_vmem [thread:$0]  %s7190_s4, 128, %s66_s16, [#allocation9]  }
  0x26   :  { %s6359_s19 = smov [#allocation11]   ;;  %s6360_s21 = smov [#allocation2]  }
  0x27   :  { %s86_s20 = sshll.u32 %s6359_s19, 4  ;;  %s26_s22 = sshll.u32 %s6360_s21, 4  ;;  %s87_s20 = int_to_ptr.vmem [resolvable:$true] %s86_s20  ;;  %s6448_s22 = int_to_ptr.vmem [resolvable:$true] %s26_s22 }
  0x28   :  { %s6189_s27 = scalar_lea.hbm %s7192_s6, 2048 }
  0x29   :  { %p6190_p2 = scmp.ne.s32.totalorder %s7192_s6, %s6189_s27  ;;  %p6193_p3 = scmp.lt.u32.totalorder %s6189_s27, %s7192_s6 }
  0x2b   :  { %p6195_p4 = pnand %p6193_p3, %p6190_p2 }
  0x2d   :  { %6198 = shalt.err (!%p6195_p4)
}
  0x2e   :  { %s6199_s4 = scalar_lea.vmem %s87_s20, 2048  ;;  %p6204_p6 = scmp.lt.s32.totalorder %s87_s20, %s87_s20 }
  0x2f   :  { %p6200_p5 = scmp.ne.s32.totalorder %s87_s20, %s6199_s4  ;;  %p6205_p7 = scmp.lt.s32.totalorder %s6199_s4, %s6199_s4 }
  0x31   :  { %p6206_p8 = por %p6205_p7, %p6204_p6 }
  0x33   :  { %p6207_p9 = pnand %p6206_p8, %p6200_p5 }
  0x35   :  { %6210 = shalt.err (!%p6207_p9)
}
  0x36   :  { %92 = dma.hbm_to_vmem [thread:$0]  %s7192_s6, 2048, %s87_s20, [#allocation12], %s6357_s25, %s6357_s25, %s6358_s26  }
  0x37   :  { %s6211_s17 = scalar_lea.hbm %s7186_s0, 512 }
  0x38   :  { %p6212_p10 = scmp.ne.s32.totalorder %s7186_s0, %s6211_s17  ;;  %p6215_p11 = scmp.lt.u32.totalorder %s6211_s17, %s7186_s0 }
  0x3a   :  { %p6217_p12 = pnand %p6215_p11, %p6212_p10 }
  0x3c   :  { %6220 = shalt.err (!%p6217_p12)
}
  0x3d   :  { %s6221_s21 = scalar_lea.vmem %s6448_s22, 512  ;;  %p6226_p0 = scmp.lt.s32.totalorder %s6448_s22, %s6448_s22 }
  0x3e   :  { %p6222_p13 = scmp.ne.s32.totalorder %s6448_s22, %s6221_s21  ;;  %p6227_p1 = scmp.lt.s32.totalorder %s6221_s21, %s6221_s21 }
  0x40   :  { %p6228_p2 = por %p6227_p1, %p6226_p0 }
  0x42   :  { %p6229_p3 = pnand %p6228_p2, %p6222_p13 }
  0x44   :  { %6232 = shalt.err (!%p6229_p3)
}
  0x45   :  { %32 = dma.hbm_to_vmem [thread:$0]  %s7186_s0, 512, %s6448_s22, [#allocation3], %s6357_s25, %s6357_s25, %s6358_s26  }
  0x46   :  { %s6361_s23 = smov [#allocation7]   ;;  %s6362_s27 = smov [#allocation10]  }
  0x47   :  { %s50_s24 = sshll.u32 %s6361_s23, 4  ;;  %s74_s28 = sshll.u32 %s6362_s27, 4  ;;  %s51_s24 = int_to_ptr.vmem [resolvable:$true] %s50_s24  ;;  %s6485_s28 = int_to_ptr.vmem [resolvable:$true] %s74_s28 }
  0x48   :  { %s6233_s11 = scalar_lea.hbm %s7188_s2, 512 }
  0x49   :  { %p6234_p4 = scmp.ne.s32.totalorder %s7188_s2, %s6233_s11  ;;  %p6237_p5 = scmp.lt.u32.totalorder %s6233_s11, %s7188_s2 }
  0x4b   :  { %p6239_p6 = pnand %p6237_p5, %p6234_p4 }
  0x4d   :  { %6242 = shalt.err (!%p6239_p6)
}
  0x4e   :  { %s6243_s0 = scalar_lea.vmem %s51_s24, 512  ;;  %p6248_p8 = scmp.lt.s32.totalorder %s51_s24, %s51_s24 }
  0x4f   :  { %p6244_p7 = scmp.ne.s32.totalorder %s51_s24, %s6243_s0  ;;  %p6249_p9 = scmp.lt.s32.totalorder %s6243_s0, %s6243_s0 }
  0x51   :  { %p6250_p10 = por %p6249_p9, %p6248_p8 }
  0x53   :  { %p6251_p11 = pnand %p6250_p10, %p6244_p7 }
  0x55   :  { %6254 = shalt.err (!%p6251_p11)
}
  0x56   :  { %56 = dma.hbm_to_vmem [thread:$0]  %s7188_s2, 512, %s51_s24, [#allocation6], %s6357_s25, %s6357_s25, %s6358_s26  }
  0x57   :  { %s6255_s1 = scalar_lea.hbm %s7191_s5, 1024 }
  0x58   :  { %p6256_p12 = scmp.ne.s32.totalorder %s7191_s5, %s6255_s1  ;;  %p6259_p13 = scmp.lt.u32.totalorder %s6255_s1, %s7191_s5 }
  0x5a   :  { %p6261_p0 = pnand %p6259_p13, %p6256_p12 }
  0x5c   :  { %6264 = shalt.err (!%p6261_p0)
}
  0x5d   :  { %s6265_s20 = scalar_lea.vmem %s6485_s28, 1024  ;;  %p6270_p2 = scmp.lt.s32.totalorder %s6485_s28, %s6485_s28 }
  0x5e   :  { %p6266_p1 = scmp.ne.s32.totalorder %s6485_s28, %s6265_s20  ;;  %p6271_p3 = scmp.lt.s32.totalorder %s6265_s20, %s6265_s20 }
  0x60   :  { %p6272_p4 = por %p6271_p3, %p6270_p2 }
  0x62   :  { %p6273_p5 = pnand %p6272_p4, %p6266_p1 }
  0x64   :  { %6276 = shalt.err (!%p6273_p5)
}
  0x65   :  { %80 = dma.hbm_to_vmem [thread:$0]  %s7191_s5, 1024, %s6485_s28, [#allocation9], %s6357_s25, %s6357_s25, %s6358_s26  }
  0x66   :  { %s6363_s24 = smov [#allocation13]   ;;  %s6364_s29 = smov [#allocation14]  }
  0x67   :  { %s98_s27 = sshll.u32 %s6363_s24, 4  ;;  %s110_s30 = sshll.u32 %s6364_s29, 4  ;;  %s99_s27 = int_to_ptr.vmem [resolvable:$true] %s98_s27  ;;  %s6522_s30 = int_to_ptr.vmem [resolvable:$true] %s110_s30 }
  0x68   :  { %s6277_s16 = scalar_lea.hbm %s7193_s7, 1024 }
  0x69   :  { %p6278_p6 = scmp.ne.s32.totalorder %s7193_s7, %s6277_s16  ;;  %p6281_p7 = scmp.lt.u32.totalorder %s6277_s16, %s7193_s7 }
  0x6b   :  { %p6283_p8 = pnand %p6281_p7, %p6278_p6 }
  0x6d   :  { %6286 = shalt.err (!%p6283_p8)
}
  0x6e   :  { %s6287_s5 = scalar_lea.vmem %s99_s27, 1024  ;;  %p6292_p10 = scmp.lt.s32.totalorder %s99_s27, %s99_s27 }
  0x6f   :  { %p6288_p9 = scmp.ne.s32.totalorder %s99_s27, %s6287_s5  ;;  %p6293_p11 = scmp.lt.s32.totalorder %s6287_s5, %s6287_s5 }
  0x71   :  { %p6294_p12 = por %p6293_p11, %p6292_p10 }
  0x73   :  { %p6295_p13 = pnand %p6294_p12, %p6288_p9 }
  0x75   :  { %6298 = shalt.err (!%p6295_p13)
}
  0x76   :  { %104 = dma.hbm_to_vmem [thread:$0]  %s7193_s7, 1024, %s99_s27, [#allocation12], %s6357_s25, %s6357_s25, %s6358_s26  }
  0x77   :  { %s6299_s1 = scalar_lea.hbm %s7194_s8, 2048 }
  0x78   :  { %p6300_p0 = scmp.ne.s32.totalorder %s7194_s8, %s6299_s1  ;;  %p6303_p1 = scmp.lt.u32.totalorder %s6299_s1, %s7194_s8 }
  0x7a   :  { %p6305_p2 = pnand %p6303_p1, %p6300_p0 }
  0x7c   :  { %6308 = shalt.err (!%p6305_p2)
}
  0x7d   :  { %s6309_s20 = scalar_lea.vmem %s6522_s30, 2048  ;;  %p6314_p4 = scmp.lt.s32.totalorder %s6522_s30, %s6522_s30 }
  0x7e   :  { %p6310_p3 = scmp.ne.s32.totalorder %s6522_s30, %s6309_s20  ;;  %p6315_p5 = scmp.lt.s32.totalorder %s6309_s20, %s6309_s20 }
  0x80   :  { %p6316_p6 = por %p6315_p5, %p6314_p4 }
  0x82   :  { %p6317_p7 = pnand %p6316_p6, %p6310_p3 }
  0x84   :  { %6320 = shalt.err (!%p6317_p7)
}
  0x85   :  { %116 = dma.hbm_to_vmem [thread:$0]  %s7194_s8, 2048, %s6522_s30, [#allocation15], %s6357_s25, %s6357_s25, %s6358_s26  }
  0x86   :  { %6343 = dma.done.wait [#allocation3], 512  }
  0x87   :  { %6344 = vsyncadd [#allocation3], 4294966784 }
  0x88   :  { %6345 = dma.done.wait [#allocation6], 1024  }
  0x89   :  { %6346 = vsyncadd [#allocation6], 4294966272 }
  0x8a   :  { %6347 = dma.done.wait [#allocation9], 1152  }
  0x8b   :  { %6348 = vsyncadd [#allocation9], 4294966144 }
  0x8c   :  { %6349 = dma.done.wait [#allocation12], 3072  }
  0x8d   :  { %6350 = vsyncadd [#allocation12], 4294964224 }
  0x8e   :  { %6351 = dma.done.wait [#allocation15], 2048  }
  0x8f   :  { %6352 = vsyncadd [#allocation15], 4294965248  ;;  %vm163_vm0 = vcmask 261120   ;;  %v143_v0 = vld [vmem:[#allocation2] sm:$0xff]  ;;  %v145_v1 = vld [vmem:[#allocation2 + $0x10] sm:$0xff]  ;;  %vm968_vm1 = vcmask 130048  }
  0x90   :  { %v144_v2 = vld [vmem:[#allocation2 + $0x8] sm:$0xff]  ;;  %v164_v3 = vsel %vm163_vm0, %v143_v0, 0.0  ;;  %v170_v4 = vsel %vm163_vm0, %v145_v1, 0.0  ;;  %v146_v5 = vld [vmem:[#allocation2 + $0x18] sm:$0xff]  ;;  %v147_v8 = vld [vmem:[#allocation5] sm:$0xff]  ;;  %s6365_s14 = smov [#allocation16]  }
  0x91   :  { %165 = vadd.xlane.f32.xlu0 %v164_v3  ;;  %171 = vadd.xlane.f32.xlu1 %v170_v4  ;;  %v167_v6 = vsel %vm163_vm0, %v144_v2, 0.0  ;;  %v173_v7 = vsel %vm163_vm0, %v146_v5, 0.0  ;;  %v148_v9 = vld [vmem:[#allocation5 + $0x8] sm:$0xff]  ;;  %v176_v10 = vsel %vm163_vm0, %v147_v8, 0.0  ;;  %v149_v40 = vld [vmem:[#allocation5 + $0x10] sm:$0xff]  ;;  %v6596_v44 = vld [vmem:[#allocation5 + $0x18] sm:$0xff] }
  0x92   :  { %v179_v11 = vsel %vm163_vm0, %v148_v9, 0.0  ;;  %v182_v43 = vsel %vm163_vm0, %v149_v40, 0.0  ;;  %v185_v45 = vsel %vm163_vm0, %v6596_v44, 0.0  ;;  %v341_v46 = vld [vmem:[#allocation10] sm:$0xff]  ;;  %v342_v47 = vld [vmem:[#allocation10 + $0x8] sm:$0xff]  ;;  %v343_v49 = vld [vmem:[#allocation10 + $0x10] sm:$0xff] }
  0x93   :  { %v5697_v48 = vpack.c.bf16 %v342_v47, %v341_v46  ;;  %v344_v50 = vld [vmem:[#allocation10 + $0x18] sm:$0xff]  ;;  %v443_v52 = vld [vmem:[#allocation10 + $0x20] sm:$0xff]  ;;  %v444_v53 = vld [vmem:[#allocation10 + $0x28] sm:$0xff]  ;;  %s4743_s19 = sshll.u32 %s6365_s14, 4  ;;  %s4744_s19 = int_to_ptr.vmem [resolvable:$true] %s4743_s19 }
  0x94   :  { %v5701_v51 = vpack.c.bf16 %v344_v50, %v343_v49  ;;  %v544_v54 = vld [vmem:[#allocation11] sm:$0xff]  ;;  %v5705_v55 = vpack.c.bf16 %v444_v53, %v443_v52  ;;  %v545_v56 = vld [vmem:[#allocation11 + $0x8] sm:$0xff]  ;;  %v445_v58 = vld [vmem:[#allocation10 + $0x30] sm:$0xff]  ;;  %p6326_p9 = scmp.lt.s32.totalorder %s4744_s19, %s4744_s19 }
  0x95   :  { %168 = vadd.xlane.f32.xlu0 %v167_v6  ;;  %174 = vadd.xlane.f32.xlu1 %v173_v7  ;;  %v6600_v57 = vpack.c.bf16 %v545_v56, %v544_v54  ;;  %v446_v59 = vld [vmem:[#allocation10 + $0x38] sm:$0xff]  ;;  %v737_v52 = vld [vmem:[#allocation11 + $0x48] sm:$0xff]  ;;  %vm6736_vm2 = vmpackc.low %vm163_vm0, %vm163_vm0 }
  0x96   :  { %5698 = vmatprep.subr.bf16.mxu0 %v5697_v48  ;;  %5706 = vmatprep.subr.bf16.mxu1 %v5705_v55  ;;  %v5709_v60 = vpack.c.bf16 %v446_v59, %v445_v58  ;;  %v4764_v58 = vld [vmem:[#allocation8 + $0x2] ss:$0 sm:$0xff] }
  0x97   :  { %5700 = vmatpush3.bf16.msra.mxu0 %v5697_v48  ;;  %5708 = vmatpush3.bf16.msra.mxu1 %v5705_v55  ;;  %v6632_v55 = vld [vmem:[#allocation8 + $0x1] ss:$0 sm:$0xff] }
  0x98   :  { %5702 = vmatprep.subr.bf16.mxu0 %v5701_v51  ;;  %5710 = vmatprep.subr.bf16.mxu1 %v5709_v60 }
  0x99   :  { %177 = vadd.xlane.f32.xlu0 %v176_v10  ;;  %180 = vadd.xlane.f32.xlu1 %v179_v11 }
  0x9b   :  { %5704 = vmatpush3.bf16.msra.mxu0 %v5701_v51  ;;  %5712 = vmatpush3.bf16.msra.mxu1 %v5709_v60  ;;  %v736_v51 = vld [vmem:[#allocation11 + $0x40] sm:$0xff] }
  0x9c   :  { %5714 = vmatprep.subr.bf16.mxu0 %v6600_v57 }
 0x11e   :  { %v166_v12 = vpop.xlane.xlu0 %165  ;;  %v172_v13 = vpop.xlane.xlu1 %171 }
 0x11f   :  { %v189_v14 = vmul.f32 0.03125, %v166_v12  ;;  %v191_v15 = vmul.f32 0.03125, %v172_v13 }
 0x121   :  { %v6565_v16 = vsub.f32 %v143_v0, %v189_v14  ;;  %v6567_v17 = vsub.f32 %v145_v1, %v191_v15 }
 0x122   :  { %v169_v18 = vpop.xlane.xlu0 %168  ;;  %v175_v19 = vpop.xlane.xlu1 %174 }
 0x123   :  { %v190_v20 = vmul.f32 0.03125, %v169_v18  ;;  %v192_v21 = vmul.f32 0.03125, %v175_v19  ;;  %v205_v22 = vmul.f32 %v6565_v16, %v6565_v16  ;;  %v207_v23 = vmul.f32 %v6567_v17, %v6567_v17 }
 0x125   :  { %v6573_v24 = vsub.f32 %v144_v2, %v190_v20  ;;  %v6575_v25 = vsub.f32 %v146_v5, %v192_v21  ;;  %v213_v26 = vsel %vm163_vm0, %v205_v22, 0.0  ;;  %v219_v29 = vsel %vm163_vm0, %v207_v23, 0.0  ;;  %v4759_v21 = vld [vmem:[%s7189_s3] ss:$0 sm:$0xff] }
 0x126   :  { %214 = vadd.xlane.f32.xlu0 %v213_v26  ;;  %v178_v27 = vpop.xlane.xlu0 %177  ;;  %v181_v28 = vpop.xlane.xlu1 %180 }
 0x127   :  { %v193_v30 = vmul.f32 0.03125, %v178_v27  ;;  %v194_v31 = vmul.f32 0.03125, %v181_v28  ;;  %v206_v32 = vmul.f32 %v6573_v24, %v6573_v24  ;;  %v208_v33 = vmul.f32 %v6575_v25, %v6575_v25  ;;  %v4760_v27 = vld [vmem:[#allocation8] ss:$0 sm:$0xff] }
 0x129   :  { %v6583_v34 = vsub.f32 %v147_v8, %v193_v30  ;;  %v6585_v35 = vsub.f32 %v148_v9, %v194_v31  ;;  %v216_v36 = vsel %vm163_vm0, %v206_v32, 0.0  ;;  %v222_v37 = vsel %vm163_vm0, %v208_v33, 0.0 }
 0x12a   :  { %220 = vadd.xlane.f32.xlu0 %v219_v29  ;;  %217 = vadd.xlane.f32.xlu1 %v216_v36 }
 0x12b   :  { %v209_v38 = vmul.f32 %v6583_v34, %v6583_v34  ;;  %v210_v39 = vmul.f32 %v6585_v35, %v6585_v35 }
 0x12d   :  { %v225_v41 = vsel %vm163_vm0, %v209_v38, 0.0  ;;  %v228_v42 = vsel %vm163_vm0, %v210_v39, 0.0  ;;  %v546_v39 = vld [vmem:[#allocation11 + $0x10] sm:$0xff] }
 0x12e   :  { %223 = vadd.xlane.f32.xlu1 %v222_v37  ;;  %226 = vadd.xlane.f32.xlu0 %v225_v41 }
 0x132   :  { %229 = vadd.xlane.f32.xlu1 %v228_v42  ;;  %183 = vadd.xlane.f32.xlu0 %v182_v43  ;;  %v4763_v43 = vld [vmem:[%s7189_s3 + $0x2] ss:$0 sm:$0xff] }
 0x136   :  { %186 = vadd.xlane.f32.xlu1 %v185_v45 }
 0x1b3   :  { %v215_v61 = vpop.xlane.xlu0 %214 }
 0x1b4   :  { %v237_v62 = vmul.f32 0.03125, %v215_v61  ;;  %v5729_v61 = vpack.c.bf16 %v737_v52, %v736_v51 }
 0x1b6   :  { %v245_v63 = vadd.f32 1e-06, %v237_v62  ;;  %v738_v62 = vld [vmem:[#allocation11 + $0x50] sm:$0xff] }
 0x1b7   :  { %v218_v0 = vpop.xlane.xlu1 %217  ;;  %v221_v1 = vpop.xlane.xlu0 %220 }
 0x1b8   :  { %5989 = vrsqrt.f32 %v245_v63  ;;  %v238_v2 = vmul.f32 0.03125, %v218_v0  ;;  %v239_v3 = vmul.f32 0.03125, %v221_v1  ;;  %v739_v63 = vld [vmem:[#allocation11 + $0x58] sm:$0xff] }
 0x1ba   :  { %v246_v4 = vadd.f32 1e-06, %v238_v2  ;;  %v247_v5 = vadd.f32 1e-06, %v239_v3 }
 0x1bb   :  { %v224_v6 = vpop.xlane.xlu1 %223  ;;  %v227_v7 = vpop.xlane.xlu0 %226 }
 0x1bc   :  { %5991 = vrsqrt.f32 %v246_v4  ;;  %v240_v8 = vmul.f32 0.03125, %v224_v6  ;;  %v241_v9 = vmul.f32 0.03125, %v227_v7 }
 0x1bd   :  { %5993 = vrsqrt.f32 %v247_v5 }
 0x1be   :  { %v248_v10 = vadd.f32 1e-06, %v240_v8  ;;  %v249_v11 = vadd.f32 1e-06, %v241_v9  ;;  %v4766_v9 = vld [vmem:[#allocation8 + $0x3] ss:$0 sm:$0xff] }
 0x1bf   :  { %v230_v12 = vpop.xlane.xlu1 %229  ;;  %v184_v13 = vpop.xlane.xlu0 %183 }
 0x1c0   :  { %5995 = vrsqrt.f32 %v248_v10  ;;  %v242_v14 = vmul.f32 0.03125, %v230_v12  ;;  %v195_v15 = vmul.f32 0.03125, %v184_v13 }
 0x1c1   :  { %5997 = vrsqrt.f32 %v249_v11 }
 0x1c2   :  { %v5990_v18 = vpop.eup %5989  ;;  %v250_v19 = vadd.f32 1e-06, %v242_v14  ;;  %v6603_v20 = vsub.f32 %v149_v40, %v195_v15  ;;  %v547_v40 = vld [vmem:[#allocation11 + $0x18] sm:$0xff]  ;;  %v646_v14 = vld [vmem:[#allocation11 + $0x20] sm:$0xff]  ;;  %v647_v15 = vld [vmem:[#allocation11 + $0x28] sm:$0xff] }
 0x1c3   :  { %v187_v22 = vpop.xlane.xlu1 %186  ;;  %v261_v23 = vmul.f32 %v5990_v18, %v6565_v16  ;;  %v5717_v48 = vpack.c.bf16 %v547_v40, %v546_v39  ;;  %v5721_v18 = vpack.c.bf16 %v647_v15, %v646_v14 }
 0x1c4   :  { %5999 = vrsqrt.f32 %v250_v19  ;;  %v196_v26 = vmul.f32 0.03125, %v187_v22  ;;  %v211_v28 = vmul.f32 %v6603_v20, %v6603_v20  ;;  %v648_v19 = vld [vmem:[#allocation11 + $0x30] sm:$0xff] }
 0x1c5   :  { %v274_v29 = vmul.f32 %v4759_v21, %v261_v23  ;;  %v310_v53 = vmul.f32 %v4763_v43, %v261_v23  ;;  %5722 = vmatprep.subr.bf16.mxu1 %v5721_v18  ;;  %v838_v23 = vld [vmem:[#allocation11 + $0x60] sm:$0xff] }
 0x1c6   :  { %v5992_v30 = vpop.eup %5991  ;;  %v6612_v31 = vsub.f32 %v6596_v44, %v196_v26  ;;  %v231_v32 = vsel %vm163_vm0, %v211_v28, 0.0  ;;  %v839_v26 = vld [vmem:[#allocation11 + $0x68] sm:$0xff] }
 0x1c7   :  { %v5994_v33 = vpop.eup %5993  ;;  %v283_v36 = vadd.f32 %v4760_v27, %v274_v29  ;;  %232 = vadd.xlane.f32.xlu0 %v231_v32  ;;  %v262_v37 = vmul.f32 %v5992_v30, %v6573_v24  ;;  %v6643_v2 = vadd.f32 %v4764_v58, %v310_v53 }
 0x1c8   :  { %v212_v16 = vmul.f32 %v6612_v31, %v6612_v31  ;;  %v263_v38 = vmul.f32 %v5994_v33, %v6567_v17  ;;  %v6628_v17 = vld [vmem:[%s7189_s3 + $0x1] ss:$0 sm:$0xff] }
 0x1c9   :  { %5217 = vmatprep.mubr.msk.f32.mxu0 %vm163_vm0, %v283_v36  ;;  %v275_v41 = vmul.f32 %v4759_v21, %v262_v37  ;;  %v311_v59 = vmul.f32 %v4763_v43, %v262_v37 }
 0x1ca   :  { %v5996_v42 = vpop.eup %5995  ;;  %v234_v44 = vsel %vm163_vm0, %v212_v16, 0.0  ;;  %v276_v45 = vmul.f32 %v4759_v21, %v263_v38  ;;  %v312_v1 = vmul.f32 %v4763_v43, %v263_v38 }
 0x1cb   :  { %v5998_v46 = vpop.eup %5997  ;;  %235 = vadd.xlane.f32.xlu1 %v234_v44  ;;  %v284_v24 = vadd.f32 %v4760_v27, %v275_v41  ;;  %v264_v47 = vmul.f32 %v5996_v42, %v6575_v25  ;;  %v6647_v4 = vadd.f32 %v4764_v58, %v311_v59 }
 0x1cc   :  { %v285_v49 = vadd.f32 %v4760_v27, %v276_v45  ;;  %v265_v50 = vmul.f32 %v5998_v46, %v6583_v34  ;;  %v321_v8 = vadd.f32 %v4764_v58, %v312_v1  ;;  %v6701_v1 = vld [vmem:[#allocation7 + $0x18] sm:$0xff] }
 0x1cd   :  { %5218 = vmatmul.mubr.msk.f32.vlgmr.msra.gmra.mrb[0].mxu0 %vm163_vm0, %v284_v24  ;;  %v277_v54 = vmul.f32 %v4759_v21, %v264_v47  ;;  %v313_v6 = vmul.f32 %v4763_v43, %v264_v47  ;;  %v649_v21 = vld [vmem:[#allocation11 + $0x38] sm:$0xff] }
 0x1ce   :  { %v6000_v56 = vpop.eup %5999  ;;  %5220 = vmatprep.mubr.msk.f32.mxu0 %vm163_vm0, %v285_v49  ;;  %5716 = vmatpush3.bf16.msra.mxu0 %v6600_v57  ;;  %v292_v25 = vmul.f32 %v6628_v17, %v265_v50  ;;  %v4765_v57 = vld [vmem:[%s7189_s3 + $0x3] ss:$0 sm:$0xff]  ;;  %v5725_v22 = vpack.c.bf16 %v649_v21, %v648_v19 }
 0x1cf   :  { %v286_v60 = vadd.f32 %v4760_v27, %v277_v54  ;;  %5718 = vmatprep.subr.bf16.mxu0 %v5717_v48  ;;  %v266_v34 = vmul.f32 %v6000_v56, %v6585_v35  ;;  %v5733_v35 = vpack.c.bf16 %v739_v63, %v738_v62  ;;  %v328_v7 = vmul.f32 %v4765_v57, %v265_v50  ;;  %v841_v47 = vld [vmem:[#allocation11 + $0x78] sm:$0xff]  ;;  %v6693_v62 = vld [vmem:[#allocation7 + $0x8] sm:$0xff]  ;;  %v6695_v63 = vld [vmem:[#allocation7 + $0x10] sm:$0xff] }
 0x1d0   :  { %v301_v0 = vadd.f32 %v6632_v55, %v292_v25  ;;  %v322_v11 = vadd.f32 %v4764_v58, %v313_v6  ;;  %v5737_v27 = vpack.c.bf16 %v839_v26, %v838_v23 }
 0x1d1   :  { %5221 = vmatmul.mubr.msk.f32.gmra.mrb[2].mxu0 %vm163_vm0, %v286_v60  ;;  %v293_v3 = vmul.f32 %v6628_v17, %v266_v34  ;;  %v329_v10 = vmul.f32 %v4765_v57, %v266_v34  ;;  %v337_v12 = vadd.f32 %v4766_v9, %v328_v7 }
 0x1d2   :  { %5231 = vmatprep.mubr.msk.f32.mxu1 %vm163_vm0, %v301_v0  ;;  %5720 = vmatpush3.bf16.msra.mxu0 %v5717_v48 }
 0x1d3   :  { %5245 = vmatprep.mubr.msk.f32.mxu0 %vm163_vm0, %v6643_v2  ;;  %v302_v5 = vadd.f32 %v6632_v55, %v293_v3  ;;  %5730 = vmatprep.subr.bf16.mxu0 %v5729_v61  ;;  %v338_v13 = vadd.f32 %v4766_v9, %v329_v10 }
 0x1d5   :  { %5232 = vmatmul.mubr.msk.f32.vlgmr.msra.gmra.mrb[0].mxu1 %vm163_vm0, %v302_v5  ;;  %5246 = vmatmul.mubr.msk.f32.vlgmr.msra.gmra.mrb[4].mxu0 %vm163_vm0, %v6647_v4 }
 0x1d6   :  { %5248 = vmatprep.mubr.msk.f32.mxu0 %vm163_vm0, %v321_v8  ;;  %5732 = vmatpush3.bf16.msra.mxu0 %v5729_v61  ;;  %v6691_v61 = vld [vmem:[#allocation7] sm:$0xff] }
 0x1d7   :  { %5734 = vmatprep.subr.bf16.mxu0 %v5733_v35  ;;  %5724 = vmatpush3.bf16.msra.mxu1 %v5721_v18  ;;  %v6699_v0 = vpack.c.bf16 %v6693_v62, %v6691_v61 }
 0x1d8   :  { %5726 = vmatprep.subr.bf16.mxu1 %v5725_v22 }
 0x1d9   :  { %5249 = vmatmul.mubr.msk.f32.gmra.mrb[6].mxu0 %vm163_vm0, %v322_v11 }
 0x1da   :  { %5736 = vmatpush3.bf16.msra.mxu0 %v5733_v35  ;;  %5273 = vmatprep.mubr.msk.f32.mxu0 %vm163_vm0, %v337_v12 }
 0x1db   :  { %5728 = vmatpush3.bf16.msra.mxu1 %v5725_v22 }
 0x1dc   :  { %5738 = vmatprep.subr.bf16.mxu1 %v5737_v27 }
 0x1dd   :  { %5274 = vmatmul.mubr.msk.f32.vlgmr.msra.gmra.mrb[8].mxu0 %vm163_vm0, %v338_v13 }
 0x254   :  { %v233_v28 = vpop.xlane.xlu0 %232 }
 0x255   :  { %v243_v29 = vmul.f32 0.03125, %v233_v28 }
 0x257   :  { %v251_v30 = vadd.f32 1e-06, %v243_v29 }
 0x258   :  { %v236_v32 = vpop.xlane.xlu1 %235 }
 0x259   :  { %6001 = vrsqrt.f32 %v251_v30  ;;  %v244_v33 = vmul.f32 0.03125, %v236_v32 }
 0x25b   :  { %v252_v36 = vadd.f32 1e-06, %v244_v33 }
 0x25d   :  { %6003 = vrsqrt.f32 %v252_v36 }
 0x263   :  { %v6002_v37 = vpop.eup %6001 }
 0x264   :  { %v267_v16 = vmul.f32 %v6002_v37, %v6603_v20  ;;  %v840_v20 = vld [vmem:[#allocation11 + $0x70] sm:$0xff] }
 0x266   :  { %v294_v38 = vmul.f32 %v6628_v17, %v267_v16  ;;  %v330_v39 = vmul.f32 %v4765_v57, %v267_v16 }
 0x267   :  { %v6004_v40 = vpop.eup %6003 }
 0x268   :  { %v303_v41 = vadd.f32 %v6632_v55, %v294_v38  ;;  %v268_v42 = vmul.f32 %v6004_v40, %v6612_v31  ;;  %v339_v43 = vadd.f32 %v4766_v9, %v330_v39  ;;  %v5741_v31 = vpack.c.bf16 %v841_v47, %v840_v20 }
 0x26a   :  { %5234 = vmatprep.mubr.msk.f32.mxu1 %vm163_vm0, %v303_v41  ;;  %v295_v44 = vmul.f32 %v6628_v17, %v268_v42  ;;  %5276 = vmatprep.mubr.msk.f32.mxu0 %vm163_vm0, %v339_v43  ;;  %v331_v45 = vmul.f32 %v4765_v57, %v268_v42  ;;  %v6705_v57 = vpack.c.bf16 %v6701_v1, %v6695_v63 }
 0x26c   :  { %v304_v46 = vadd.f32 %v6632_v55, %v295_v44  ;;  %v340_v24 = vadd.f32 %v4766_v9, %v331_v45 }
 0x26e   :  { %5235 = vmatmul.mubr.msk.f32.gmra.mrb[2].mxu1 %vm163_vm0, %v304_v46  ;;  %5277 = vmatmul.mubr.msk.f32.gmra.mrb[10].mxu0 %vm163_vm0, %v340_v24 }
 0x26f   :  { %5259 = vmatprep.mubr.msk.f32.mxu1 %vm163_vm0, %v6643_v2 }
 0x272   :  { %5260 = vmatmul.mubr.msk.f32.vlgmr.msra.gmra.mrb[4].mxu1 %vm163_vm0, %v6647_v4 }
 0x273   :  { %5262 = vmatprep.mubr.msk.f32.mxu1 %vm163_vm0, %v321_v8  ;;  %5740 = vmatpush3.bf16.msra.mxu1 %v5737_v27 }
 0x274   :  { %5742 = vmatprep.subr.bf16.mxu1 %v5741_v31 }
 0x276   :  { %5263 = vmatmul.mubr.msk.f32.gmra.mrb[6].mxu1 %vm163_vm0, %v322_v11 }
 0x277   :  { %5744 = vmatpush3.bf16.msra.mxu1 %v5741_v31  ;;  %5287 = vmatprep.mubr.msk.f32.mxu1 %vm163_vm0, %v337_v12 }
 0x278   :  { %5750 = vmatprep.subr.bf16.mxu1 %v6699_v0 }
 0x27a   :  { %5288 = vmatmul.mubr.msk.f32.vlgmr.msra.gmra.mrb[8].mxu1 %vm163_vm0, %v338_v13 }
 0x27b   :  { %5290 = vmatprep.mubr.msk.f32.mxu1 %vm163_vm0, %v339_v43  ;;  %5752 = vmatpush3.bf16.msra.mxu1 %v6699_v0 }
 0x27c   :  { %5754 = vmatprep.subr.bf16.mxu1 %v6705_v57 }
 0x27e   :  { %5291 = vmatmul.mubr.msk.f32.gmra.mrb[10].mxu1 %vm163_vm0, %v340_v24 }
 0x27f   :  { %5756 = vmatpush3.bf16.msra.mxu1 %v6705_v57 }
 0x280   :  { %5766 = vmatprep.subr.bf16.mxu1 %v6699_v0 }
 0x2a0   :  { %v5219_v17 = vpop.f32.mrb[0].mxu0 }
 0x2a1   :  { %v423_v48 = vpop.f32.mrb[1].mxu0 }
 0x2a2   :  { %936 = vxpose.xlu0.b32.start [1/2] (short) (narrow) %v423_v48, 32 }
 0x2a4   :  { %v6679_v49 = vpop.f32.mrb[2].mxu0 }
 0x2a5   :  { %v6681_v50 = vpop.f32.mrb[3].mxu0 }
 0x2a6   :  { %937 = vxpose.xlu0.b32.end [2/2] (short) (narrow) %v5219_v17, 32 }
 0x2a8   :  { %v6683_v51 = vpop.f32.mrb[0].mxu1  ;;  %v5247_v52 = vpop.f32.mrb[4].mxu0 }
 0x2a9   :  { %v6685_v53 = vpop.f32.mrb[1].mxu1  ;;  %v626_v54 = vpop.f32.mrb[5].mxu0 }
 0x2aa   :  { %v6687_v55 = vpack.c.bf16 %v5247_v52, %v626_v54 }
 0x2ac   :  { %v5250_v56 = vpop.f32.mrb[6].mxu0 }
 0x2ad   :  { %v636_v25 = vpop.f32.mrb[7].mxu0 }
 0x2ae   :  { %v6689_v58 = vpack.c.bf16 %v5250_v56, %v636_v25 }
 0x2b0   :  { %v5275_v59 = vpop.f32.mrb[8].mxu0 }
 0x2b1   :  { %v818_v60 = vpop.f32.mrb[9].mxu0 }
 0x2b2   :  { %v5745_v34 = vpack.c.bf16 %v5275_v59, %v818_v60 }
 0x2b4   :  { %5746 = vmatprep.subr.bf16.mxu0 %v5745_v34 }
 0x2b5   :  { %5748 = vmatpush3.bf16.msra.mxu0 %v5745_v34 }
 0x322   :  { %v952_v2 = vpop.trf.xlu0 }
 0x323   :  { %5297 = vmatprep.mubr.msk.f32.mxu0 %vm968_vm1, %v952_v2 }
 0x326   :  { %v953_v3 = vpop.trf.xlu0 }
 0x327   :  { %5298 = vmatmul.mubr.msk.f32.vlgmr.msra.gmra.mrb[12].mxu0 %vm968_vm1, %v953_v3 }
 0x32a   :  { %v954_v35 = vpop.trf.xlu0 }
 0x32b   :  { %5300 = vmatprep.mubr.msk.f32.mxu0 %vm968_vm1, %v954_v35 }
 0x32e   :  { %v955_v4 = vpop.trf.xlu0 }
 0x32f   :  { %5301 = vmatmul.mubr.msk.f32.gmra.mrb[14].mxu0 %vm968_vm1, %v955_v4 }
 0x330   :  { %5325 = vmatprep.mubr.msk.f32.mxu0 %vm163_vm0, %v6691_v61 }
 0x341   :  { %v6718_v5 = vpop.f32.mrb[2].mxu1  ;;  %v5278_v6 = vpop.f32.mrb[10].mxu0 }
 0x342   :  { %v6720_v7 = vpop.f32.mrb[3].mxu1  ;;  %v828_v8 = vpop.f32.mrb[11].mxu0 }
 0x343   :  { %v6722_v9 = vpack.c.bf16 %v5278_v6, %v828_v8 }
 0x345   :  { %v5261_v10 = vpop.f32.mrb[4].mxu1 }
 0x346   :  { %v716_v11 = vpop.f32.mrb[5].mxu1 }
 0x347   :  { %v6724_v12 = vpack.c.bf16 %v5261_v10, %v716_v11 }
 0x349   :  { %v5264_v13 = vpop.f32.mrb[6].mxu1 }
 0x34a   :  { %v726_v14 = vpop.f32.mrb[7].mxu1 }
 0x34b   :  { %v6726_v15 = vpack.c.bf16 %v5264_v13, %v726_v14 }
 0x34d   :  { %v5289_v18 = vpop.f32.mrb[8].mxu1 }
 0x34e   :  { %v908_v19 = vpop.f32.mrb[9].mxu1 }
 0x34f   :  { %v5781_v21 = vpack.c.bf16 %v5289_v18, %v908_v19 }
 0x351   :  { %v5292_v22 = vpop.f32.mrb[10].mxu1 }
 0x352   :  { %v918_v23 = vpop.f32.mrb[11].mxu1 }
 0x353   :  { %v6728_v26 = vpack.c.bf16 %v5292_v22, %v918_v23 }
 0x3fa   :  { %v5299_v27 = vpop.f32.mrb[12].mxu0 }
 0x3fb   :  { %v1047_v28 = vpop.f32.mrb[13].mxu0 }
 0x3fc   :  { %5311 = vmatprep.mubr.msk.f32.mxu1 %vm163_vm0, %v1047_v28 }
 0x3fd   :  { %5312 = vmatmul.mubr.msk.f32.vlgmr.msra.gmra.mrb[12].mxu1 %vm163_vm0, %v5299_v27 }
 0x3fe   :  { %5768 = vmatpush3.bf16.msra.mxu1 %v6699_v0 }
 0x3ff   :  { %5770 = vmatprep.subr.bf16.mxu1 %v6705_v57 }
 0x402   :  { %5772 = vmatpush3.bf16.msra.mxu1 %v6705_v57  ;;  %v5302_v30 = vpop.f32.mrb[14].mxu0 }
 0x403   :  { %5783 = vmatprep.subr.msk.bf16.mxu1 %vm6736_vm2, %v5781_v21  ;;  %v1057_v32 = vpop.f32.mrb[15].mxu0 }
 0x404   :  { %5314 = vmatprep.mubr.msk.f32.mxu1 %vm163_vm0, %v1057_v32 }
 0x405   :  { %5315 = vmatmul.mubr.msk.f32.gmra.mrb[14].mxu1 %vm163_vm0, %v5302_v30 }
 0x4d0   :  { %v5313_v33 = vpop.f32.mrb[12].mxu1 }
 0x4d1   :  { %v1144_v36 = vpop.f32.mrb[13].mxu1 }
 0x4d2   :  { %v5757_v37 = vpack.c.bf16 %v5313_v33, %v1144_v36  ;;  %v155_v33 = vsub.f32 1.0, %v6691_v61 }
 0x4d4   :  { %5758 = vmatprep.subr.bf16.mxu0 %v5757_v37 }
 0x4d5   :  { %5760 = vmatpush3.bf16.msra.mxu0 %v5757_v37 }
 0x4d8   :  { %v5316_v16 = vpop.f32.mrb[14].mxu1 }
 0x4d9   :  { %v1154_v38 = vpop.f32.mrb[15].mxu1 }
 0x4da   :  { %v5761_v39 = vpack.c.bf16 %v5316_v16, %v1154_v38 }
 0x4dc   :  { %5762 = vmatprep.subr.bf16.mxu0 %v5761_v39 }
 0x4dd   :  { %5764 = vmatpush3.bf16.msra.mxu0 %v5761_v39  ;;  %v6774_v39 = vmul.f32 -1e+30, %v155_v33 }
 0x4e0   :  { %5326 = vmatmul.mubr.msk.f32.vlgmr.msra.gmra.mrb[16].mxu0 %vm163_vm0, %v6693_v62 }
 0x4e1   :  { %5328 = vmatprep.mubr.msk.f32.mxu0 %vm163_vm0, %v6695_v63 }
 0x4e4   :  { %5329 = vmatmul.mubr.msk.f32.gmra.mrb[18].mxu0 %vm163_vm0, %v6701_v1 }
 0x4e5   :  { %5353 = vmatprep.mubr.msk.f32.mxu0 %vm163_vm0, %v6691_v61 }
 0x5b3   :  { %v5327_v40 = vpop.f32.mrb[16].mxu0 }
 0x5b4   :  { %v1261_v41 = vmul.f32 0.015625, %v5327_v40  ;;  %v1241_v42 = vpop.f32.mrb[17].mxu0  ;;  %v157_v40 = vsub.f32 1.0, %v6695_v63 }
 0x5b5   :  { %v1260_v43 = vmul.f32 0.015625, %v1241_v42 }
 0x5b6   :  { %v1265_v44 = vsub.f32 %v5299_v27, %v1261_v41 }
 0x5b7   :  { %v1264_v45 = vsub.f32 %v1047_v28, %v1260_v43  ;;  %v5330_v46 = vpop.f32.mrb[18].mxu0 }
 0x5b8   :  { %v1269_v24 = vmul.f32 %v1265_v44, %v6693_v62  ;;  %v1263_v20 = vmul.f32 0.015625, %v5330_v46  ;;  %v1251_v47 = vpop.f32.mrb[19].mxu0  ;;  %v6780_v46 = vmul.f32 -1e+30, %v157_v40 }
 0x5b9   :  { %v1268_v31 = vmul.f32 %v1264_v45, %v6691_v61  ;;  %v1262_v17 = vmul.f32 0.015625, %v1251_v47 }
 0x5ba   :  { %v1267_v48 = vsub.f32 %v5302_v30, %v1263_v20  ;;  %v1273_v56 = vmul.f32 %v1269_v24, %v1269_v24  ;;  %v158_v20 = vsub.f32 1.0, %v6701_v1 }
 0x5bb   :  { %v1272_v52 = vmul.f32 %v1268_v31, %v1268_v31  ;;  %v1266_v54 = vsub.f32 %v1057_v32, %v1262_v17  ;;  %v156_v32 = vsub.f32 1.0, %v6693_v62 }
 0x5bc   :  { %v1271_v25 = vmul.f32 %v1267_v48, %v6701_v1 }
 0x5bd   :  { %v1270_v59 = vmul.f32 %v1266_v54, %v6695_v63  ;;  %5339 = vmatprep.mubr.msk.f32.mxu1 %vm163_vm0, %v1272_v52  ;;  %v6772_v36 = vmul.f32 -1e+30, %v156_v32  ;;  %v6785_v52 = vmul.f32 -1e+30, %v158_v20 }
 0x5be   :  { %5340 = vmatmul.mubr.msk.f32.vlgmr.msra.gmra.mrb[16].mxu1 %vm163_vm0, %v1273_v56  ;;  %v1275_v34 = vmul.f32 %v1271_v25, %v1271_v25 }
 0x5bf   :  { %v1274_v60 = vmul.f32 %v1270_v59, %v1270_v59  ;;  %5786 = vmatpush3.bf16.xpose.msk.msra.mxu1 %vm6736_vm2, %v5781_v21 }
 0x5c0   :  { %5796 = vmatprep.subr.bf16.mxu1 %v6687_v55 }
 0x5c1   :  { %5342 = vmatprep.mubr.msk.f32.mxu1 %vm163_vm0, %v1274_v60 }
 0x5c2   :  { %5343 = vmatmul.mubr.msk.f32.gmra.mrb[18].mxu1 %vm163_vm0, %v1275_v34 }
 0x691   :  { %v5341_v2 = vpop.f32.mrb[16].mxu1 }
 0x692   :  { %v1354_v3 = vpop.f32.mrb[17].mxu1 }
 0x693   :  { %v5773_v35 = vpack.c.bf16 %v5341_v2, %v1354_v3 }
 0x695   :  { %v5344_v4 = vpop.f32.mrb[18].mxu1  ;;  %5774 = vmatprep.subr.bf16.mxu0 %v5773_v35 }
 0x696   :  { %v1364_v6 = vpop.f32.mrb[19].mxu1  ;;  %5776 = vmatpush3.bf16.msra.mxu0 %v5773_v35 }
 0x697   :  { %v5777_v8 = vpack.c.bf16 %v5344_v4, %v1364_v6 }
 0x699   :  { %5778 = vmatprep.subr.bf16.mxu0 %v5777_v8 }
 0x69a   :  { %5780 = vmatpush3.bf16.msra.mxu0 %v5777_v8 }
 0x69d   :  { %5354 = vmatmul.mubr.msk.f32.vlgmr.msra.gmra.mrb[20].mxu0 %vm163_vm0, %v6693_v62 }
 0x69e   :  { %5356 = vmatprep.mubr.msk.f32.mxu0 %vm163_vm0, %v6695_v63 }
 0x6a1   :  { %5357 = vmatmul.mubr.msk.f32.gmra.mrb[22].mxu0 %vm163_vm0, %v6701_v1 }
 0x770   :  { %v5355_v10 = vpop.f32.mrb[20].mxu0 }
 0x771   :  { %v1459_v11 = vmul.f32 0.015625, %v5355_v10  ;;  %v1439_v13 = vpop.f32.mrb[21].mxu0 }
 0x772   :  { %v1458_v14 = vmul.f32 0.015625, %v1439_v13 }
 0x773   :  { %v1463_v18 = vadd.f32 1e-05, %v1459_v11 }
 0x774   :  { %v1462_v19 = vadd.f32 1e-05, %v1458_v14  ;;  %v5358_v21 = vpop.f32.mrb[22].mxu0 }
 0x775   :  { %6005 = vrsqrt.f32 %v1463_v18  ;;  %v1461_v22 = vmul.f32 0.015625, %v5358_v21  ;;  %v1449_v23 = vpop.f32.mrb[23].mxu0 }
 0x776   :  { %6007 = vrsqrt.f32 %v1462_v19  ;;  %v1460_v27 = vmul.f32 0.015625, %v1449_v23 }
 0x777   :  { %v1465_v28 = vadd.f32 1e-05, %v1461_v22 }
 0x778   :  { %v1464_v30 = vadd.f32 1e-05, %v1460_v27 }
 0x77a   :  { %6009 = vrsqrt.f32 %v1464_v30 }
 0x77b   :  { %6011 = vrsqrt.f32 %v1465_v28 }
 0x77f   :  { %v6006_v37 = vpop.eup %6005 }
 0x780   :  { %v6008_v16 = vpop.eup %6007  ;;  %v1471_v38 = vmul.f32 %v6006_v37, %v1269_v24 }
 0x781   :  { %v1470_v41 = vmul.f32 %v6008_v16, %v1268_v31 }
 0x782   :  { %v1475_v42 = vadd.f32 %v1471_v38, %v6772_v36 }
 0x783   :  { %v1474_v45 = vadd.f32 %v1470_v41, %v6774_v39 }
 0x784   :  { %v6010_v43 = vpop.eup %6009  ;;  %v1481_v44 = vsel %vm163_vm0, %v1475_v42, -inf }
 0x785   :  { %v6012_v47 = vpop.eup %6011  ;;  %1482 = vmax.xlane.f32.xlu1 %v1481_v44  ;;  %v1472_v17 = vmul.f32 %v6010_v43, %v1270_v59  ;;  %v1478_v24 = vsel %vm163_vm0, %v1474_v45, -inf }
 0x786   :  { %v1473_v31 = vmul.f32 %v6012_v47, %v1271_v25 }
 0x787   :  { %v1476_v48 = vadd.f32 %v1472_v17, %v6780_v46  ;;  %v928_v17 = vld [vmem:[#allocation13 + $0x8] sm:$0xff] }
 0x788   :  { %v1477_v56 = vadd.f32 %v1473_v31, %v6785_v52  ;;  %v930_v31 = vld [vmem:[#allocation13 + $0x18] sm:$0xff] }
 0x789   :  { %1479 = vmax.xlane.f32.xlu1 %v1478_v24  ;;  %v1484_v54 = vsel %vm163_vm0, %v1476_v48, -inf  ;;  %v929_v24 = vld [vmem:[#allocation13 + $0x10] sm:$0xff] }
 0x78a   :  { %v1487_v60 = vsel %vm163_vm0, %v1477_v56, -inf }
 0x78d   :  { %1485 = vmax.xlane.f32.xlu1 %v1484_v54  ;;  %v6809_v54 = vpack.c.bf16 %v930_v31, %v929_v24  ;;  %v932_v31 = vld [vmem:[#allocation13 + $0x20] sm:$0xff] }
 0x791   :  { %1488 = vmax.xlane.f32.xlu1 %v1487_v60 }
 0x812   :  { %v1483_v34 = vpop.xlane.xlu1 %1482 }
 0x813   :  { %v1491_v2 = vsub.f32 %v1475_v42, %v1483_v34 }
 0x815   :  { %v1496_v3 = vmul.f32 1.442695, %v1491_v2 }
 0x816   :  { %v1480_v59 = vpop.xlane.xlu1 %1479 }
 0x817   :  { %6013 = vpow2.f32 %v1496_v3  ;;  %v1490_v35 = vsub.f32 %v1474_v45, %v1480_v59 }
 0x819   :  { %v1494_v4 = vmul.f32 1.442695, %v1490_v35 }
 0x81a   :  { %v1486_v6 = vpop.xlane.xlu1 %1485 }
 0x81b   :  { %6015 = vpow2.f32 %v1494_v4  ;;  %v1492_v8 = vsub.f32 %v1476_v48, %v1486_v6 }
 0x81d   :  { %v1498_v25 = vmul.f32 1.442695, %v1492_v8 }
 0x81e   :  { %v1489_v10 = vpop.xlane.xlu1 %1488 }
 0x81f   :  { %6017 = vpow2.f32 %v1498_v25  ;;  %v1493_v11 = vsub.f32 %v1477_v56, %v1489_v10 }
 0x821   :  { %v6014_v13 = vpop.eup %6013  ;;  %v1500_v14 = vmul.f32 1.442695, %v1493_v11 }
 0x822   :  { %v1505_v18 = vsel %vm163_vm0, %v6014_v13, 0.0 }
 0x823   :  { %6019 = vpow2.f32 %v1500_v14  ;;  %1506 = vadd.xlane.f32.xlu1 %v1505_v18 }
 0x825   :  { %v6016_v19 = vpop.eup %6015 }
 0x826   :  { %v1502_v21 = vsel %vm163_vm0, %v6016_v19, 0.0 }
 0x827   :  { %1503 = vadd.xlane.f32.xlu1 %v1502_v21 }
 0x829   :  { %v6018_v22 = vpop.eup %6017 }
 0x82a   :  { %v1508_v23 = vsel %vm163_vm0, %v6018_v22, 0.0 }
 0x82b   :  { %1509 = vadd.xlane.f32.xlu1 %v1508_v23 }
 0x82d   :  { %v6020_v27 = vpop.eup %6019 }
 0x82e   :  { %v1511_v28 = vsel %vm163_vm0, %v6020_v27, 0.0 }
 0x82f   :  { %1512 = vadd.xlane.f32.xlu1 %v1511_v28 }
 0x862   :  { %1738 = vxpose.xlu1.b32.start [1/2] (short) (narrow) %v6685_v53, 32 }
 0x866   :  { %1739 = vxpose.xlu1.b32.end [2/2] (short) (narrow) %v6683_v51, 32 }
 0x8b0   :  { %v1507_v30 = vpop.xlane.xlu1 %1506 }
 0x8b1   :  { %6021 = vrcp.f32 %v1507_v30 }
 0x8b4   :  { %v1504_v32 = vpop.xlane.xlu1 %1503 }
 0x8b5   :  { %6023 = vrcp.f32 %v1504_v32 }
 0x8b8   :  { %v1510_v33 = vpop.xlane.xlu1 %1509 }
 0x8b9   :  { %6025 = vrcp.f32 %v1510_v33 }
 0x8bb   :  { %v6022_v16 = vpop.eup %6021 }
 0x8bc   :  { %v1513_v37 = vpop.xlane.xlu1 %1512  ;;  %v1517_v41 = vmul.f32 %v6022_v16, %v6014_v13 }
 0x8bd   :  { %6027 = vrcp.f32 %v1513_v37 }
 0x8bf   :  { %v6024_v38 = vpop.eup %6023 }
 0x8c0   :  { %v1515_v40 = vmul.f32 %v6024_v38, %v6016_v19 }
 0x8c2   :  { %5363 = vmatprep.mubr.msk.f32.mxu1 %vm163_vm0, %v1515_v40 }
 0x8c3   :  { %v6026_v42 = vpop.eup %6025  ;;  %5364 = vmatmul.mubr.msk.f32.vlgmr.msra.gmra.mrb[20].mxu1 %vm163_vm0, %v1517_v41 }
 0x8c4   :  { %5798 = vmatpush3.bf16.msra.mxu1 %v6687_v55  ;;  %v1519_v51 = vmul.f32 %v6026_v42, %v6018_v22  ;;  %v927_v55 = vld [vmem:[#allocation13] sm:$0xff] }
 0x8c5   :  { %v6807_v48 = vpack.c.bf16 %v928_v17, %v927_v55 }
 0x8c6   :  { %5366 = vmatprep.mubr.msk.f32.mxu1 %vm163_vm0, %v1519_v51 }
 0x8c7   :  { %v6028_v53 = vpop.eup %6027  ;;  %5788 = vmatprep.subr.bf16.mxu0 %v6807_v48 }
 0x8c8   :  { %v1521_v43 = vmul.f32 %v6028_v53, %v6020_v27  ;;  %5790 = vmatpush3.bf16.msra.mxu0 %v6807_v48 }
 0x8c9   :  { %5792 = vmatprep.subr.bf16.mxu0 %v6809_v54 }
 0x8ca   :  { %5367 = vmatmul.mubr.msk.f32.gmra.mrb[22].mxu1 %vm163_vm0, %v1521_v43 }
 0x8cc   :  { %5794 = vmatpush3.bf16.msra.mxu0 %v6809_v54 }
 0x8cd   :  { %5800 = vmatprep.subr.bf16.mxu0 %v6699_v0 }
 0x8e2   :  { %v1754_v44 = vpop.trf.xlu1 }
 0x8e3   :  { %5384 = vmatprep.mubr.msk.f32.mxu1 %vm968_vm1, %v1754_v44 }
 0x8e6   :  { %v1755_v45 = vpop.trf.xlu1 }
 0x8e7   :  { %5385 = vmatmul.mubr.msk.f32.vlgmr.msra.gmra.mrb[24].mxu1 %vm968_vm1, %v1755_v45 }
 0x8ea   :  { %v1756_v20 = vpop.trf.xlu1 }
 0x8eb   :  { %5387 = vmatprep.mubr.msk.f32.mxu1 %vm968_vm1, %v1756_v20 }
 0x8ee   :  { %v1757_v47 = vpop.trf.xlu1 }
 0x8ef   :  { %5388 = vmatmul.mubr.msk.f32.gmra.mrb[26].mxu1 %vm968_vm1, %v1757_v47 }
 0x8f0   :  { %5412 = vmatprep.mubr.msk.f32.mxu1 %vm163_vm0, %v6691_v61 }
 0x996   :  { %v5365_v56 = vpop.f32.mrb[20].mxu1 }
 0x997   :  { %v1606_v60 = vpop.f32.mrb[21].mxu1 }
 0x998   :  { %1625 = vxpose.xlu0.b32.start [1/4] (short) (narrow) %v1606_v60, 16 }
 0x99c   :  { %1626 = vxpose.xlu0.b32.cont [2/4] (short) (narrow) %v5365_v56, 16  ;;  %v933_v56 = vld [vmem:[#allocation13 + $0x28] sm:$0xff] }
 0x99d   :  { %v5368_v34 = vpop.f32.mrb[22].mxu1 }
 0x99e   :  { %v1616_v2 = vpop.f32.mrb[23].mxu1 }
 0x9a0   :  { %1627 = vxpose.xlu0.b32.cont [3/4] (short) (narrow) %v1616_v2, 16 }
 0x9a4   :  { %1628 = vxpose.xlu0.b32.end [4/4] (short) (narrow) %v5368_v34, 16 }
 0x9ba   :  { %v5386_v3 = vpop.f32.mrb[24].mxu1 }
 0x9bb   :  { %v1848_v59 = vpop.f32.mrb[25].mxu1 }
 0x9c2   :  { %v5389_v35 = vpop.f32.mrb[26].mxu1 }
 0x9c3   :  { %v1858_v4 = vpop.f32.mrb[27].mxu1 }
 0xa18   :  { %v1641_v6 = vpop.trf.xlu0 }
 0xa19   :  { %5377 = vmatprep.mubr.msk.f32.mxu0 %vm163_vm0, %v1641_v6 }
 0xa1c   :  { %v1642_v8 = vpop.trf.xlu0 }
 0xa1d   :  { %5378 = vmatmul.mubr.msk.f32.vlgmr.msra.gmra.mrb[24].mxu0 %vm163_vm0, %v1642_v8 }
 0xa1e   :  { %5802 = vmatpush3.bf16.msra.mxu0 %v6699_v0  ;;  %5398 = vmatprep.mubr.msk.f32.mxu0 %vm163_vm0, %v1848_v59 }
 0xa1f   :  { %5804 = vmatprep.subr.bf16.mxu0 %v6705_v57 }
 0xa22   :  { %5806 = vmatpush3.bf16.msra.mxu0 %v6705_v57 }
 0xa23   :  { %5816 = vmatprep.subr.bf16.mxu0 %v6699_v0 }
 0xa25   :  { %5399 = vmatmul.mubr.msk.f32.vlgmr.msra.gmra.mrb[26].mxu0 %vm163_vm0, %v5386_v3 }
 0xa26   :  { %5818 = vmatpush3.bf16.msra.mxu0 %v6699_v0  ;;  %5401 = vmatprep.mubr.msk.f32.mxu0 %vm163_vm0, %v1858_v4 }
 0xa27   :  { %5820 = vmatprep.subr.bf16.mxu0 %v6705_v57 }
 0xa29   :  { %5402 = vmatmul.mubr.msk.f32.gmra.mrb[28].mxu0 %vm163_vm0, %v5389_v35 }
 0xa2a   :  { %5822 = vmatpush3.bf16.msra.mxu0 %v6705_v57 }
 0xa2b   :  { %5833 = vmatprep.subr.msk.bf16.mxu0 %vm6736_vm2, %v6724_v12 }
 0xaf0   :  { %v6832_v25 = vpop.f32.mrb[24].mxu0 }
 0xaf1   :  { %v6834_v10 = vpop.f32.mrb[25].mxu0 }
 0xaf8   :  { %v5400_v11 = vpop.f32.mrb[26].mxu0 }
 0xaf9   :  { %v1945_v13 = vpop.f32.mrb[27].mxu0 }
 0xafa   :  { %v5807_v14 = vpack.c.bf16 %v5400_v11, %v1945_v13 }
 0xafc   :  { %v5403_v18 = vpop.f32.mrb[28].mxu0  ;;  %5808 = vmatprep.subr.bf16.mxu1 %v5807_v14 }
 0xafd   :  { %v1955_v19 = vpop.f32.mrb[29].mxu0  ;;  %5810 = vmatpush3.bf16.msra.mxu1 %v5807_v14 }
 0xafe   :  { %v5811_v21 = vpack.c.bf16 %v5403_v18, %v1955_v19 }
 0xb00   :  { %5812 = vmatprep.subr.bf16.mxu1 %v5811_v21 }
 0xb01   :  { %5814 = vmatpush3.bf16.msra.mxu1 %v5811_v21 }
 0xb04   :  { %5413 = vmatmul.mubr.msk.f32.vlgmr.msra.gmra.mrb[28].mxu1 %vm163_vm0, %v6693_v62 }
 0xb05   :  { %5415 = vmatprep.mubr.msk.f32.mxu1 %vm163_vm0, %v6695_v63 }
 0xb08   :  { %5416 = vmatmul.mubr.msk.f32.gmra.mrb[30].mxu1 %vm163_vm0, %v6701_v1 }
 0xb09   :  { %5440 = vmatprep.mubr.msk.f32.mxu1 %vm163_vm0, %v6691_v61 }
 0xbd7   :  { %v5414_v22 = vpop.f32.mrb[28].mxu1 }
 0xbd8   :  { %v2050_v23 = vmul.f32 0.015625, %v5414_v22  ;;  %v2030_v27 = vpop.f32.mrb[29].mxu1 }
 0xbd9   :  { %v2049_v28 = vmul.f32 0.015625, %v2030_v27 }
 0xbda   :  { %v2054_v30 = vsub.f32 %v5386_v3, %v2050_v23  ;;  %v6856_v3 = vpack.c.bf16 %v933_v56, %v932_v31 }
 0xbdb   :  { %v2053_v32 = vsub.f32 %v1848_v59, %v2049_v28  ;;  %v5417_v33 = vpop.f32.mrb[30].mxu1  ;;  %v935_v59 = vld [vmem:[#allocation13 + $0x38] sm:$0xff] }
 0xbdc   :  { %v2058_v37 = vmul.f32 %v2054_v30, %v6693_v62  ;;  %v2052_v16 = vmul.f32 0.015625, %v5417_v33  ;;  %v2040_v38 = vpop.f32.mrb[31].mxu1 }
 0xbdd   :  { %v2057_v40 = vmul.f32 %v2053_v32, %v6691_v61  ;;  %v2051_v41 = vmul.f32 0.015625, %v2040_v38 }
 0xbde   :  { %v2056_v42 = vsub.f32 %v5389_v35, %v2052_v16  ;;  %v2062_v43 = vmul.f32 %v2058_v37, %v2058_v37 }
 0xbdf   :  { %v2061_v51 = vmul.f32 %v2057_v40, %v2057_v40  ;;  %v2055_v53 = vsub.f32 %v1858_v4, %v2051_v41 }
 0xbe0   :  { %v2060_v44 = vmul.f32 %v2056_v42, %v6701_v1 }
 0xbe1   :  { %v2059_v45 = vmul.f32 %v2055_v53, %v6695_v63  ;;  %5426 = vmatprep.mubr.msk.f32.mxu0 %vm163_vm0, %v2061_v51 }
 0xbe2   :  { %5427 = vmatmul.mubr.msk.f32.vlgmr.msra.gmra.mrb[30].mxu0 %vm163_vm0, %v2062_v43  ;;  %v2064_v47 = vmul.f32 %v2060_v44, %v2060_v44 }
 0xbe3   :  { %v2063_v20 = vmul.f32 %v2059_v45, %v2059_v45  ;;  %5836 = vmatpush3.bf16.xpose.msk.msra.mxu0 %vm6736_vm2, %v6724_v12  ;;  %v934_v12 = vld [vmem:[#allocation13 + $0x30] sm:$0xff] }
 0xbe4   :  { %5850 = vmatprep.subr.bf16.mxu0 %v6699_v0  ;;  %v6859_v35 = vpack.c.bf16 %v935_v59, %v934_v12 }
 0xbe5   :  { %5429 = vmatprep.mubr.msk.f32.mxu0 %vm163_vm0, %v2063_v20 }
 0xbe6   :  { %5430 = vmatmul.mubr.msk.f32.gmra.mrb[32].mxu0 %vm163_vm0, %v2064_v47 }
 0xcb5   :  { %v5428_v55 = vpop.f32.mrb[30].mxu0 }
 0xcb6   :  { %v2143_v17 = vpop.f32.mrb[31].mxu0 }
 0xcb7   :  { %v5823_v24 = vpack.c.bf16 %v5428_v55, %v2143_v17 }
 0xcb9   :  { %v5431_v60 = vpop.f32.mrb[32].mxu0  ;;  %5824 = vmatprep.subr.bf16.mxu1 %v5823_v24 }
 0xcba   :  { %v2153_v34 = vpop.f32.mrb[33].mxu0  ;;  %5826 = vmatpush3.bf16.msra.mxu1 %v5823_v24 }
 0xcbb   :  { %v5827_v2 = vpack.c.bf16 %v5431_v60, %v2153_v34 }
 0xcbd   :  { %5828 = vmatprep.subr.bf16.mxu1 %v5827_v2 }
 0xcbe   :  { %5830 = vmatpush3.bf16.msra.mxu1 %v5827_v2 }
 0xcbf   :  { %5838 = vmatprep.subr.bf16.mxu1 %v6856_v3 }
 0xcc1   :  { %5441 = vmatmul.mubr.msk.f32.vlgmr.msra.gmra.mrb[32].mxu1 %vm163_vm0, %v6693_v62 }
 0xcc2   :  { %5840 = vmatpush3.bf16.msra.mxu1 %v6856_v3  ;;  %5443 = vmatprep.mubr.msk.f32.mxu1 %vm163_vm0, %v6695_v63 }
 0xcc3   :  { %5842 = vmatprep.subr.bf16.mxu1 %v6859_v35 }
 0xcc5   :  { %5444 = vmatmul.mubr.msk.f32.gmra.mrb[34].mxu1 %vm163_vm0, %v6701_v1 }
 0xcc6   :  { %5844 = vmatpush3.bf16.msra.mxu1 %v6859_v35 }
 0xcc7   :  { %5846 = vmatprep.subr.bf16.mxu1 %v6722_v9 }
 0xd94   :  { %v5442_v4 = vpop.f32.mrb[32].mxu1 }
 0xd95   :  { %v2248_v6 = vmul.f32 0.015625, %v5442_v4  ;;  %v2228_v8 = vpop.f32.mrb[33].mxu1 }
 0xd96   :  { %v2247_v11 = vmul.f32 0.015625, %v2228_v8 }
 0xd97   :  { %v2252_v13 = vadd.f32 1e-05, %v2248_v6 }
 0xd98   :  { %v2251_v14 = vadd.f32 1e-05, %v2247_v11  ;;  %v5445_v18 = vpop.f32.mrb[34].mxu1 }
 0xd99   :  { %6029 = vrsqrt.f32 %v2252_v13  ;;  %v2250_v19 = vmul.f32 0.015625, %v5445_v18  ;;  %v2238_v21 = vpop.f32.mrb[35].mxu1 }
 0xd9a   :  { %6031 = vrsqrt.f32 %v2251_v14  ;;  %v2249_v22 = vmul.f32 0.015625, %v2238_v21 }
 0xd9b   :  { %v2254_v23 = vadd.f32 1e-05, %v2250_v19 }
 0xd9c   :  { %v2253_v27 = vadd.f32 1e-05, %v2249_v22 }
 0xd9d   :  { %6033 = vrsqrt.f32 %v2254_v23 }
 0xd9e   :  { %6035 = vrsqrt.f32 %v2253_v27 }
 0xda3   :  { %v6030_v28 = vpop.eup %6029 }
 0xda4   :  { %v6032_v30 = vpop.eup %6031  ;;  %v2260_v32 = vmul.f32 %v6030_v28, %v2058_v37 }
 0xda5   :  { %v2259_v33 = vmul.f32 %v6032_v30, %v2057_v40 }
 0xda6   :  { %v2264_v16 = vadd.f32 %v2260_v32, %v6772_v36 }
 0xda7   :  { %v6034_v38 = vpop.eup %6033  ;;  %v2263_v41 = vadd.f32 %v2259_v33, %v6774_v39 }
 0xda8   :  { %v6036_v42 = vpop.eup %6035  ;;  %v2270_v51 = vsel %vm163_vm0, %v2264_v16, -inf  ;;  %v2262_v20 = vmul.f32 %v6034_v38, %v2060_v44 }
 0xda9   :  { %2271 = vmax.xlane.f32.xlu1 %v2270_v51  ;;  %v2267_v53 = vsel %vm163_vm0, %v2263_v41, -inf  ;;  %v2261_v43 = vmul.f32 %v6036_v42, %v2059_v45 }
 0xdaa   :  { %2268 = vmax.xlane.f32.xlu0 %v2267_v53  ;;  %v2266_v37 = vadd.f32 %v2262_v20, %v6785_v52 }
 0xdab   :  { %v2265_v47 = vadd.f32 %v2261_v43, %v6780_v46 }
 0xdac   :  { %v2276_v40 = vsel %vm163_vm0, %v2266_v37, -inf }
 0xdad   :  { %v2273_v55 = vsel %vm163_vm0, %v2265_v47, -inf }
 0xdae   :  { %2274 = vmax.xlane.f32.xlu0 %v2273_v55 }
 0xdb2   :  { %2277 = vmax.xlane.f32.xlu0 %v2276_v40 }
 0xe36   :  { %v2272_v17 = vpop.xlane.xlu1 %2271 }
 0xe37   :  { %v2280_v24 = vsub.f32 %v2264_v16, %v2272_v17  ;;  %v2269_v31 = vpop.xlane.xlu0 %2268 }
 0xe38   :  { %v2279_v56 = vsub.f32 %v2263_v41, %v2269_v31 }
 0xe39   :  { %v2285_v60 = vmul.f32 1.442695, %v2280_v24 }
 0xe3a   :  { %v2283_v34 = vmul.f32 1.442695, %v2279_v56 }
 0xe3b   :  { %6037 = vpow2.f32 %v2285_v60  ;;  %v2275_v45 = vpop.xlane.xlu0 %2274 }
 0xe3c   :  { %v2281_v44 = vsub.f32 %v2265_v47, %v2275_v45  ;;  %6039 = vpow2.f32 %v2283_v34 }
 0xe3e   :  { %v2287_v2 = vmul.f32 1.442695, %v2281_v44 }
 0xe3f   :  { %v2278_v12 = vpop.xlane.xlu0 %2277 }
 0xe40   :  { %v2282_v59 = vsub.f32 %v2266_v37, %v2278_v12  ;;  %6041 = vpow2.f32 %v2287_v2 }
 0xe42   :  { %v2289_v4 = vmul.f32 1.442695, %v2282_v59 }
 0xe44   :  { %6043 = vpow2.f32 %v2289_v4 }
 0xe45   :  { %v6038_v6 = vpop.eup %6037 }
 0xe46   :  { %v2294_v8 = vsel %vm163_vm0, %v6038_v6, 0.0  ;;  %v6040_v11 = vpop.eup %6039 }
 0xe47   :  { %2295 = vadd.xlane.f32.xlu0 %v2294_v8  ;;  %v2291_v13 = vsel %vm163_vm0, %v6040_v11, 0.0 }
 0xe4a   :  { %v6042_v14 = vpop.eup %6041 }
 0xe4b   :  { %2292 = vadd.xlane.f32.xlu0 %v2291_v13  ;;  %v2297_v19 = vsel %vm163_vm0, %v6042_v14, 0.0 }
 0xe4e   :  { %v6044_v18 = vpop.eup %6043 }
 0xe4f   :  { %2298 = vadd.xlane.f32.xlu0 %v2297_v19  ;;  %v2300_v21 = vsel %vm163_vm0, %v6044_v18, 0.0 }
 0xe50   :  { %2301 = vadd.xlane.f32.xlu1 %v2300_v21 }
 0xe83   :  { %2527 = vxpose.xlu1.b32.start [1/2] (short) (narrow) %v6681_v50, 32 }
 0xe87   :  { %2528 = vxpose.xlu1.b32.end [2/2] (short) (narrow) %v6679_v49, 32 }
 0xed4   :  { %v2296_v22 = vpop.xlane.xlu0 %2295 }
 0xed5   :  { %6045 = vrcp.f32 %v2296_v22 }
 0xed8   :  { %v2293_v23 = vpop.xlane.xlu0 %2292 }
 0xed9   :  { %6047 = vrcp.f32 %v2293_v23 }
 0xedc   :  { %v2299_v27 = vpop.xlane.xlu0 %2298 }
 0xedd   :  { %6049 = vrcp.f32 %v2299_v27  ;;  %v2302_v28 = vpop.xlane.xlu1 %2301 }
 0xede   :  { %6051 = vrcp.f32 %v2302_v28 }
 0xedf   :  { %v6046_v30 = vpop.eup %6045 }
 0xee0   :  { %v2306_v16 = vmul.f32 %v6046_v30, %v6038_v6 }
 0xee3   :  { %v6048_v32 = vpop.eup %6047 }
 0xee4   :  { %v2304_v33 = vmul.f32 %v6048_v32, %v6040_v11 }
 0xee6   :  { %5450 = vmatprep.mubr.msk.f32.mxu0 %vm163_vm0, %v2304_v33 }
 0xee7   :  { %v6050_v38 = vpop.eup %6049  ;;  %5451 = vmatmul.mubr.msk.f32.vlgmr.msra.gmra.mrb[34].mxu0 %vm163_vm0, %v2306_v16 }
 0xee8   :  { %v6052_v50 = vpop.eup %6051  ;;  %v2308_v41 = vmul.f32 %v6050_v38, %v6042_v14  ;;  %5852 = vmatpush3.bf16.msra.mxu0 %v6699_v0 }
 0xee9   :  { %v2310_v49 = vmul.f32 %v6052_v50, %v6044_v18  ;;  %5854 = vmatprep.subr.bf16.mxu0 %v6705_v57 }
 0xeea   :  { %5453 = vmatprep.mubr.msk.f32.mxu0 %vm163_vm0, %v2308_v41 }
 0xeeb   :  { %5454 = vmatmul.mubr.msk.f32.gmra.mrb[36].mxu0 %vm163_vm0, %v2310_v49 }
 0xeec   :  { %5856 = vmatpush3.bf16.msra.mxu0 %v6705_v57 }
 0xeed   :  { %5866 = vmatprep.subr.bf16.mxu0 %v6699_v0 }
 0xf03   :  { %v2543_v20 = vpop.trf.xlu1 }
 0xf07   :  { %v2544_v47 = vpop.trf.xlu1 }
 0xf0b   :  { %v2545_v40 = vpop.trf.xlu1 }
 0xf0f   :  { %v2546_v17 = vpop.trf.xlu1 }
 0xfba   :  { %v5452_v42 = vpop.f32.mrb[34].mxu0 }
 0xfbb   :  { %v2395_v51 = vpop.f32.mrb[35].mxu0 }
 0xfbc   :  { %2414 = vxpose.xlu0.b32.start [1/4] (short) (narrow) %v2395_v51, 16 }
 0xfbe   :  { %v5455_v53 = vpop.f32.mrb[36].mxu0 }
 0xfbf   :  { %v2405_v43 = vpop.f32.mrb[37].mxu0 }
 0xfc0   :  { %2415 = vxpose.xlu0.b32.cont [2/4] (short) (narrow) %v5452_v42, 16 }
 0xfc4   :  { %2416 = vxpose.xlu0.b32.cont [3/4] (short) (narrow) %v2405_v43, 16 }
 0xfc8   :  { %2417 = vxpose.xlu0.b32.end [4/4] (short) (narrow) %v5455_v53, 16 }
0x103c   :  { %v2430_v55 = vpop.trf.xlu0 }
0x103d   :  { %5464 = vmatprep.mubr.msk.f32.mxu1 %vm163_vm0, %v2430_v55 }
0x1040   :  { %v2431_v37 = vpop.trf.xlu0 }
0x1041   :  { %5465 = vmatmul.mubr.msk.f32.vlgmr.msra.gmra.mrb[36].mxu1 %vm163_vm0, %v2431_v37 }
0x1042   :  { %5848 = vmatpush3.bf16.msra.mxu1 %v6722_v9  ;;  %5471 = vmatprep.mubr.msk.f32.mxu1 %vm968_vm1, %v2543_v20 }
0x1045   :  { %5472 = vmatmul.mubr.msk.f32.vlgmr.msra.gmra.mrb[38].mxu1 %vm968_vm1, %v2544_v47 }
0x1046   :  { %5474 = vmatprep.mubr.msk.f32.mxu1 %vm968_vm1, %v2545_v40 }
0x1049   :  { %5475 = vmatmul.mubr.msk.f32.gmra.mrb[40].mxu1 %vm968_vm1, %v2546_v17 }
0x104a   :  { %5499 = vmatprep.mubr.msk.f32.mxu1 %vm163_vm0, %v6691_v61 }
0x1114   :  { %v6902_v24 = vpop.f32.mrb[36].mxu1 }
0x1115   :  { %v6904_v31 = vpop.f32.mrb[37].mxu1 }
0x1118   :  { %v5473_v56 = vpop.f32.mrb[38].mxu1 }
0x1119   :  { %v2637_v60 = vpop.f32.mrb[39].mxu1 }
0x111a   :  { %5485 = vmatprep.mubr.msk.f32.mxu0 %vm163_vm0, %v2637_v60 }
0x111b   :  { %5486 = vmatmul.mubr.msk.f32.vlgmr.msra.gmra.mrb[38].mxu0 %vm163_vm0, %v5473_v56 }
0x111c   :  { %5868 = vmatpush3.bf16.msra.mxu0 %v6699_v0  ;;  %v5476_v9 = vpop.f32.mrb[40].mxu1 }
0x111d   :  { %v2647_v34 = vpop.f32.mrb[41].mxu1  ;;  %5870 = vmatprep.subr.bf16.mxu0 %v6705_v57 }
0x111e   :  { %5488 = vmatprep.mubr.msk.f32.mxu0 %vm163_vm0, %v2647_v34 }
0x111f   :  { %5489 = vmatmul.mubr.msk.f32.gmra.mrb[40].mxu0 %vm163_vm0, %v5476_v9 }
0x1120   :  { %5872 = vmatpush3.bf16.msra.mxu0 %v6705_v57 }
0x1121   :  { %5883 = vmatprep.subr.msk.bf16.mxu0 %vm6736_vm2, %v6728_v26 }
0x11ee   :  { %v5487_v45 = vpop.f32.mrb[38].mxu0 }
0x11ef   :  { %v2734_v44 = vpop.f32.mrb[39].mxu0 }
0x11f0   :  { %v5857_v2 = vpack.c.bf16 %v5487_v45, %v2734_v44 }
0x11f2   :  { %v5490_v12 = vpop.f32.mrb[40].mxu0  ;;  %5858 = vmatprep.subr.bf16.mxu1 %v5857_v2 }
0x11f3   :  { %v2744_v59 = vpop.f32.mrb[41].mxu0  ;;  %5860 = vmatpush3.bf16.msra.mxu1 %v5857_v2 }
0x11f4   :  { %v5861_v4 = vpack.c.bf16 %v5490_v12, %v2744_v59 }
0x11f6   :  { %5862 = vmatprep.subr.bf16.mxu1 %v5861_v4 }
0x11f7   :  { %5864 = vmatpush3.bf16.msra.mxu1 %v5861_v4 }
0x11fa   :  { %5500 = vmatmul.mubr.msk.f32.vlgmr.msra.gmra.mrb[42].mxu1 %vm163_vm0, %v6693_v62 }
0x11fb   :  { %5502 = vmatprep.mubr.msk.f32.mxu1 %vm163_vm0, %v6695_v63 }
0x11fe   :  { %5503 = vmatmul.mubr.msk.f32.gmra.mrb[44].mxu1 %vm163_vm0, %v6701_v1 }
0x11ff   :  { %5527 = vmatprep.mubr.msk.f32.mxu1 %vm163_vm0, %v6691_v61 }
0x12cd   :  { %v5501_v6 = vpop.f32.mrb[42].mxu1 }
0x12ce   :  { %v2839_v8 = vmul.f32 0.015625, %v5501_v6  ;;  %v2819_v11 = vpop.f32.mrb[43].mxu1 }
0x12cf   :  { %v2838_v13 = vmul.f32 0.015625, %v2819_v11 }
0x12d0   :  { %v2843_v14 = vsub.f32 %v5473_v56, %v2839_v8 }
0x12d1   :  { %v2842_v18 = vsub.f32 %v2637_v60, %v2838_v13  ;;  %v5504_v19 = vpop.f32.mrb[44].mxu1 }
0x12d2   :  { %v2847_v21 = vmul.f32 %v2843_v14, %v6693_v62  ;;  %v2841_v22 = vmul.f32 0.015625, %v5504_v19  ;;  %v2829_v23 = vpop.f32.mrb[45].mxu1 }
0x12d3   :  { %v2846_v27 = vmul.f32 %v2842_v18, %v6691_v61  ;;  %v2840_v28 = vmul.f32 0.015625, %v2829_v23 }
0x12d4   :  { %v2845_v30 = vsub.f32 %v5476_v9, %v2841_v22  ;;  %v2851_v16 = vmul.f32 %v2847_v21, %v2847_v21 }
0x12d5   :  { %v2850_v32 = vmul.f32 %v2846_v27, %v2846_v27  ;;  %v2844_v33 = vsub.f32 %v2647_v34, %v2840_v28 }
0x12d6   :  { %v2849_v38 = vmul.f32 %v2845_v30, %v6701_v1 }
0x12d7   :  { %v2848_v50 = vmul.f32 %v2844_v33, %v6695_v63  ;;  %5513 = vmatprep.mubr.msk.f32.mxu0 %vm163_vm0, %v2850_v32 }
0x12d8   :  { %5514 = vmatmul.mubr.msk.f32.vlgmr.msra.gmra.mrb[42].mxu0 %vm163_vm0, %v2851_v16  ;;  %v2853_v49 = vmul.f32 %v2849_v38, %v2849_v38 }
0x12d9   :  { %v2852_v41 = vmul.f32 %v2848_v50, %v2848_v50  ;;  %5886 = vmatpush3.bf16.xpose.msk.msra.mxu0 %vm6736_vm2, %v6728_v26 }
0x12da   :  { %5896 = vmatprep.subr.bf16.mxu0 %v6689_v58 }
0x12db   :  { %5516 = vmatprep.mubr.msk.f32.mxu0 %vm163_vm0, %v2852_v41 }
0x12dc   :  { %5517 = vmatmul.mubr.msk.f32.gmra.mrb[44].mxu0 %vm163_vm0, %v2853_v49 }
0x13ab   :  { %v5515_v61 = vpop.f32.mrb[42].mxu0 }
0x13ac   :  { %v2932_v42 = vpop.f32.mrb[43].mxu0 }
0x13ad   :  { %v5873_v51 = vpack.c.bf16 %v5515_v61, %v2932_v42 }
0x13af   :  { %v5518_v53 = vpop.f32.mrb[44].mxu0  ;;  %5874 = vmatprep.subr.bf16.mxu1 %v5873_v51 }
0x13b0   :  { %v2942_v43 = vpop.f32.mrb[45].mxu0  ;;  %5876 = vmatpush3.bf16.msra.mxu1 %v5873_v51 }
0x13b1   :  { %v5877_v20 = vpack.c.bf16 %v5518_v53, %v2942_v43 }
0x13b3   :  { %5878 = vmatprep.subr.bf16.mxu1 %v5877_v20 }
0x13b4   :  { %5880 = vmatpush3.bf16.msra.mxu1 %v5877_v20 }
0x13b5   :  { %5888 = vmatprep.subr.bf16.mxu1 %v6807_v48 }
0x13b7   :  { %5528 = vmatmul.mubr.msk.f32.vlgmr.msra.gmra.mrb[46].mxu1 %vm163_vm0, %v6693_v62 }
0x13b8   :  { %5530 = vmatprep.mubr.msk.f32.mxu1 %vm163_vm0, %v6695_v63  ;;  %5890 = vmatpush3.bf16.msra.mxu1 %v6807_v48 }
0x13b9   :  { %5892 = vmatprep.subr.bf16.mxu1 %v6809_v54 }
0x13bb   :  { %5531 = vmatmul.mubr.msk.f32.gmra.mrb[48].mxu1 %vm163_vm0, %v6701_v1 }
0x13bc   :  { %5894 = vmatpush3.bf16.msra.mxu1 %v6809_v54 }
0x13bd   :  { %5900 = vmatprep.subr.bf16.mxu1 %v6699_v0 }
0x148a   :  { %v5529_v26 = vpop.f32.mrb[46].mxu1 }
0x148b   :  { %v3037_v47 = vmul.f32 0.015625, %v5529_v26  ;;  %v3017_v55 = vpop.f32.mrb[47].mxu1 }
0x148c   :  { %v3036_v37 = vmul.f32 0.015625, %v3017_v55 }
0x148d   :  { %v3041_v40 = vadd.f32 1e-05, %v3037_v47 }
0x148e   :  { %v3040_v62 = vadd.f32 1e-05, %v3036_v37  ;;  %v5532_v17 = vpop.f32.mrb[48].mxu1 }
0x148f   :  { %6053 = vrsqrt.f32 %v3041_v40  ;;  %v3039_v63 = vmul.f32 0.015625, %v5532_v17  ;;  %v3027_v56 = vpop.f32.mrb[49].mxu1 }
0x1490   :  { %6055 = vrsqrt.f32 %v3040_v62  ;;  %v3038_v48 = vmul.f32 0.015625, %v3027_v56 }
0x1491   :  { %v3043_v60 = vadd.f32 1e-05, %v3039_v63 }
0x1492   :  { %v3042_v9 = vadd.f32 1e-05, %v3038_v48 }
0x1493   :  { %6057 = vrsqrt.f32 %v3043_v60 }
0x1494   :  { %6059 = vrsqrt.f32 %v3042_v9 }
0x1499   :  { %v6054_v1 = vpop.eup %6053 }
0x149a   :  { %v6056_v54 = vpop.eup %6055  ;;  %v3049_v34 = vmul.f32 %v6054_v1, %v2847_v21 }
0x149b   :  { %v3048_v45 = vmul.f32 %v6056_v54, %v2846_v27 }
0x149c   :  { %v3053_v44 = vadd.f32 %v3049_v34, %v6772_v36 }
0x149d   :  { %v6058_v2 = vpop.eup %6057  ;;  %v3052_v12 = vadd.f32 %v3048_v45, %v6774_v39  ;;  %v6133_v45 = vld [vmem:[#allocation7] sm:$0xff] }
0x149e   :  { %v6060_v59 = vpop.eup %6059  ;;  %v3059_v4 = vsel %vm163_vm0, %v3053_v44, -inf  ;;  %v3051_v6 = vmul.f32 %v6058_v2, %v2849_v38 }
0x149f   :  { %3060 = vmax.xlane.f32.xlu1 %v3059_v4  ;;  %v3056_v8 = vsel %vm163_vm0, %v3052_v12, -inf  ;;  %v3050_v11 = vmul.f32 %v6060_v59, %v2848_v50 }
0x14a0   :  { %3057 = vmax.xlane.f32.xlu0 %v3056_v8  ;;  %v3055_v13 = vadd.f32 %v3051_v6, %v6785_v52 }
0x14a1   :  { %v3054_v14 = vadd.f32 %v3050_v11, %v6780_v46 }
0x14a2   :  { %v3065_v18 = vsel %vm163_vm0, %v3055_v13, -inf }
0x14a3   :  { %3066 = vmax.xlane.f32.xlu1 %v3065_v18  ;;  %v3062_v19 = vsel %vm163_vm0, %v3054_v14, -inf }
0x14a4   :  { %3063 = vmax.xlane.f32.xlu0 %v3062_v19 }
0x152c   :  { %v3061_v21 = vpop.xlane.xlu1 %3060 }
0x152d   :  { %v3069_v22 = vsub.f32 %v3053_v44, %v3061_v21  ;;  %v3058_v23 = vpop.xlane.xlu0 %3057 }
0x152e   :  { %v3068_v27 = vsub.f32 %v3052_v12, %v3058_v23 }
0x152f   :  { %v3074_v28 = vmul.f32 1.442695, %v3069_v22 }
0x1530   :  { %v3072_v30 = vmul.f32 1.442695, %v3068_v27  ;;  %v3067_v32 = vpop.xlane.xlu1 %3066 }
0x1531   :  { %6061 = vpow2.f32 %v3074_v28  ;;  %v3071_v33 = vsub.f32 %v3055_v13, %v3067_v32  ;;  %v3064_v16 = vpop.xlane.xlu0 %3063  ;;  %v6134_v28 = vld [vmem:[#allocation7 + $0x8] sm:$0xff] }
0x1532   :  { %6063 = vpow2.f32 %v3072_v30  ;;  %v3070_v38 = vsub.f32 %v3054_v14, %v3064_v16  ;;  %v6136_v30 = vld [vmem:[#allocation7 + $0x18] sm:$0xff] }
0x1533   :  { %v3078_v50 = vmul.f32 1.442695, %v3071_v33 }
0x1534   :  { %v3076_v41 = vmul.f32 1.442695, %v3070_v38 }
0x1535   :  { %6065 = vpow2.f32 %v3078_v50 }
0x1536   :  { %6067 = vpow2.f32 %v3076_v41 }
0x153b   :  { %v6062_v49 = vpop.eup %6061 }
0x153c   :  { %v6064_v61 = vpop.eup %6063  ;;  %v3083_v42 = vsel %vm163_vm0, %v6062_v49, 0.0 }
0x153d   :  { %3084 = vadd.xlane.f32.xlu1 %v3083_v42  ;;  %v3080_v51 = vsel %vm163_vm0, %v6064_v61, 0.0 }
0x153e   :  { %3081 = vadd.xlane.f32.xlu0 %v3080_v51 }
0x153f   :  { %v6066_v53 = vpop.eup %6065 }
0x1540   :  { %v6068_v43 = vpop.eup %6067  ;;  %v3089_v20 = vsel %vm163_vm0, %v6066_v53, 0.0 }
0x1541   :  { %3090 = vadd.xlane.f32.xlu1 %v3089_v20  ;;  %v3086_v26 = vsel %vm163_vm0, %v6068_v43, 0.0 }
0x1542   :  { %3087 = vadd.xlane.f32.xlu0 %v3086_v26 }
0x156f   :  { %3316 = vxpose.xlu0.b32.start [1/2] (short) (narrow) %v6720_v7, 32 }
0x1573   :  { %3317 = vxpose.xlu0.b32.end [2/2] (short) (narrow) %v6718_v5, 32 }
0x15ca   :  { %v3085_v47 = vpop.xlane.xlu1 %3084 }
0x15cb   :  { %6069 = vrcp.f32 %v3085_v47  ;;  %v3082_v55 = vpop.xlane.xlu0 %3081 }
0x15cc   :  { %6071 = vrcp.f32 %v3082_v55 }
0x15ce   :  { %v3091_v37 = vpop.xlane.xlu1 %3090 }
0x15cf   :  { %6073 = vrcp.f32 %v3091_v37  ;;  %v3088_v40 = vpop.xlane.xlu0 %3087 }
0x15d0   :  { %6075 = vrcp.f32 %v3088_v40 }
0x15d5   :  { %v6070_v62 = vpop.eup %6069 }
0x15d6   :  { %v6072_v17 = vpop.eup %6071  ;;  %v3095_v56 = vmul.f32 %v6070_v62, %v6062_v49 }
0x15d7   :  { %v3093_v63 = vmul.f32 %v6072_v17, %v6064_v61 }
0x15d9   :  { %v6074_v48 = vpop.eup %6073  ;;  %5537 = vmatprep.mubr.msk.f32.mxu0 %vm163_vm0, %v3093_v63 }
0x15da   :  { %v6076_v60 = vpop.eup %6075  ;;  %5538 = vmatmul.mubr.msk.f32.vlgmr.msra.gmra.mrb[46].mxu0 %vm163_vm0, %v3095_v56  ;;  %v3099_v7 = vmul.f32 %v6074_v48, %v6066_v53 }
0x15db   :  { %5898 = vmatpush3.bf16.msra.mxu0 %v6689_v58  ;;  %v3097_v5 = vmul.f32 %v6076_v60, %v6068_v43 }
0x15dd   :  { %5540 = vmatprep.mubr.msk.f32.mxu0 %vm163_vm0, %v3097_v5 }
0x15de   :  { %5541 = vmatmul.mubr.msk.f32.gmra.mrb[48].mxu0 %vm163_vm0, %v3099_v7 }
0x15ef   :  { %v3332_v9 = vpop.trf.xlu0 }
0x15f0   :  { %5558 = vmatprep.mubr.msk.f32.mxu0 %vm968_vm1, %v3332_v9 }
0x15f3   :  { %v3333_v1 = vpop.trf.xlu0 }
0x15f4   :  { %5559 = vmatmul.mubr.msk.f32.vlgmr.msra.gmra.mrb[50].mxu0 %vm968_vm1, %v3333_v1 }
0x15f7   :  { %v3334_v54 = vpop.trf.xlu0 }
0x15f8   :  { %5561 = vmatprep.mubr.msk.f32.mxu0 %vm968_vm1, %v3334_v54 }
0x15fb   :  { %v3335_v34 = vpop.trf.xlu0 }
0x15fc   :  { %5562 = vmatmul.mubr.msk.f32.gmra.mrb[52].mxu0 %vm968_vm1, %v3335_v34 }
0x15fd   :  { %5586 = vmatprep.mubr.msk.f32.mxu0 %vm163_vm0, %v6133_v45 }
0x16ad   :  { %v5539_v58 = vpop.f32.mrb[46].mxu0 }
0x16ae   :  { %v3184_v44 = vpop.f32.mrb[47].mxu0 }
0x16af   :  { %3203 = vxpose.xlu1.b32.start [1/4] (short) (narrow) %v3184_v44, 16 }
0x16b1   :  { %v5542_v2 = vpop.f32.mrb[48].mxu0 }
0x16b2   :  { %v3194_v12 = vpop.f32.mrb[49].mxu0 }
0x16b3   :  { %3204 = vxpose.xlu1.b32.cont [2/4] (short) (narrow) %v5539_v58, 16 }
0x16b7   :  { %3205 = vxpose.xlu1.b32.cont [3/4] (short) (narrow) %v3194_v12, 16 }
0x16bb   :  { %3206 = vxpose.xlu1.b32.end [4/4] (short) (narrow) %v5542_v2, 16 }
0x16c7   :  { %v5560_v59 = vpop.f32.mrb[50].mxu0 }
0x16c8   :  { %v3426_v4 = vpop.f32.mrb[51].mxu0 }
0x16cf   :  { %v5563_v6 = vpop.f32.mrb[52].mxu0 }
0x16d0   :  { %v3436_v8 = vpop.f32.mrb[53].mxu0 }
0x172f   :  { %v3219_v11 = vpop.trf.xlu1 }
0x1730   :  { %5551 = vmatprep.mubr.msk.f32.mxu1 %vm163_vm0, %v3219_v11 }
0x1733   :  { %v3220_v13 = vpop.trf.xlu1 }
0x1734   :  { %5552 = vmatmul.mubr.msk.f32.vlgmr.msra.gmra.mrb[50].mxu1 %vm163_vm0, %v3220_v13 }
0x1735   :  { %5902 = vmatpush3.bf16.msra.mxu1 %v6699_v0  ;;  %5572 = vmatprep.mubr.msk.f32.mxu1 %vm163_vm0, %v3426_v4 }
0x1736   :  { %5904 = vmatprep.subr.bf16.mxu1 %v6705_v57 }
0x1739   :  { %5906 = vmatpush3.bf16.msra.mxu1 %v6705_v57 }
0x173a   :  { %5916 = vmatprep.subr.bf16.mxu1 %v6699_v0 }
0x173c   :  { %5573 = vmatmul.mubr.msk.f32.vlgmr.msra.gmra.mrb[52].mxu1 %vm163_vm0, %v5560_v59 }
0x173d   :  { %5918 = vmatpush3.bf16.msra.mxu1 %v6699_v0  ;;  %5575 = vmatprep.mubr.msk.f32.mxu1 %vm163_vm0, %v3436_v8 }
0x173e   :  { %5920 = vmatprep.subr.bf16.mxu1 %v6705_v57 }
0x1740   :  { %5576 = vmatmul.mubr.msk.f32.gmra.mrb[54].mxu1 %vm163_vm0, %v5563_v6 }
0x1741   :  { %5922 = vmatpush3.bf16.msra.mxu1 %v6705_v57  ;;  %v6135_v57 = vld [vmem:[#allocation7 + $0x10] sm:$0xff] }
0x1742   :  { %5933 = vmatprep.subr.msk.bf16.mxu1 %vm6736_vm2, %v6726_v15 }
0x1807   :  { %v6987_v14 = vpop.f32.mrb[50].mxu1 }
0x1808   :  { %v6989_v18 = vpop.f32.mrb[51].mxu1 }
0x180f   :  { %v5574_v19 = vpop.f32.mrb[52].mxu1 }
0x1810   :  { %v3523_v21 = vpop.f32.mrb[53].mxu1 }
0x1811   :  { %v5907_v22 = vpack.c.bf16 %v5574_v19, %v3523_v21 }
0x1813   :  { %v5577_v0 = vpop.f32.mrb[54].mxu1  ;;  %5908 = vmatprep.subr.bf16.mxu0 %v5907_v22 }
0x1814   :  { %v3533_v23 = vpop.f32.mrb[55].mxu1  ;;  %5910 = vmatpush3.bf16.msra.mxu0 %v5907_v22 }
0x1815   :  { %v5911_v27 = vpack.c.bf16 %v5577_v0, %v3533_v23 }
0x1817   :  { %5912 = vmatprep.subr.bf16.mxu0 %v5911_v27 }
0x1818   :  { %5914 = vmatpush3.bf16.msra.mxu0 %v5911_v27 }
0x181b   :  { %5587 = vmatmul.mubr.msk.f32.vlgmr.msra.gmra.mrb[54].mxu0 %vm163_vm0, %v6134_v28 }
0x181c   :  { %5589 = vmatprep.mubr.msk.f32.mxu0 %vm163_vm0, %v6135_v57 }
0x181f   :  { %5590 = vmatmul.mubr.msk.f32.gmra.mrb[56].mxu0 %vm163_vm0, %v6136_v30 }
0x1820   :  { %5614 = vmatprep.mubr.msk.f32.mxu0 %vm163_vm0, %v6133_v45 }
0x18ee   :  { %v5588_v32 = vpop.f32.mrb[54].mxu0 }
0x18ef   :  { %v3628_v33 = vmul.f32 0.015625, %v5588_v32  ;;  %v3608_v16 = vpop.f32.mrb[55].mxu0 }
0x18f0   :  { %v3627_v38 = vmul.f32 0.015625, %v3608_v16 }
0x18f1   :  { %v3632_v50 = vsub.f32 %v5560_v59, %v3628_v33 }
0x18f2   :  { %v3631_v41 = vsub.f32 %v3426_v4, %v3627_v38  ;;  %v5591_v49 = vpop.f32.mrb[56].mxu0 }
0x18f3   :  { %v3636_v61 = vmul.f32 %v6134_v28, %v3632_v50  ;;  %v3630_v42 = vmul.f32 0.015625, %v5591_v49  ;;  %v3618_v51 = vpop.f32.mrb[57].mxu0 }
0x18f4   :  { %v3635_v53 = vmul.f32 %v6133_v45, %v3631_v41  ;;  %v3629_v43 = vmul.f32 0.015625, %v3618_v51 }
0x18f5   :  { %v3634_v20 = vsub.f32 %v5563_v6, %v3630_v42  ;;  %v3640_v55 = vmul.f32 %v3636_v61, %v3636_v61 }
0x18f6   :  { %v3639_v26 = vmul.f32 %v3635_v53, %v3635_v53  ;;  %v3633_v47 = vsub.f32 %v3436_v8, %v3629_v43 }
0x18f7   :  { %v3638_v37 = vmul.f32 %v6136_v30, %v3634_v20 }
0x18f8   :  { %v3637_v40 = vmul.f32 %v6135_v57, %v3633_v47  ;;  %5600 = vmatprep.mubr.msk.f32.mxu1 %vm163_vm0, %v3639_v26  ;;  %v6137_v47 = vld [vmem:[#allocation2] sm:$0xff] }
0x18f9   :  { %5601 = vmatmul.mubr.msk.f32.vlgmr.msra.gmra.mrb[56].mxu1 %vm163_vm0, %v3640_v55  ;;  %v3642_v17 = vmul.f32 %v3638_v37, %v3638_v37  ;;  %v7020_v55 = vadd.f32 %v6137_v47, %v6834_v10 }
0x18fa   :  { %v3641_v62 = vmul.f32 %v3637_v40, %v3637_v40  ;;  %5936 = vmatpush3.bf16.xpose.msk.msra.mxu1 %vm6736_vm2, %v6726_v15 }
0x18fc   :  { %5603 = vmatprep.mubr.msk.f32.mxu1 %vm163_vm0, %v3641_v62  ;;  %v6138_v62 = vld [vmem:[#allocation2 + $0x8] sm:$0xff] }
0x18fd   :  { %5604 = vmatmul.mubr.msk.f32.gmra.mrb[58].mxu1 %vm163_vm0, %v3642_v17  ;;  %v7025_v17 = vadd.f32 %v6138_v62, %v6832_v25 }
0x18ff   :  { %v4116_v10 = vsel %vm163_vm0, %v7025_v17, 0.0 }
0x19cc   :  { %v5602_v63 = vpop.f32.mrb[56].mxu1 }
0x19cd   :  { %v3721_v56 = vpop.f32.mrb[57].mxu1 }
0x19ce   :  { %v5923_v48 = vpack.c.bf16 %v5602_v63, %v3721_v56  ;;  %v4113_v63 = vsel %vm163_vm0, %v7020_v55, 0.0  ;;  %v6139_v56 = vld [vmem:[#allocation2 + $0x10] sm:$0xff] }
0x19d0   :  { %v5605_v60 = vpop.f32.mrb[58].mxu1  ;;  %5924 = vmatprep.subr.bf16.mxu0 %v5923_v48 }
0x19d1   :  { %v3731_v5 = vpop.f32.mrb[59].mxu1  ;;  %5926 = vmatpush3.bf16.msra.mxu0 %v5923_v48  ;;  %v7030_v48 = vadd.f32 %v6139_v56, %v6989_v18 }
0x19d2   :  { %v5927_v7 = vpack.c.bf16 %v5605_v60, %v3731_v5  ;;  %v6140_v60 = vld [vmem:[#allocation2 + $0x18] sm:$0xff] }
0x19d3   :  { %v7035_v5 = vadd.f32 %v6140_v60, %v6987_v14  ;;  %v4119_v25 = vsel %vm163_vm0, %v7030_v48, 0.0 }
0x19d4   :  { %5928 = vmatprep.subr.bf16.mxu0 %v5927_v7 }
0x19d5   :  { %5930 = vmatpush3.bf16.msra.mxu0 %v5927_v7  ;;  %v6141_v7 = vld [vmem:[#allocation5] sm:$0xff]  ;;  %v4122_v18 = vsel %vm163_vm0, %v7035_v5, 0.0 }
0x19d6   :  { %5938 = vmatprep.subr.bf16.mxu0 %v6856_v3 }
0x19d8   :  { %5615 = vmatmul.mubr.msk.f32.vlgmr.msra.gmra.mrb[58].mxu0 %vm163_vm0, %v6134_v28 }
0x19d9   :  { %5617 = vmatprep.mubr.msk.f32.mxu0 %vm163_vm0, %v6135_v57  ;;  %5940 = vmatpush3.bf16.msra.mxu0 %v6856_v3 }
0x19da   :  { %5942 = vmatprep.subr.bf16.mxu0 %v6859_v35 }
0x19dc   :  { %5618 = vmatmul.mubr.msk.f32.gmra.mrb[60].mxu0 %vm163_vm0, %v6136_v30 }
0x19dd   :  { %5944 = vmatpush3.bf16.msra.mxu0 %v6859_v35 }
0x1aab   :  { %v5616_v15 = vpop.f32.mrb[58].mxu0 }
0x1aac   :  { %v3826_v29 = vmul.f32 0.015625, %v5616_v15  ;;  %v3806_v9 = vpop.f32.mrb[59].mxu0  ;;  %v7040_v15 = vadd.f32 %v6141_v7, %v6904_v31 }
0x1aad   :  { %v3825_v1 = vmul.f32 0.015625, %v3806_v9 }
0x1aae   :  { %v3830_v54 = vadd.f32 1e-05, %v3826_v29  ;;  %v6142_v29 = vld [vmem:[#allocation5 + $0x8] sm:$0xff]  ;;  %v4125_v14 = vsel %vm163_vm0, %v7040_v15, 0.0 }
0x1aaf   :  { %v3829_v34 = vadd.f32 1e-05, %v3825_v1  ;;  %v5619_v45 = vpop.f32.mrb[60].mxu0  ;;  %v7045_v9 = vadd.f32 %v6142_v29, %v6902_v24 }
0x1ab0   :  { %6077 = vrsqrt.f32 %v3830_v54  ;;  %v3828_v58 = vmul.f32 0.015625, %v5619_v45  ;;  %v3816_v44 = vpop.f32.mrb[61].mxu0 }
0x1ab1   :  { %6079 = vrsqrt.f32 %v3829_v34  ;;  %v3827_v2 = vmul.f32 0.015625, %v3816_v44  ;;  %v4128_v1 = vsel %vm163_vm0, %v7045_v9, 0.0 }
0x1ab2   :  { %v3832_v12 = vadd.f32 1e-05, %v3828_v58 }
0x1ab3   :  { %v3831_v3 = vadd.f32 1e-05, %v3827_v2 }
0x1ab4   :  { %6081 = vrsqrt.f32 %v3832_v12 }
0x1ab5   :  { %6083 = vrsqrt.f32 %v3831_v3 }
0x1aba   :  { %v6078_v59 = vpop.eup %6077 }
0x1abb   :  { %v6080_v4 = vpop.eup %6079  ;;  %v3838_v6 = vmul.f32 %v6078_v59, %v3636_v61 }
0x1abc   :  { %v3837_v35 = vmul.f32 %v6080_v4, %v3635_v53 }
0x1abd   :  { %v3842_v8 = vadd.f32 %v3838_v6, %v6772_v36 }
0x1abe   :  { %v6082_v11 = vpop.eup %6081  ;;  %v3841_v13 = vadd.f32 %v3837_v35, %v6774_v39 }
0x1abf   :  { %v6084_v19 = vpop.eup %6083  ;;  %v3848_v21 = vsel %vm163_vm0, %v3842_v8, -inf  ;;  %v3840_v22 = vmul.f32 %v6082_v11, %v3638_v37 }
0x1ac0   :  { %3849 = vmax.xlane.f32.xlu1 %v3848_v21  ;;  %v3845_v0 = vsel %vm163_vm0, %v3841_v13, -inf  ;;  %v3839_v23 = vmul.f32 %v6084_v19, %v3637_v40 }
0x1ac1   :  { %3846 = vmax.xlane.f32.xlu0 %v3845_v0  ;;  %v3844_v27 = vadd.f32 %v3840_v22, %v6785_v52 }
0x1ac2   :  { %v3843_v28 = vadd.f32 %v3839_v23, %v6780_v46 }
0x1ac3   :  { %v3854_v57 = vsel %vm163_vm0, %v3844_v27, -inf }
0x1ac4   :  { %3855 = vmax.xlane.f32.xlu1 %v3854_v57  ;;  %v3851_v36 = vsel %vm163_vm0, %v3843_v28, -inf  ;;  %v6143_v57 = vld [vmem:[#allocation5 + $0x10] sm:$0xff] }
0x1ac5   :  { %3852 = vmax.xlane.f32.xlu0 %v3851_v36 }
0x1b4d   :  { %v3850_v39 = vpop.xlane.xlu1 %3849 }
0x1b4e   :  { %v3858_v30 = vsub.f32 %v3842_v8, %v3850_v39  ;;  %v3847_v32 = vpop.xlane.xlu0 %3846 }
0x1b4f   :  { %v3857_v33 = vsub.f32 %v3841_v13, %v3847_v32  ;;  %v6144_v32 = vld [vmem:[#allocation5 + $0x18] sm:$0xff] }
0x1b50   :  { %v3863_v16 = vmul.f32 1.442695, %v3858_v30 }
0x1b51   :  { %v3861_v38 = vmul.f32 1.442695, %v3857_v33  ;;  %v3856_v50 = vpop.xlane.xlu1 %3855 }
0x1b52   :  { %6085 = vpow2.f32 %v3863_v16  ;;  %v3860_v41 = vsub.f32 %v3844_v27, %v3856_v50  ;;  %v3853_v49 = vpop.xlane.xlu0 %3852 }
0x1b53   :  { %6087 = vpow2.f32 %v3861_v38  ;;  %v3859_v52 = vsub.f32 %v3843_v28, %v3853_v49 }
0x1b54   :  { %v3867_v61 = vmul.f32 1.442695, %v3860_v41 }
0x1b55   :  { %v3865_v46 = vmul.f32 1.442695, %v3859_v52 }
0x1b56   :  { %6089 = vpow2.f32 %v3867_v61 }
0x1b57   :  { %6091 = vpow2.f32 %v3865_v46 }
0x1b5c   :  { %v6086_v42 = vpop.eup %6085 }
0x1b5d   :  { %v6088_v51 = vpop.eup %6087  ;;  %v3872_v53 = vsel %vm163_vm0, %v6086_v42, 0.0 }
0x1b5e   :  { %3873 = vadd.xlane.f32.xlu1 %v3872_v53  ;;  %v3869_v43 = vsel %vm163_vm0, %v6088_v51, 0.0 }
0x1b5f   :  { %3870 = vadd.xlane.f32.xlu0 %v3869_v43 }
0x1b60   :  { %v6090_v20 = vpop.eup %6089 }
0x1b61   :  { %v6092_v26 = vpop.eup %6091  ;;  %v3878_v37 = vsel %vm163_vm0, %v6090_v20, 0.0 }
0x1b62   :  { %3879 = vadd.xlane.f32.xlu1 %v3878_v37  ;;  %v3875_v40 = vsel %vm163_vm0, %v6092_v26, 0.0 }
0x1b63   :  { %3876 = vadd.xlane.f32.xlu0 %v3875_v40 }
0x1b66   :  { %4114 = vadd.xlane.f32.xlu1 %v4113_v63 }
0x1b6a   :  { %4117 = vadd.xlane.f32.xlu1 %v4116_v10 }
0x1b6e   :  { %4120 = vadd.xlane.f32.xlu1 %v4119_v25 }
0x1b72   :  { %4123 = vadd.xlane.f32.xlu1 %v4122_v18 }
0x1b76   :  { %4126 = vadd.xlane.f32.xlu1 %v4125_v14  ;;  %v4253_v14 = vld [vmem:[#allocation14] sm:$0xff] }
0x1b7a   :  { %4129 = vadd.xlane.f32.xlu1 %v4128_v1  ;;  %v4254_v1 = vld [vmem:[#allocation14 + $0x8] sm:$0xff] }
0x1beb   :  { %v3874_v54 = vpop.xlane.xlu1 %3873 }
0x1bec   :  { %6093 = vrcp.f32 %v3874_v54  ;;  %v3871_v31 = vpop.xlane.xlu0 %3870  ;;  %v5945_v54 = vpack.c.bf16 %v4254_v1, %v4253_v14 }
0x1bed   :  { %6095 = vrcp.f32 %v3871_v31  ;;  %v4255_v31 = vld [vmem:[#allocation14 + $0x10] sm:$0xff] }
0x1bee   :  { %5946 = vmatprep.subr.bf16.mxu1 %v5945_v54 }
0x1bef   :  { %v3880_v34 = vpop.xlane.xlu1 %3879 }
0x1bf0   :  { %6097 = vrcp.f32 %v3880_v34  ;;  %v3877_v45 = vpop.xlane.xlu0 %3876  ;;  %v4256_v34 = vld [vmem:[#allocation14 + $0x18] sm:$0xff] }
0x1bf1   :  { %6099 = vrcp.f32 %v3877_v45  ;;  %v5949_v45 = vpack.c.bf16 %v4256_v34, %v4255_v31 }
0x1bf3   :  { %v4115_v21 = vpop.xlane.xlu1 %4114 }
0x1bf4   :  { %v4137_v23 = vmul.f32 0.03125, %v4115_v21 }
0x1bf6   :  { %v6094_v58 = vpop.eup %6093  ;;  %v7060_v39 = vsub.f32 %v7020_v55, %v4137_v23 }
0x1bf7   :  { %v6096_v44 = vpop.eup %6095  ;;  %v3884_v2 = vmul.f32 %v6094_v58, %v6086_v42  ;;  %v4118_v22 = vpop.xlane.xlu1 %4117  ;;  %v4491_v58 = vld [vmem:[#allocation14 + $0x40] sm:$0xff] }
0x1bf8   :  { %v3882_v24 = vmul.f32 %v6096_v44, %v6088_v51  ;;  %v4138_v30 = vmul.f32 0.03125, %v4118_v22  ;;  %v4153_v52 = vmul.f32 %v7060_v39, %v7060_v39  ;;  %v4492_v44 = vld [vmem:[#allocation14 + $0x48] sm:$0xff] }
0x1bfa   :  { %v6098_v12 = vpop.eup %6097  ;;  %5624 = vmatprep.mubr.msk.f32.mxu1 %vm163_vm0, %v3882_v24  ;;  %v7067_v50 = vsub.f32 %v7025_v17, %v4138_v30  ;;  %v4161_v51 = vsel %vm163_vm0, %v4153_v52, 0.0  ;;  %v5961_v24 = vpack.c.bf16 %v4492_v44, %v4491_v58  ;;  %v4905_v58 = vld [vmem:[%s7189_s3 + $0x5] ss:$0 sm:$0xff] }
0x1bfb   :  { %v6100_v3 = vpop.eup %6099  ;;  %5625 = vmatmul.mubr.msk.f32.vlgmr.msra.gmra.mrb[60].mxu1 %vm163_vm0, %v3884_v2  ;;  %v3888_v4 = vmul.f32 %v6098_v12, %v6090_v20  ;;  %v4121_v0 = vpop.xlane.xlu1 %4120 }
0x1bfc   :  { %v3886_v59 = vmul.f32 %v6100_v3, %v6092_v26  ;;  %v4139_v41 = vmul.f32 0.03125, %v4121_v0  ;;  %v4154_v53 = vmul.f32 %v7067_v50, %v7067_v50  ;;  %5948 = vmatpush3.bf16.msra.mxu1 %v5945_v54 }
0x1bfd   :  { %5950 = vmatprep.subr.bf16.mxu1 %v5949_v45 }
0x1bfe   :  { %5627 = vmatprep.mubr.msk.f32.mxu1 %vm163_vm0, %v3886_v59  ;;  %v7074_v46 = vsub.f32 %v7030_v48, %v4139_v41  ;;  %v4164_v26 = vsel %vm163_vm0, %v4154_v53, 0.0 }
0x1bff   :  { %5628 = vmatmul.mubr.msk.f32.gmra.mrb[62].mxu1 %vm163_vm0, %v3888_v4  ;;  %v4124_v38 = vpop.xlane.xlu1 %4123 }
0x1c00   :  { %v4140_v42 = vmul.f32 0.03125, %v4124_v38  ;;  %v4155_v47 = vmul.f32 %v7074_v46, %v7074_v46  ;;  %5952 = vmatpush3.bf16.msra.mxu1 %v5949_v45 }
0x1c01   :  { %5962 = vmatprep.subr.bf16.mxu1 %v5961_v24 }
0x1c02   :  { %v7080_v43 = vsub.f32 %v7035_v5, %v4140_v42  ;;  %v4167_v63 = vsel %vm163_vm0, %v4155_v47, 0.0 }
0x1c03   :  { %v4127_v61 = vpop.xlane.xlu1 %4126 }
0x1c04   :  { %v4141_v20 = vmul.f32 0.03125, %v4127_v61  ;;  %v4156_v56 = vmul.f32 %v7080_v43, %v7080_v43 }
0x1c06   :  { %v7086_v40 = vsub.f32 %v7040_v15, %v4141_v20  ;;  %v4170_v60 = vsel %vm163_vm0, %v4156_v56, 0.0  ;;  %v4493_v56 = vld [vmem:[#allocation14 + $0x50] sm:$0xff] }
0x1c07   :  { %v4130_v37 = vpop.xlane.xlu1 %4129 }
0x1c08   :  { %v4142_v62 = vmul.f32 0.03125, %v4130_v37  ;;  %v4157_v25 = vmul.f32 %v7086_v40, %v7086_v40 }
0x1c0a   :  { %v7092_v10 = vsub.f32 %v7045_v9, %v4142_v62  ;;  %v4173_v7 = vsel %vm163_vm0, %v4157_v25, 0.0 }
0x1c0c   :  { %v4158_v18 = vmul.f32 %v7092_v10, %v7092_v10 }
0x1c0e   :  { %v4176_v29 = vsel %vm163_vm0, %v4158_v18, 0.0 }
0x1cce   :  { %v5626_v6 = vpop.f32.mrb[60].mxu1 }
0x1ccf   :  { %v3973_v35 = vpop.f32.mrb[61].mxu1 }
0x1cd0   :  { %3992 = vxpose.xlu0.b32.start [1/4] (short) (narrow) %v3973_v35, 16 }
0x1cd2   :  { %v5629_v8 = vpop.f32.mrb[62].mxu1 }
0x1cd3   :  { %v3983_v11 = vpop.f32.mrb[63].mxu1 }
0x1cd4   :  { %3993 = vxpose.xlu0.b32.cont [2/4] (short) (narrow) %v5626_v6, 16 }
0x1cd8   :  { %3994 = vxpose.xlu0.b32.cont [3/4] (short) (narrow) %v3983_v11, 16 }
0x1cdc   :  { %3995 = vxpose.xlu0.b32.end [4/4] (short) (narrow) %v5629_v8, 16 }
0x1d50   :  { %v4008_v13 = vpop.trf.xlu0 }
0x1d51   :  { %5638 = vmatprep.mubr.msk.f32.mxu0 %vm163_vm0, %v4008_v13 }
0x1d54   :  { %v4009_v19 = vpop.trf.xlu0 }
0x1d55   :  { %5639 = vmatmul.mubr.msk.f32.vlgmr.msra.gmra.mrb[62].mxu0 %vm163_vm0, %v4009_v19 }
0x1e28   :  { %v5640_v27 = vpop.f32.mrb[62].mxu0 }
0x1e29   :  { %v4096_v28 = vpop.f32.mrb[63].mxu0  ;;  %v7062_v33 = vadd.f32 %v6144_v32, %v5640_v27 }
0x1e2a   :  { %v7057_v36 = vadd.f32 %v6143_v57, %v4096_v28 }
0x1e2b   :  { %v4134_v49 = vsel %vm163_vm0, %v7062_v33, 0.0 }
0x1e2c   :  { %v4131_v16 = vsel %vm163_vm0, %v7057_v36, 0.0 }
0x1e2d   :  { %4132 = vadd.xlane.f32.xlu1 %v4131_v16 }
0x1e31   :  { %4135 = vadd.xlane.f32.xlu1 %v4134_v49  ;;  %v4903_v49 = vld [vmem:[%s7189_s3 + $0x4] ss:$0 sm:$0xff] }
0x1e35   :  { %4162 = vadd.xlane.f32.xlu1 %v4161_v51  ;;  %v4904_v51 = vld [vmem:[#allocation8 + $0x4] ss:$0 sm:$0xff] }
0x1e39   :  { %4165 = vadd.xlane.f32.xlu1 %v4164_v26 }
0x1e3d   :  { %4168 = vadd.xlane.f32.xlu1 %v4167_v63 }
0x1e41   :  { %4171 = vadd.xlane.f32.xlu1 %v4170_v60  ;;  %v4494_v60 = vld [vmem:[#allocation14 + $0x58] sm:$0xff] }
0x1e42   :  { %v5965_v14 = vpack.c.bf16 %v4494_v60, %v4493_v56 }
0x1e45   :  { %4174 = vadd.xlane.f32.xlu1 %v4173_v7 }
0x1e49   :  { %4177 = vadd.xlane.f32.xlu1 %v4176_v29 }
0x1eba   :  { %v4133_v2 = vpop.xlane.xlu1 %4132 }
0x1ebb   :  { %v4143_v12 = vmul.f32 0.03125, %v4133_v2  ;;  %v4906_v2 = vld [vmem:[#allocation8 + $0x5] ss:$0 sm:$0xff] }
0x1ebd   :  { %v7102_v3 = vsub.f32 %v7057_v36, %v4143_v12 }
0x1ebe   :  { %v4136_v59 = vpop.xlane.xlu1 %4135 }
0x1ebf   :  { %v4144_v4 = vmul.f32 0.03125, %v4136_v59  ;;  %v4159_v6 = vmul.f32 %v7102_v3, %v7102_v3 }
0x1ec1   :  { %v7107_v35 = vsub.f32 %v7062_v33, %v4144_v4  ;;  %v4179_v8 = vsel %vm163_vm0, %v4159_v6, 0.0 }
0x1ec2   :  { %4180 = vadd.xlane.f32.xlu0 %v4179_v8  ;;  %v4163_v11 = vpop.xlane.xlu1 %4162  ;;  %v4380_v8 = vld [vmem:[#allocation14 + $0x20] sm:$0xff] }
0x1ec3   :  { %v4185_v13 = vmul.f32 0.03125, %v4163_v11  ;;  %v4160_v19 = vmul.f32 %v7107_v35, %v7107_v35  ;;  %v4381_v11 = vld [vmem:[#allocation14 + $0x28] sm:$0xff] }
0x1ec5   :  { %v4193_v21 = vadd.f32 1e-06, %v4185_v13  ;;  %v4182_v22 = vsel %vm163_vm0, %v4160_v19, 0.0  ;;  %v5953_v13 = vpack.c.bf16 %v4381_v11, %v4380_v8  ;;  %v4383_v19 = vld [vmem:[#allocation14 + $0x38] sm:$0xff] }
0x1ec6   :  { %4183 = vadd.xlane.f32.xlu1 %v4182_v22  ;;  %v4166_v0 = vpop.xlane.xlu1 %4165  ;;  %v4619_v22 = vld [vmem:[#allocation14 + $0x60] sm:$0xff] }
0x1ec7   :  { %6101 = vrsqrt.f32 %v4193_v21  ;;  %v4186_v23 = vmul.f32 0.03125, %v4166_v0  ;;  %5954 = vmatprep.subr.bf16.mxu0 %v5953_v13  ;;  %v4620_v0 = vld [vmem:[#allocation14 + $0x68] sm:$0xff] }
0x1ec8   :  { %5956 = vmatpush3.bf16.msra.mxu0 %v5953_v13 }
0x1ec9   :  { %v4194_v27 = vadd.f32 1e-06, %v4186_v23 }
0x1eca   :  { %v4169_v28 = vpop.xlane.xlu1 %4168 }
0x1ecb   :  { %6103 = vrsqrt.f32 %v4194_v27  ;;  %v4187_v57 = vmul.f32 0.03125, %v4169_v28 }
0x1ecd   :  { %v4195_v30 = vadd.f32 1e-06, %v4187_v57 }
0x1ece   :  { %v4172_v32 = vpop.xlane.xlu1 %4171 }
0x1ecf   :  { %6105 = vrsqrt.f32 %v4195_v30  ;;  %v4188_v16 = vmul.f32 0.03125, %v4172_v32 }
0x1ed1   :  { %v6102_v38 = vpop.eup %6101  ;;  %v4196_v41 = vadd.f32 1e-06, %v4188_v16 }
0x1ed2   :  { %v4175_v52 = vpop.xlane.xlu1 %4174  ;;  %v4209_v61 = vmul.f32 %v6102_v38, %v7060_v39 }
0x1ed3   :  { %6107 = vrsqrt.f32 %v4196_v41  ;;  %v4189_v42 = vmul.f32 0.03125, %v4175_v52 }
0x1ed4   :  { %v4222_v53 = vmul.f32 %v4903_v49, %v4209_v61 }
0x1ed5   :  { %v6104_v20 = vpop.eup %6103  ;;  %v4197_v26 = vadd.f32 1e-06, %v4189_v42 }
0x1ed6   :  { %v4210_v47 = vmul.f32 %v6104_v20, %v7067_v50  ;;  %v4178_v37 = vpop.xlane.xlu1 %4177  ;;  %v4231_v62 = vadd.f32 %v4904_v51, %v4222_v53  ;;  %v4907_v53 = vld [vmem:[%s7195_s9] ss:$0 sm:$0xff] }
0x1ed7   :  { %6109 = vrsqrt.f32 %v4197_v26  ;;  %v4190_v63 = vmul.f32 0.03125, %v4178_v37 }
0x1ed8   :  { %v4223_v25 = vmul.f32 %v4903_v49, %v4210_v47  ;;  %5649 = vmatprep.mubr.msk.f32.mxu1 %vm163_vm0, %v4231_v62 }
0x1ed9   :  { %v6106_v7 = vpop.eup %6105  ;;  %v4198_v18 = vadd.f32 1e-06, %v4190_v63 }
0x1eda   :  { %v4232_v39 = vadd.f32 %v4904_v51, %v4223_v25  ;;  %v4211_v29 = vmul.f32 %v6106_v7, %v7074_v46 }
0x1edb   :  { %6111 = vrsqrt.f32 %v4198_v18  ;;  %v4918_v18 = vld [vmem:[%s7195_s9 + $0x2] ss:$0 sm:$0xff] }
0x1edc   :  { %5650 = vmatmul.mubr.msk.f32.vlgmr.msra.gmra.mrb[64].mxu1 %vm163_vm0, %v4232_v39  ;;  %v4224_v1 = vmul.f32 %v4903_v49, %v4211_v29 }
0x1edd   :  { %v6108_v50 = vpop.eup %6107  ;;  %5964 = vmatpush3.bf16.msra.mxu1 %v5961_v24 }
0x1ede   :  { %v4233_v54 = vadd.f32 %v4904_v51, %v4224_v1  ;;  %v4212_v31 = vmul.f32 %v6108_v50, %v7080_v43  ;;  %5966 = vmatprep.subr.bf16.mxu1 %v5965_v14 }
0x1ee0   :  { %5652 = vmatprep.mubr.msk.f32.mxu1 %vm163_vm0, %v4233_v54  ;;  %v4225_v34 = vmul.f32 %v4903_v49, %v4212_v31 }
0x1ee1   :  { %v6110_v45 = vpop.eup %6109  ;;  %5968 = vmatpush3.bf16.msra.mxu1 %v5965_v14 }
0x1ee2   :  { %v4234_v46 = vadd.f32 %v4904_v51, %v4225_v34  ;;  %v4213_v44 = vmul.f32 %v6110_v45, %v7086_v40  ;;  %v4382_v40 = vld [vmem:[#allocation14 + $0x30] sm:$0xff] }
0x1ee3   :  { %v5957_v21 = vpack.c.bf16 %v4383_v19, %v4382_v40  ;;  %v4621_v45 = vld [vmem:[#allocation14 + $0x70] sm:$0xff] }
0x1ee4   :  { %5653 = vmatmul.mubr.msk.f32.gmra.mrb[66].mxu1 %vm163_vm0, %v4234_v46  ;;  %v4240_v24 = vmul.f32 %v4905_v58, %v4213_v44 }
0x1ee5   :  { %v6112_v12 = vpop.eup %6111  ;;  %5958 = vmatprep.subr.bf16.mxu0 %v5957_v21 }
0x1ee6   :  { %v4214_v43 = vmul.f32 %v6112_v12, %v7092_v10  ;;  %v4249_v59 = vadd.f32 %v4906_v2, %v4240_v24  ;;  %5960 = vmatpush3.bf16.msra.mxu0 %v5957_v21  ;;  %v5969_v10 = vpack.c.bf16 %v4620_v0, %v4619_v22 }
0x1ee8   :  { %v4241_v4 = vmul.f32 %v4905_v58, %v4214_v43  ;;  %5677 = vmatprep.mubr.msk.f32.mxu1 %vm163_vm0, %v4249_v59  ;;  %5970 = vmatprep.subr.bf16.mxu0 %v5969_v10 }
0x1eea   :  { %v4250_v6 = vadd.f32 %v4906_v2, %v4241_v4 }
0x1eec   :  { %5678 = vmatmul.mubr.msk.f32.vlgmr.msra.gmra.mrb[68].mxu1 %vm163_vm0, %v4250_v6 }
0x1f4f   :  { %v4181_v23 = vpop.xlane.xlu0 %4180 }
0x1f50   :  { %v4191_v27 = vmul.f32 0.03125, %v4181_v23 }
0x1f52   :  { %v4199_v28 = vadd.f32 1e-06, %v4191_v27 }
0x1f53   :  { %v4184_v57 = vpop.xlane.xlu1 %4183 }
0x1f54   :  { %6113 = vrsqrt.f32 %v4199_v28  ;;  %v4192_v30 = vmul.f32 0.03125, %v4184_v57 }
0x1f56   :  { %v4200_v32 = vadd.f32 1e-06, %v4192_v30 }
0x1f58   :  { %6115 = vrsqrt.f32 %v4200_v32 }
0x1f5e   :  { %v6114_v16 = vpop.eup %6113 }
0x1f5f   :  { %v4215_v38 = vmul.f32 %v6114_v16, %v7102_v3 }
0x1f61   :  { %v4242_v41 = vmul.f32 %v4905_v58, %v4215_v38 }
0x1f62   :  { %v6116_v49 = vpop.eup %6115 }
0x1f63   :  { %v4251_v52 = vadd.f32 %v4906_v2, %v4242_v41  ;;  %v4216_v61 = vmul.f32 %v6116_v49, %v7107_v35 }
0x1f65   :  { %5680 = vmatprep.mubr.msk.f32.mxu1 %vm163_vm0, %v4251_v52  ;;  %v4243_v42 = vmul.f32 %v4905_v58, %v4216_v61  ;;  %v4622_v58 = vld [vmem:[#allocation14 + $0x78] sm:$0xff] }
0x1f66   :  { %v5973_v59 = vpack.c.bf16 %v4622_v58, %v4621_v45 }
0x1f67   :  { %v4252_v51 = vadd.f32 %v4906_v2, %v4243_v42 }
0x1f69   :  { %5681 = vmatmul.mubr.msk.f32.gmra.mrb[70].mxu1 %vm163_vm0, %v4252_v51 }
0x1faf   :  { %v5651_v20 = vpop.f32.mrb[64].mxu1 }
0x1fb0   :  { %v4346_v26 = vadd.f32 %v5651_v20, %v4907_v53  ;;  %v4340_v47 = vpop.f32.mrb[65].mxu1 }
0x1fb1   :  { %v4341_v37 = vadd.f32 %v4907_v53, %v4340_v47 }
0x1fb2   :  { %v4364_v3 = vmul.f32 0.70710677, %v4346_v26  ;;  %v4360_v46 = vmul.f32 0.5, %v4346_v26 }
0x1fb3   :  { %v4363_v62 = vmul.f32 0.70710677, %v4341_v37  ;;  %v4359_v50 = vmul.f32 0.5, %v4341_v37 }
0x1fb4   :  { %6117 = verf.f32 %v4364_v3  ;;  %v4912_v3 = vld [vmem:[%s7195_s9 + $0x1] ss:$0 sm:$0xff] }
0x1fb5   :  { %6119 = verf.f32 %v4363_v62 }
0x1fb7   :  { %v5654_v63 = vpop.f32.mrb[66].mxu1 }
0x1fb8   :  { %v4356_v35 = vadd.f32 %v5654_v63, %v4907_v53  ;;  %v4350_v56 = vpop.f32.mrb[67].mxu1 }
0x1fb9   :  { %v4351_v60 = vadd.f32 %v4907_v53, %v4350_v56 }
0x1fba   :  { %v4366_v25 = vmul.f32 0.70710677, %v4356_v35  ;;  %v4362_v40 = vmul.f32 0.5, %v4356_v35 }
0x1fbb   :  { %v4365_v7 = vmul.f32 0.70710677, %v4351_v60  ;;  %v4361_v11 = vmul.f32 0.5, %v4351_v60 }
0x1fbc   :  { %6121 = verf.f32 %v4366_v25 }
0x1fbd   :  { %6123 = verf.f32 %v4365_v7 }
0x1fbe   :  { %v6118_v39 = vpop.eup %6117 }
0x1fbf   :  { %v6120_v29 = vpop.eup %6119  ;;  %v4372_v14 = vadd.f32 1.0, %v6118_v39  ;;  %v5679_v1 = vpop.f32.mrb[68].mxu1 }
0x1fc0   :  { %v4371_v54 = vadd.f32 1.0, %v6120_v29  ;;  %v4585_v31 = vadd.f32 %v5679_v1, %v4918_v18  ;;  %v4579_v34 = vpop.f32.mrb[69].mxu1 }
0x1fc1   :  { %v4580_v44 = vadd.f32 %v4918_v18, %v4579_v34  ;;  %v4376_v12 = vmul.f32 %v4372_v14, %v4360_v46 }
0x1fc2   :  { %v4375_v2 = vmul.f32 %v4371_v54, %v4359_v50  ;;  %v4603_v24 = vmul.f32 0.70710677, %v4585_v31  ;;  %v4599_v57 = vmul.f32 0.5, %v4585_v31 }
0x1fc3   :  { %v4602_v43 = vmul.f32 0.70710677, %v4580_v44  ;;  %v4598_v27 = vmul.f32 0.5, %v4580_v44 }
0x1fc4   :  { %6125 = verf.f32 %v4603_v24  ;;  %5663 = vmatprep.mubr.msk.f32.mxu0 %vm163_vm0, %v4375_v2 }
0x1fc5   :  { %6127 = verf.f32 %v4602_v43  ;;  %5664 = vmatmul.mubr.msk.f32.vlgmr.msra.gmra.mrb[64].mxu0 %vm163_vm0, %v4376_v12 }
0x1fc6   :  { %v6122_v4 = vpop.eup %6121  ;;  %5972 = vmatpush3.bf16.msra.mxu0 %v5969_v10 }
0x1fc7   :  { %v6124_v6 = vpop.eup %6123  ;;  %v4374_v8 = vadd.f32 1.0, %v6122_v4  ;;  %5974 = vmatprep.subr.bf16.mxu0 %v5973_v59 }
0x1fc8   :  { %v4373_v13 = vadd.f32 1.0, %v6124_v6 }
0x1fc9   :  { %v4378_v21 = vmul.f32 %v4374_v8, %v4362_v40 }
0x1fca   :  { %v4377_v19 = vmul.f32 %v4373_v13, %v4361_v11  ;;  %5976 = vmatpush3.bf16.msra.mxu0 %v5973_v59 }
0x1fcc   :  { %5666 = vmatprep.mubr.msk.f32.mxu0 %vm163_vm0, %v4377_v19 }
0x1fcd   :  { %5667 = vmatmul.mubr.msk.f32.gmra.mrb[66].mxu0 %vm163_vm0, %v4378_v21 }
0x1fce   :  { %v6126_v22 = vpop.eup %6125 }
0x1fcf   :  { %v6128_v0 = vpop.eup %6127  ;;  %v4611_v23 = vadd.f32 1.0, %v6126_v22 }
0x1fd0   :  { %v4610_v28 = vadd.f32 1.0, %v6128_v0 }
0x1fd1   :  { %v4615_v30 = vmul.f32 %v4611_v23, %v4599_v57 }
0x1fd2   :  { %v4614_v10 = vmul.f32 %v4610_v28, %v4598_v27 }
0x1fd4   :  { %5691 = vmatprep.mubr.msk.f32.mxu0 %vm163_vm0, %v4614_v10 }
0x1fd5   :  { %5692 = vmatmul.mubr.msk.f32.vlgmr.msra.gmra.mrb[68].mxu0 %vm163_vm0, %v4615_v30 }
0x203c   :  { %v5682_v32 = vpop.f32.mrb[70].mxu1 }
0x203d   :  { %v4595_v16 = vadd.f32 %v5682_v32, %v4918_v18  ;;  %v4589_v38 = vpop.f32.mrb[71].mxu1 }
0x203e   :  { %v4590_v41 = vadd.f32 %v4918_v18, %v4589_v38 }
0x203f   :  { %v4605_v49 = vmul.f32 0.70710677, %v4595_v16  ;;  %v4601_v26 = vmul.f32 0.5, %v4595_v16 }
0x2040   :  { %v4604_v52 = vmul.f32 0.70710677, %v4590_v41  ;;  %v4600_v53 = vmul.f32 0.5, %v4590_v41 }
0x2041   :  { %6129 = verf.f32 %v4605_v49 }
0x2042   :  { %6131 = verf.f32 %v4604_v52 }
0x204b   :  { %v6130_v61 = vpop.eup %6129 }
0x204c   :  { %v6132_v42 = vpop.eup %6131  ;;  %v4613_v51 = vadd.f32 1.0, %v6130_v61 }
0x204d   :  { %v4612_v20 = vadd.f32 1.0, %v6132_v42 }
0x204e   :  { %v4617_v37 = vmul.f32 %v4613_v51, %v4601_v26 }
0x204f   :  { %v4616_v47 = vmul.f32 %v4612_v20, %v4600_v53 }
0x2051   :  { %5694 = vmatprep.mubr.msk.f32.mxu0 %vm163_vm0, %v4616_v47 }
0x2052   :  { %5695 = vmatmul.mubr.msk.f32.gmra.mrb[70].mxu0 %vm163_vm0, %v4617_v37 }
0x2098   :  { %v5665_v62 = vpop.f32.mrb[64].mxu0 }
0x2099   :  { %v4473_v63 = vadd.f32 %v5665_v62, %v4912_v3  ;;  %v4467_v35 = vpop.f32.mrb[65].mxu0 }
0x209a   :  { %v4468_v56 = vadd.f32 %v4912_v3, %v4467_v35 }
0x209b   :  { %v4487_v60 = vadd.f32 %v4473_v63, %v7025_v17 }
0x209c   :  { %v4486_v25 = vadd.f32 %v4468_v56, %v7020_v55  ;;  %v4924_v55 = vld [vmem:[%s7195_s9 + $0x3] ss:$0 sm:$0xff]  ;;  %s6321_s9 = scalar_lea.vmem %s4744_s19, 1024 }
0x209d   :  { %4730 = vst.msk [vmem:[#allocation16 + $0x8] sm:$0xff] %vm163_vm0, %v4487_v60  ;;  %p6322_p8 = scmp.ne.s32.totalorder %s4744_s19, %s6321_s9  ;;  %p6327_p10 = scmp.lt.s32.totalorder %s6321_s9, %s6321_s9 }
0x209e   :  { %4729 = vst.msk [vmem:[#allocation16] sm:$0xff] %vm163_vm0, %v4486_v25 }
0x209f   :  { %p6328_p11 = por %p6327_p10, %p6326_p9 }
0x20a0   :  { %v5668_v7 = vpop.f32.mrb[66].mxu0 }
0x20a1   :  { %v4483_v18 = vadd.f32 %v5668_v7, %v4912_v3  ;;  %v4477_v39 = vpop.f32.mrb[67].mxu0  ;;  %p6329_p12 = pnand %p6328_p11, %p6322_p8 }
0x20a2   :  { %v4478_v29 = vadd.f32 %v4912_v3, %v4477_v39 }
0x20a3   :  { %v4489_v14 = vadd.f32 %v4483_v18, %v7035_v5 }
0x20a4   :  { %v4488_v1 = vadd.f32 %v4478_v29, %v7030_v48 }
0x20a5   :  { %4732 = vst.msk [vmem:[#allocation16 + $0x18] sm:$0xff] %vm163_vm0, %v4489_v14 }
0x20a6   :  { %4731 = vst.msk [vmem:[#allocation16 + $0x10] sm:$0xff] %vm163_vm0, %v4488_v1 }
0x20a8   :  { %v5693_v17 = vpop.f32.mrb[68].mxu0 }
0x20a9   :  { %v4712_v50 = vadd.f32 %v5693_v17, %v4924_v55  ;;  %v4706_v54 = vpop.f32.mrb[69].mxu0 }
0x20aa   :  { %v4707_v31 = vadd.f32 %v4924_v55, %v4706_v54 }
0x20ab   :  { %v4726_v34 = vadd.f32 %v4712_v50, %v7045_v9 }
0x20ac   :  { %v4725_v45 = vadd.f32 %v4707_v31, %v7040_v15 }
0x20ad   :  { %4735 = vst.msk [vmem:[#allocation16 + $0x28] sm:$0xff] %vm163_vm0, %v4726_v34 }
0x20ae   :  { %4734 = vst.msk [vmem:[#allocation16 + $0x20] sm:$0xff] %vm163_vm0, %v4725_v45 }
0x2125   :  { %v5696_v48 = vpop.f32.mrb[70].mxu0 }
0x2126   :  { %v4722_v5 = vadd.f32 %v5696_v48, %v4924_v55  ;;  %v4716_v58 = vpop.f32.mrb[71].mxu0 }
0x2127   :  { %v4717_v46 = vadd.f32 %v4924_v55, %v4716_v58 }
0x2128   :  { %v4728_v44 = vadd.f32 %v4722_v5, %v7062_v33 }
0x2129   :  { %v4727_v2 = vadd.f32 %v4717_v46, %v7057_v36 }
0x212a   :  { %4737 = vst.msk [vmem:[#allocation16 + $0x38] sm:$0xff] %vm163_vm0, %v4728_v44 }
0x212b   :  { %4736 = vst.msk [vmem:[#allocation16 + $0x30] sm:$0xff] %vm163_vm0, %v4727_v2 }
0x212c   :  { %6332 = shalt.err (!%p6329_p12)
}
0x212d   :  { %s6333_s20 = scalar_lea.hbm %s7196_s10, 1024 }
0x212e   :  { %p6334_p13 = scmp.ne.s32.totalorder %s7196_s10, %s6333_s20  ;;  %p6337_p0 = scmp.lt.u32.totalorder %s6333_s20, %s7196_s10 }
0x2130   :  { %p6339_p1 = pnand %p6337_p0, %p6334_p13 }
0x2132   :  { %6342 = shalt.err (!%p6339_p1)
}
0x2133   :  { %4749 = dma.vmem_to_hbm [thread:$0]  %s4744_s19, 1024, %s7196_s10, [#allocation4], %s6357_s25, %s6357_s25, %s6358_s26  }
0x2134   :  { %6353 = dma.done.wait [#allocation4], 1024  }
0x2135   :  { %6354 = vsyncadd [#allocation4], 4294966272 }
0x2136   :  { %4753 = vsyncpa [#allocation3], 1 }
0x2137   :  { %4754 = vsyncpa [#allocation6], 1 }
0x2138   :  { %4755 = vsyncpa [#allocation9], 1 }
0x2139   :  { %4756 = vsyncpa [#allocation12], 1 }
0x213a   :  { %4757 = vsyncpa [#allocation15], 1 }
0x213b   :  { %4758 = vsyncpa [#allocation4], 1 }

</bundles_post_ra>
